<compile_context>
chip_gen: v7x
topology: tpu7x:2x2x1
jax: 0.10.0
libtpu: 0.0.40
codegen_flags: <defaults>
</compile_context>

<pallas_src>
import functools

import jax
import jax.numpy as jnp
from jax.experimental import pallas as pl
from jax.experimental.pallas import tpu as pltpu

_LANE = 128      # vreg lane width
_SUBLANE = 8     # vreg sublane width


def _round_up(a, b):
    return (a + b - 1) // b * b


def _cdiv(a, b):
    return (a + b - 1) // b


def _vmem_capacity_bytes():
    """Physical per-core VMEM; conservative fallback = v7x (64 MiB)."""
    try:
        return int(pltpu.get_tpu_info().vmem_capacity_bytes)
    except Exception:
        return 64 * 1024 * 1024


@functools.lru_cache(maxsize=None)
def _single_buffer_supported():
    """One-time capability probe: does pipeline_mode=pl.Buffered(1) lower & run?

    Compiles/runs a trivial 8x128 kernel once (cached), so the real kernel is
    never built twice and genuine lowering/VMEM errors are never swallowed.
    """
    if not hasattr(pl, "Buffered"):
        return False

    def _probe(x_ref, o_ref):
        o_ref[...] = x_ref[...] + 1.0

    try:
        spec = pl.BlockSpec((8, 128), lambda i: (0, 0),
                            pipeline_mode=pl.Buffered(1))
        fn = pl.pallas_call(
            _probe,
            out_shape=jax.ShapeDtypeStruct((8, 128), jnp.float32),
            grid=(1,),
            in_specs=[spec],
            out_specs=pl.BlockSpec((8, 128), lambda i: (0, 0)),
        )
        jax.block_until_ready(fn(jnp.zeros((8, 128), jnp.float32)))
        return True
    except Exception:
        return False


def _finer_act(t, omega_0):
    # FINER variable-periodic activation: sin(omega_0 * (|t| + 1) * t).
    return jnp.sin(omega_0 * (jnp.abs(t) + 1.0) * t)


def _finer_residual_kernel(x_ref, w1_ref, b1_ref, w2_ref, b2_ref, o_ref,
                           *, omega_0, mxu_dtype):
    # Residual input kept in f32 for the add and the final activation.
    x = x_ref[...]
    if x.dtype != jnp.float32:
        x = x.astype(jnp.float32)

    # first_linear on the MXU (f32 accumulation always).
    xm = x if jnp.dtype(mxu_dtype) == jnp.float32 else x.astype(mxu_dtype)
    h = jnp.dot(xm, w1_ref[...], preferred_element_type=jnp.float32) + b1_ref[...]
    a = _finer_act(h, omega_0)

    # last_linear + residual + FINER activation.
    am = a if jnp.dtype(mxu_dtype) == jnp.float32 else a.astype(mxu_dtype)
    y = jnp.dot(am, w2_ref[...], preferred_element_type=jnp.float32) + b2_ref[...]
    o_ref[...] = _finer_act(y + x, omega_0).astype(o_ref.dtype)
    # TODO(synk): dropout_prc > 0.0 (train-mode nn.Dropout) is not implemented;
    # the module default 0.0 maps to nn.Identity, which is what this kernel does.


def _choose_row_tile(n_rows, f_lane, io_itemsize, tile_budget_bytes):
    """Row tile: biggest within budget, capped at 512, with >=2 (>=4) grid steps.

    512-row tiles already sit at ~85% of HBM roofline; larger tiles only add
    VMEM pressure and kill pipelining.  >=2 steps lets v7x's two TensorCores
    split the 'parallel' axis; >=4 steps for N>=256 keeps the x/out DMAs
    overlapped with compute (per-step overhead is ~0.35 us, i.e. cheap).
    """
    per_row = 2 * 2 * f_lane * io_itemsize + 6 * f_lane * 4
    cap = max(_SUBLANE, min(int(tile_budget_bytes // max(per_row, 1)), 512))
    cap -= cap % _SUBLANE
    cap = max(cap, _SUBLANE)

    n8 = _round_up(max(n_rows, 1), _SUBLANE)
    if n_rows >= 32 * _SUBLANE:        # N >= 256
        min_steps = 4
    elif n_rows >= 2 * _SUBLANE:       # N >= 16
        min_steps = 2
    else:
        min_steps = 1
    cap = min(cap, _round_up(_cdiv(n8, min_steps), _SUBLANE))

    tm = min(cap, n8)
    return max(_SUBLANE, tm - tm % _SUBLANE)


def finer_residual_layer(x, w1, b1, w2, b2, *, omega_0=30.0, tm=None,
                         matmul_dtype=None):
    """FinerResidualLayer forward.

    x: [N, F]; w1, w2: [F, F] stored as [in, out] (torch weight transposed);
    b1, b2: [F].  Requires in_features == out_features (residual add).

    matmul_dtype: optional MXU operand dtype (e.g. jnp.bfloat16).  Default f32
    for reference-level accuracy.  bf16 is ~3-4x faster on v6e/v7x MXUs and
    halves weight VMEM/DMA, but FINER's large sin arguments
    (omega_0 * (|t|+1) * t with omega_0=30) amplify bf16 rounding into phase
    errors, so it is strictly opt-in.
    """
    N, F = x.shape
    assert w1.shape == (F, F) and w2.shape == (F, F)
    assert b1.shape == (F,) and b2.shape == (F,)

    mxu_dtype = jnp.dtype(matmul_dtype) if matmul_dtype is not None else jnp.dtype(jnp.float32)
    w_itemsize = mxu_dtype.itemsize
    io_itemsize = jnp.dtype(x.dtype).itemsize

    single_buffer = _single_buffer_supported()
    w_bufs = 1 if single_buffer else 2

    # ---- VMEM budget (need-based) --------------------------------------------
    Fl = _round_up(F, _LANE)           # lane-padded extent (layout, budget only)
    Fs = _round_up(F, 16)              # sublane-padded extent (bf16-safe)
    const_bytes = w_bufs * (2 * Fs * Fl * w_itemsize + 2 * _SUBLANE * Fl * 4)

    phys = _vmem_capacity_bytes()
    headroom = 8 << 20                 # Mosaic internal scratch / semaphores
    tile_budget = phys - const_bytes - headroom
    min_tile_bytes = 2 * 2 * _SUBLANE * Fl * io_itemsize + 6 * _SUBLANE * Fl * 4
    if tile_budget < min_tile_bytes:
        # TODO(synk): K-tile the [F, F] weights (reduction grid axis marked
        # "arbitrary" + f32 accumulator scratch) so F >~ 1.5-2K fits v7x's
        # 64 MiB VMEM; until then fail loudly instead of mis-compiling.
        raise ValueError(
            f"FinerResidualLayer weights ({F}x{F}, {mxu_dtype}) do not fit VMEM "
            f"({phys >> 20} MiB); pass matmul_dtype=jnp.bfloat16 or add K-tiling.")

    if tm is None:
        tm = _choose_row_tile(N, Fl, io_itemsize, tile_budget)
    tm = max(_SUBLANE, tm - tm % _SUBLANE)
    grid = (_cdiv(N, tm),)             # ragged last row block handled by Pallas

    # Need-based VMEM limit: constants + double-buffered tiles + f32 temps.
    tile_bytes = 2 * 2 * tm * Fl * io_itemsize
    temp_bytes = 8 * tm * Fl * 4
    vmem_limit = int(min(phys, max(32 << 20,
                                   const_bytes + tile_bytes + temp_bytes + headroom)))

    # ---- operands (no row/feature padding of the activation tensor) ----------
    w1c = w1.astype(mxu_dtype)
    w2c = w2.astype(mxu_dtype)
    b1c = b1.astype(jnp.float32).reshape(1, F)
    b2c = b2.astype(jnp.float32).reshape(1, F)

    def _const_spec(shape):
        # Grid-invariant operands: constant index_map; single VMEM buffer when
        # supported (halves the weight footprint vs. the default double-buffer).
        if single_buffer:
            return pl.BlockSpec(shape, lambda i: (0, 0),
                                pipeline_mode=pl.Buffered(1))
        return pl.BlockSpec(shape, lambda i: (0, 0))

    cost = pl.CostEstimate(
        flops=4 * N * F * F,                     # two [tm,F] x [F,F] matmuls
        transcendentals=2 * N * F,               # two sin passes
        bytes_accessed=(2 * N * F * io_itemsize
                        + 2 * F * F * w_itemsize + 2 * F * 4),
    )

    kernel = functools.partial(_finer_residual_kernel,
                               omega_0=omega_0, mxu_dtype=mxu_dtype)

    return pl.pallas_call(
        kernel,
        out_shape=jax.ShapeDtypeStruct((N, F), x.dtype),
        grid_spec=pltpu.PrefetchScalarGridSpec(
            num_scalar_prefetch=0,
            grid=grid,
            in_specs=[
                pl.BlockSpec((tm, F), lambda i: (i, 0)),   # x row tile
                _const_spec((F, F)),                       # W1 (whole, resident)
                _const_spec((1, F)),                       # b1
                _const_spec((F, F)),                       # W2 (whole, resident)
                _const_spec((1, F)),                       # b2
            ],
            out_specs=pl.BlockSpec((tm, F), lambda i: (i, 0)),
        ),
        compiler_params=pltpu.CompilerParams(
            dimension_semantics=("parallel",),
            vmem_limit_bytes=vmem_limit,
        ),
        cost_estimate=cost,
    )(x, w1c, b1c, w2c, b2c)


def finer_init(key, in_features, out_features, *, omega_0, hidden_k, is_first):
    """FINER init: SIREN-style weight init + uniform(-hidden_k, hidden_k) bias.

    Weight returned as [in, out] (i.e. torch weight transposed).
    """
    kw, kb = jax.random.split(key)
    if is_first:
        w_bound = 1.0 / in_features
    else:
        w_bound = (6.0 / in_features) ** 0.5 / omega_0
    w = jax.random.uniform(kw, (in_features, out_features),
                           minval=-w_bound, maxval=w_bound, dtype=jnp.float32)
    b = jax.random.uniform(kb, (out_features,),
                           minval=-hidden_k, maxval=hidden_k, dtype=jnp.float32)
    return w, b


def reference_forward(x, w1, b1, w2, b2, omega_0):
    def act(t):
        return jnp.sin(omega_0 * (jnp.abs(t) + 1.0) * t)
    h = act(jnp.dot(x, w1, precision=jax.lax.Precision.HIGHEST) + b1)
    y = jnp.dot(h, w2, precision=jax.lax.Precision.HIGHEST) + b2
    return act(y + x)


if __name__ == "__main__":
    omega_0 = 30.0
    hidden_k = 1.0          # bias init only; keeps sin arguments moderate
    N, F = 250, 32          # small; N not a multiple of the tile -> ragged edge

    key = jax.random.PRNGKey(0)
    kx, k1, k2 = jax.random.split(key, 3)
    x = jax.random.uniform(kx, (N, F), minval=-1.0, maxval=1.0, dtype=jnp.float32)
    w1, b1 = finer_init(k1, F, F, omega_0=omega_0, hidden_k=hidden_k, is_first=False)
    w2, b2 = finer_init(k2, F, F, omega_0=omega_0, hidden_k=hidden_k, is_first=False)

    # f32 path (reference-accurate, default).
    out = jax.block_until_ready(
        finer_residual_layer(x, w1, b1, w2, b2, omega_0=omega_0))
    ref = reference_forward(x, w1, b1, w2, b2, omega_0)
    assert out.shape == (N, F)
    assert bool(jnp.allclose(out, ref, atol=2e-2, rtol=2e-2))

    # Opt-in bf16-MXU-operand path (v6e/v7x throughput option).  FINER's large
    # sin arguments amplify bf16 rounding, so only a shape/finiteness smoke test.
    out_bf16 = jax.block_until_ready(
        finer_residual_layer(x, w1, b1, w2, b2, omega_0=omega_0,
                             matmul_dtype=jnp.bfloat16))
    assert out_bf16.shape == (N, F)
    assert bool(jnp.isfinite(out_bf16).all())

    print("KERNEL_OK")
</pallas_src>

<mosaic_0001>
module attributes {stable_mosaic.version = 11 : i64} {
  func.func @_probe(%arg0: i32, %arg1: memref<8x128xf32, #tpu.memory_space<vmem>>, %arg2: memref<8x128xf32, #tpu.memory_space<vmem>>) attributes {dimension_semantics = [#tpu.dimension_semantics<arbitrary>], iteration_bounds = array<i64: 1>, scalar_prefetch = 0 : i64, scratch_operands = 0 : i64, tpu.core_type = #tpu.core_type<tc>, window_params = [{pipeline_mode = #tpu.pipeline_mode<synchronous>, transform_indices = @transform_0, window_bounds = array<i64: 8, 128>}, {pipeline_mode = #tpu.pipeline_mode<synchronous>, transform_indices = @transform_1, window_bounds = array<i64: 8, 128>}]} {
    %c0 = arith.constant 0 : index
    %c0_0 = arith.constant 0 : index
    %0 = vector.load %arg1[%c0, %c0_0] : memref<8x128xf32, #tpu.memory_space<vmem>>, vector<8x128xf32>
    %cst = arith.constant 1.000000e+00 : f32
    %1 = vector.broadcast %cst : f32 to vector<8x128xf32>
    %2 = arith.addf %0, %1 : vector<8x128xf32>
    %c0_1 = arith.constant 0 : index
    %c0_2 = arith.constant 0 : index
    %3 = vector.load %arg2[%c0_1, %c0_2] : memref<8x128xf32, #tpu.memory_space<vmem>>, vector<8x128xf32>
    tpu.vector_store %arg2[%c0_1, %c0_2], %2 {strides = array<i32>} : memref<8x128xf32, #tpu.memory_space<vmem>>, vector<8x128xf32>,
    return
  }
  func.func @transform_0(%arg0: i32) -> (i32, i32) {
    %c0_i32 = arith.constant 0 : i32
    %c0_i32_0 = arith.constant 0 : i32
    %c0_i32_1 = arith.constant 0 : i32
    return %c0_i32, %c0_i32_0 : i32, i32
  }
  func.func @transform_1(%arg0: i32) -> (i32, i32) {
    %c0_i32 = arith.constant 0 : i32
    %c0_i32_0 = arith.constant 0 : i32
    %c0_i32_1 = arith.constant 0 : i32
    return %c0_i32, %c0_i32_0 : i32, i32
  }
}

module attributes {stable_mosaic.version = 11 : i64} {
  func.func @_finer_residual_kernel(%arg0: i32, %arg1: memref<128x32xf32, #tpu.memory_space<vmem>>, %arg2: memref<32x32xf32, #tpu.memory_space<vmem>>, %arg3: memref<1x32xf32, #tpu.memory_space<vmem>>, %arg4: memref<32x32xf32, #tpu.memory_space<vmem>>, %arg5: memref<1x32xf32, #tpu.memory_space<vmem>>, %arg6: memref<128x32xf32, #tpu.memory_space<vmem>>) attributes {dimension_semantics = [#tpu.dimension_semantics<parallel>], iteration_bounds = array<i64: 2>, scalar_prefetch = 0 : i64, scratch_operands = 0 : i64, tpu.core_type = #tpu.core_type<tc>, window_params = [{transform_indices = @transform_0, window_bounds = array<i64: 128, 32>}, {pipeline_mode = #tpu.pipeline_mode<synchronous>, transform_indices = @transform_1, window_bounds = array<i64: 32, 32>}, {pipeline_mode = #tpu.pipeline_mode<synchronous>, transform_indices = @transform_2, window_bounds = array<i64: 1, 32>}, {pipeline_mode = #tpu.pipeline_mode<synchronous>, transform_indices = @transform_3, window_bounds = array<i64: 32, 32>}, {pipeline_mode = #tpu.pipeline_mode<synchronous>, transform_indices = @transform_4, window_bounds = array<i64: 1, 32>}, {transform_indices = @transform_5, window_bounds = array<i64: 128, 32>}]} {
    %c0 = arith.constant 0 : index
    %c0_0 = arith.constant 0 : index
    %0 = vector.load %arg1[%c0, %c0_0] : memref<128x32xf32, #tpu.memory_space<vmem>>, vector<128x32xf32>
    %c0_1 = arith.constant 0 : index
    %c0_2 = arith.constant 0 : index
    %1 = vector.load %arg2[%c0_1, %c0_2] : memref<32x32xf32, #tpu.memory_space<vmem>>, vector<32x32xf32>
    %cst = arith.constant dense<0.000000e+00> : vector<128x32xf32>
    %2 = tpu.matmul %0, %1, %cst {dimension_numbers = #tpu.dot_dimension_numbers<[1], [0], [0], [1], [0, 0, 1, 1], [], []>} : vector<128x32xf32>, vector<32x32xf32>, vector<128x32xf32> -> vector<128x32xf32>
    %c0_3 = arith.constant 0 : index
    %c0_4 = arith.constant 0 : index
    %3 = vector.load %arg3[%c0_3, %c0_4] : memref<1x32xf32, #tpu.memory_space<vmem>>, vector<1x32xf32>
    %4 = vector.broadcast %3 : vector<1x32xf32> to vector<128x32xf32>
    %5 = arith.addf %2, %4 : vector<128x32xf32>
    %6 = math.absf %5 : vector<128x32xf32>
    %cst_5 = arith.constant 1.000000e+00 : f32
    %7 = vector.broadcast %cst_5 : f32 to vector<128x32xf32>
    %8 = arith.addf %6, %7 : vector<128x32xf32>
    %cst_6 = arith.constant 3.000000e+01 : f32
    %9 = vector.broadcast %cst_6 : f32 to vector<128x32xf32>
    %10 = arith.mulf %9, %8 : vector<128x32xf32>
    %11 = arith.mulf %10, %5 : vector<128x32xf32>
    %12 = math.sin %11 : vector<128x32xf32>
    %c0_7 = arith.constant 0 : index
    %c0_8 = arith.constant 0 : index
    %13 = vector.load %arg4[%c0_7, %c0_8] : memref<32x32xf32, #tpu.memory_space<vmem>>, vector<32x32xf32>
    %cst_9 = arith.constant dense<0.000000e+00> : vector<128x32xf32>
    %14 = tpu.matmul %12, %13, %cst_9 {dimension_numbers = #tpu.dot_dimension_numbers<[1], [0], [0], [1], [0, 0, 1, 1], [], []>} : vector<128x32xf32>, vector<32x32xf32>, vector<128x32xf32> -> vector<128x32xf32>
    %c0_10 = arith.constant 0 : index
    %c0_11 = arith.constant 0 : index
    %15 = vector.load %arg5[%c0_10, %c0_11] : memref<1x32xf32, #tpu.memory_space<vmem>>, vector<1x32xf32>
    %16 = vector.broadcast %15 : vector<1x32xf32> to vector<128x32xf32>
    %17 = arith.addf %14, %16 : vector<128x32xf32>
    %18 = arith.addf %17, %0 : vector<128x32xf32>
    %19 = math.absf %18 : vector<128x32xf32>
    %cst_12 = arith.constant 1.000000e+00 : f32
    %20 = vector.broadcast %cst_12 : f32 to vector<128x32xf32>
    %21 = arith.addf %19, %20 : vector<128x32xf32>
    %cst_13 = arith.constant 3.000000e+01 : f32
    %22 = vector.broadcast %cst_13 : f32 to vector<128x32xf32>
    %23 = arith.mulf %22, %21 : vector<128x32xf32>
    %24 = arith.mulf %23, %18 : vector<128x32xf32>
    %25 = math.sin %24 : vector<128x32xf32>
    %c0_14 = arith.constant 0 : index
    %c0_15 = arith.constant 0 : index
    %26 = vector.load %arg6[%c0_14, %c0_15] : memref<128x32xf32, #tpu.memory_space<vmem>>, vector<128x32xf32>
    tpu.vector_store %arg6[%c0_14, %c0_15], %25 {strides = array<i32>} : memref<128x32xf32, #tpu.memory_space<vmem>>, vector<128x32xf32>,
    return
  }
  func.func @transform_0(%arg0: i32) -> (i32, i32) {
    %c0_i32 = arith.constant 0 : i32
    %c0_i32_0 = arith.constant 0 : i32
    return %arg0, %c0_i32 : i32, i32
  }
  func.func @transform_1(%arg0: i32) -> (i32, i32) {
    %c0_i32 = arith.constant 0 : i32
    %c0_i32_0 = arith.constant 0 : i32
    %c0_i32_1 = arith.constant 0 : i32
    return %c0_i32, %c0_i32_0 : i32, i32
  }
  func.func @transform_2(%arg0: i32) -> (i32, i32) {
    %c0_i32 = arith.constant 0 : i32
    %c0_i32_0 = arith.constant 0 : i32
    %c0_i32_1 = arith.constant 0 : i32
    return %c0_i32, %c0_i32_0 : i32, i32
  }
  func.func @transform_3(%arg0: i32) -> (i32, i32) {
    %c0_i32 = arith.constant 0 : i32
    %c0_i32_0 = arith.constant 0 : i32
    %c0_i32_1 = arith.constant 0 : i32
    return %c0_i32, %c0_i32_0 : i32, i32
  }
  func.func @transform_4(%arg0: i32) -> (i32, i32) {
    %c0_i32 = arith.constant 0 : i32
    %c0_i32_0 = arith.constant 0 : i32
    %c0_i32_1 = arith.constant 0 : i32
    return %c0_i32, %c0_i32_0 : i32, i32
  }
  func.func @transform_5(%arg0: i32) -> (i32, i32) {
    %c0_i32 = arith.constant 0 : i32
    %c0_i32_0 = arith.constant 0 : i32
    return %arg0, %c0_i32 : i32, i32
  }
}

</mosaic_0001>

<bundles_post_ra>
// kernel: tpu_custom_call.1
= control target key start
LH: loop header
LB: loop body
LE: loop exit
PB: predicated region body
PF: predicated region fallthrough
CT: control target
= control target key end

     0   :  { %6 = vsyncpa [#allocation3], 0  ;;  %s125_s0 = inlined_call_operand.hbm [shape: f32[8,128], index: 0, kind: input, shape index: {}]   ;;  %s126_s1 = inlined_call_operand.hbm [shape: f32[8,128], index: 1, kind: output, shape index: {}]  }
   0x1   :  { %7 = vsyncpa [#allocation4], 0  ;;  %s89_s6 = smov [#allocation2]   ;;  %s41_s10 = scalar_lea.hbm %s125_s0, 128 }
   0x2   :  { %s14_s7 = sshll.u32 %s89_s6, 4  ;;  %p42_p0 = scmp.ne.s32.totalorder %s125_s0, %s41_s10  ;;  %s15_s7 = int_to_ptr.vmem [resolvable:$true] %s14_s7 }
   0x3   :  { %p45_p1 = scmp.lt.u32.totalorder %s41_s10, %s125_s0 }
   0x5   :  { %p47_p2 = pnand %p45_p1, %p42_p0 }
   0x7   :  { %50 = shalt.err (!%p47_p2)
}
   0x8   :  { %s51_s15 = scalar_lea.vmem %s15_s7, 128  ;;  %p56_p4 = scmp.lt.s32.totalorder %s15_s7, %s15_s7 }
   0x9   :  { %p52_p3 = scmp.ne.s32.totalorder %s15_s7, %s51_s15  ;;  %p57_p5 = scmp.lt.s32.totalorder %s51_s15, %s51_s15 }
   0xb   :  { %p58_p6 = por %p57_p5, %p56_p4 }
   0xd   :  { %p59_p7 = pnand %p58_p6, %p52_p3 }
   0xf   :  { %62 = shalt.err (!%p59_p7)
}
  0x10   :  { %17 = dma.hbm_to_vmem [thread:$0]  %s125_s0, 128, %s15_s7, [#allocation3]  }
  0x11   :  { %85 = dma.done.wait [#allocation3], 128  }
  0x12   :  { %86 = vsyncadd [#allocation3], 4294967168  ;;  %s90_s18 = smov [#allocation5]   ;;  %v21_v0 = vld [vmem:[#allocation2] sm:$0xff] }
  0x13   :  { %s30_s19 = sshll.u32 %s90_s18, 4  ;;  %v22_v1 = vadd.f32 1.0, %v21_v0  ;;  %s31_s19 = int_to_ptr.vmem [resolvable:$true] %s30_s19 }
  0x14   :  { %s63_s20 = scalar_lea.vmem %s31_s19, 128  ;;  %p68_p9 = scmp.lt.s32.totalorder %s31_s19, %s31_s19 }
  0x15   :  { %23 = vst [vmem:[#allocation5] sm:$0xff] %v22_v1  ;;  %p64_p8 = scmp.ne.s32.totalorder %s31_s19, %s63_s20  ;;  %p69_p10 = scmp.lt.s32.totalorder %s63_s20, %s63_s20 }
  0x17   :  { %p70_p11 = por %p69_p10, %p68_p9 }
  0x19   :  { %p71_p12 = pnand %p70_p11, %p64_p8 }
  0x1b   :  { %74 = shalt.err (!%p71_p12)
}
  0x1c   :  { %s75_s23 = scalar_lea.hbm %s126_s1, 128 }
  0x1d   :  { %p76_p13 = scmp.ne.s32.totalorder %s126_s1, %s75_s23  ;;  %p79_p0 = scmp.lt.u32.totalorder %s75_s23, %s126_s1 }
  0x1f   :  { %p81_p1 = pnand %p79_p0, %p76_p13 }
  0x21   :  { %84 = shalt.err (!%p81_p1)
}
  0x22   :  { %33 = dma.vmem_to_hbm [thread:$0]  %s31_s19, 128, %s126_s1, [#allocation4]  }
  0x23   :  { %87 = dma.done.wait [#allocation4], 128  }
  0x24   :  { %88 = vsyncadd [#allocation4], 4294967168 }
  0x25   :  { %37 = vsyncpa [#allocation3], 1 }
  0x26   :  { %38 = vsyncpa [#allocation4], 1 }

// kernel: tpu_custom_call.1
= control target key start
LH: loop header
LB: loop body
LE: loop exit
PB: predicated region body
PF: predicated region fallthrough
CT: control target
= control target key end

     0   :  { %s4822_s18 = smov 0   ;;  %s8446_s0 = inlined_call_operand.vmem [shape: f32[250,32], index: 0, kind: input, shape index: {}]   ;;  %s8447_s1 = inlined_call_operand.vmem [shape: f32[32,32], index: 1, kind: input, shape index: {}]   ;;  %s8448_s2 = inlined_call_operand.vmem [shape: f32[1,32], index: 2, kind: input, shape index: {}]   ;;  %s8449_s3 = inlined_call_operand.vmem [shape: f32[32,32], index: 3, kind: input, shape index: {}]   ;;  %s8450_s4 = inlined_call_operand.vmem [shape: f32[1,32], index: 4, kind: input, shape index: {}]   ;;  %s8451_s5 = inlined_call_operand.vmem [shape: f32[250,32], index: 5, kind: output, shape index: {}]  }
   0x1 LB: > { %s4197_s19 = sadd.s32 4294967295, %s4784_s18   ;;  %p4201_p0 = scmp.ge.s32.totalorder %s4784_s18, 1  ;;  %s4784_s18 = sphi %s4822_s18, %s15_s18  }
   0x2   : > { %p188_p1 = scmp.lt.s32.totalorder %s4784_s18, 3 }
   0x4   : > { %p189_p2 = pnand %p4201_p0, %p188_p1 }
   0x6   : > { %192 = sbr.rel (%p189_p2) target bundleno = 1114 (0x45a), region = 40 }
   0xd   : > { %v244_v0 = vld [vmem:[%s8447_s1] sm:$0xff]  ;;  %v245_v1 = vld [vmem:[%s8447_s1 + $0x8] sm:$0xff]  ;;  %v246_v2 = vld [vmem:[%s8447_s1 + $0x10] sm:$0xff]  ;;  %s4202_s26 = sshll.u32 %s4197_s19, 4  ;;  %vm255_vm0 = vcmask 261120  }
   0xe   : > { %v4474_v3 = vpack.c.bf16 %v245_v1, %v244_v0  ;;  %v247_v4 = vld [vmem:[%s8447_s1 + $0x18] sm:$0xff]  ;;  %p217_p3 = scmp.lt.s32.totalorder %s4202_s26, 31  ;;  %v2177_v22 = vld [vmem:[%s8449_s3] sm:$0xff]  ;;  %v2178_v23 = vld [vmem:[%s8449_s3 + $0x8] sm:$0xff] }
   0xf   : > { %v4478_v5 = vpack.c.bf16 %v247_v4, %v246_v2  ;;  %v2179_v24 = vld [vmem:[%s8449_s3 + $0x10] sm:$0xff]  ;;  %v4482_v25 = vpack.c.bf16 %v2178_v23, %v2177_v22  ;;  %v2180_v26 = vld [vmem:[%s8449_s3 + $0x18] sm:$0xff]  ;;  %v4899_v28 = vld [vmem:[%s8448_s2] ss:$0 sm:$0xff] }
  0x10   : > { %4475 = vmatprep.subr.bf16.mxu0 %v4474_v3  ;;  %s8743_s26 = smov (!%p217_p3, %s4202_s26), 31  ;;  %v4486_v27 = vpack.c.bf16 %v2180_v26, %v2179_v24 }
  0x11   : > { %4477 = vmatpush3.bf16.msra.mxu0 %v4474_v3  ;;  %s4203_s29 = sshll.u32 %s8743_s26, 3  ;;  %4483 = vmatprep.subr.bf16.mxu1 %v4482_v25 }
  0x12   : > { %4479 = vmatprep.subr.bf16.mxu0 %v4478_v5  ;;  %s4850_s7 = scalar_lea.vmem %s8446_s0, %s4203_s29  ;;  %4485 = vmatpush3.bf16.msra.mxu1 %v4482_v25  ;;  %s7192_s23 = scalar_lea.vmem %s8451_s5, %s4203_s29 }
  0x13   : > { %v228_v6 = vld [vmem:[%s4850_s7] sm:$0xff]  ;;  %v229_v7 = vld [vmem:[%s4850_s7 + $0x8] sm:$0xff]  ;;  %v230_v8 = vld [vmem:[%s4850_s7 + $0x10] sm:$0xff]  ;;  %4487 = vmatprep.subr.bf16.mxu1 %v4486_v27 }
  0x14   : > { %4418 = vmatprep.mubr.msk.f32.mxu0 %vm255_vm0, %v228_v6  ;;  %v231_v9 = vld [vmem:[%s4850_s7 + $0x18] sm:$0xff]  ;;  %v232_v10 = vld [vmem:[%s4850_s7 + $0x20] sm:$0xff]  ;;  %v233_v11 = vld [vmem:[%s4850_s7 + $0x28] sm:$0xff] }
  0x15   : > { %4481 = vmatpush3.bf16.msra.mxu0 %v4478_v5  ;;  %v234_v12 = vld [vmem:[%s4850_s7 + $0x30] sm:$0xff]  ;;  %v235_v13 = vld [vmem:[%s4850_s7 + $0x38] sm:$0xff]  ;;  %v236_v14 = vld [vmem:[%s4850_s7 + $0x40] sm:$0xff] }
  0x16   : > { %v237_v15 = vld [vmem:[%s4850_s7 + $0x48] sm:$0xff]  ;;  %v238_v16 = vld [vmem:[%s4850_s7 + $0x50] sm:$0xff]  ;;  %v239_v17 = vld [vmem:[%s4850_s7 + $0x58] sm:$0xff]  ;;  %4489 = vmatpush3.bf16.msra.mxu1 %v4486_v27 }
  0x17   : > { %v240_v18 = vld [vmem:[%s4850_s7 + $0x60] sm:$0xff]  ;;  %v241_v19 = vld [vmem:[%s4850_s7 + $0x68] sm:$0xff]  ;;  %v242_v20 = vld [vmem:[%s4850_s7 + $0x70] sm:$0xff] }
  0x18   : > { %4419 = vmatmul.mubr.msk.f32.vlgmr.msra.gmra.mrb[0].mxu0 %vm255_vm0, %v229_v7  ;;  %v243_v21 = vld [vmem:[%s4850_s7 + $0x78] sm:$0xff] }
  0x19   : > { %4421 = vmatprep.mubr.msk.f32.mxu0 %vm255_vm0, %v230_v8 }
  0x1c   : > { %4422 = vmatmul.mubr.msk.f32.gmra.mrb[2].mxu0 %vm255_vm0, %v231_v9 }
  0x1d   : > { %4424 = vmatprep.mubr.msk.f32.mxu0 %vm255_vm0, %v232_v10 }
  0x20   : > { %4425 = vmatmul.mubr.msk.f32.gmra.mrb[4].mxu0 %vm255_vm0, %v233_v11 }
  0x21   : > { %4427 = vmatprep.mubr.msk.f32.mxu0 %vm255_vm0, %v234_v12 }
  0x24   : > { %4428 = vmatmul.mubr.msk.f32.gmra.mrb[6].mxu0 %vm255_vm0, %v235_v13 }
  0x25   : > { %4430 = vmatprep.mubr.msk.f32.mxu0 %vm255_vm0, %v236_v14 }
  0x28   : > { %4431 = vmatmul.mubr.msk.f32.gmra.mrb[8].mxu0 %vm255_vm0, %v237_v15 }
  0x29   : > { %4433 = vmatprep.mubr.msk.f32.mxu0 %vm255_vm0, %v238_v16 }
  0x2c   : > { %4434 = vmatmul.mubr.msk.f32.gmra.mrb[10].mxu0 %vm255_vm0, %v239_v17 }
  0x2d   : > { %4436 = vmatprep.mubr.msk.f32.mxu0 %vm255_vm0, %v240_v18 }
  0x30   : > { %4437 = vmatmul.mubr.msk.f32.gmra.mrb[12].mxu0 %vm255_vm0, %v241_v19 }
  0x31   : > { %4439 = vmatprep.mubr.msk.f32.mxu0 %vm255_vm0, %v242_v20 }
  0x34   : > { %4440 = vmatmul.mubr.msk.f32.gmra.mrb[14].mxu0 %vm255_vm0, %v243_v21 }
  0xeb   : > { %v4420_v29 = vpop.f32.mrb[0].mxu0 }
  0xec   : > { %v376_v30 = vadd.f32 %v4420_v29, %v4899_v28  ;;  %v370_v31 = vpop.f32.mrb[1].mxu0 }
  0xed   : > { %v371_v33 = vadd.f32 %v4899_v28, %v370_v31 }
  0xee   : > { %v450_v32 = vand.u32 2147483647, %v376_v30 }
  0xef   : > { %v4423_v34 = vpop.f32.mrb[2].mxu0  ;;  %v449_v38 = vand.u32 2147483647, %v371_v33 }
  0xf0   : > { %v466_v35 = vadd.f32 1.0, %v450_v32  ;;  %v380_v36 = vpop.f32.mrb[3].mxu0  ;;  %v386_v37 = vadd.f32 %v4423_v34, %v4899_v28 }
  0xf1   : > { %v381_v39 = vadd.f32 %v4899_v28, %v380_v36  ;;  %v465_v44 = vadd.f32 1.0, %v449_v38 }
  0xf2   : > { %v482_v41 = vmul.f32 30.0, %v466_v35  ;;  %v452_v43 = vand.u32 2147483647, %v386_v37 }
  0xf3   : > { %v4426_v40 = vpop.f32.mrb[4].mxu0  ;;  %v451_v45 = vand.u32 2147483647, %v381_v39  ;;  %v481_v51 = vmul.f32 30.0, %v465_v44 }
  0xf4   : > { %v390_v42 = vpop.f32.mrb[5].mxu0  ;;  %v396_v46 = vadd.f32 %v4426_v40, %v4899_v28  ;;  %v4906_v48 = vmul.f32 %v482_v41, %v376_v30  ;;  %v468_v50 = vadd.f32 1.0, %v452_v43 }
  0xf5   : > { %v467_v52 = vadd.f32 1.0, %v451_v45  ;;  %v4909_v58 = vmul.f32 %v481_v51, %v371_v33  ;;  %v391_v63 = vadd.f32 %v4899_v28, %v390_v42 }
  0xf6   : > { %v454_v53 = vand.u32 2147483647, %v396_v46  ;;  %v620_v55 = vand.u32 2139095040, %v4906_v48  ;;  %v484_v57 = vmul.f32 30.0, %v468_v50 }
  0xf7   : > { %v4429_v47 = vpop.f32.mrb[6].mxu0  ;;  %v483_v59 = vmul.f32 30.0, %v467_v52  ;;  %v516_v2 = vand.u32 2139095040, %v4909_v58  ;;  %v453_v8 = vand.u32 2147483647, %v391_v63 }
  0xf8   : > { %v400_v49 = vpop.f32.mrb[7].mxu0  ;;  %v470_v60 = vadd.f32 1.0, %v454_v53  ;;  %v621_v62 = vshrl.u32 %v620_v55, 23  ;;  %v4912_v1 = vmul.f32 %v484_v57, %v386_v37  ;;  %v406_v5 = vadd.f32 %v4429_v47, %v4899_v28 }
  0xf9   : > { %v4915_v3 = vmul.f32 %v483_v59, %v381_v39  ;;  %v517_v11 = vshrl.u32 %v516_v2, 23  ;;  %v469_v17 = vadd.f32 1.0, %v453_v8  ;;  %v401_v18 = vadd.f32 %v4899_v28, %v400_v49 }
  0xfa   : > { %v486_v4 = vmul.f32 30.0, %v470_v60  ;;  %v4227_v7 = vadd.s32 4294967169, %v621_v62  ;;  %v828_v10 = vand.u32 2139095040, %v4912_v1  ;;  %v456_v14 = vand.u32 2147483647, %v406_v5 }
  0xfb   : > { %v4432_v54 = vpop.f32.mrb[8].mxu0  ;;  %v724_v12 = vand.u32 2139095040, %v4915_v3  ;;  %v4223_v21 = vadd.s32 4294967169, %v517_v11  ;;  %v485_v25 = vmul.f32 30.0, %v469_v17  ;;  %v455_v26 = vand.u32 2147483647, %v401_v18 }
  0xfc   : > { %v410_v56 = vpop.f32.mrb[9].mxu0  ;;  %v4924_v13 = vmul.f32 %v486_v4, %v396_v46  ;;  %v627_v16 = vadd.s32 1, %v4227_v7  ;;  %v829_v20 = vshrl.u32 %v828_v10, 23  ;;  %v472_v24 = vadd.f32 1.0, %v456_v14 }
  0xfd   : > { %v725_v22 = vshrl.u32 %v724_v12, 23  ;;  %v523_v29 = vadd.s32 1, %v4223_v21  ;;  %v4932_v34 = vmul.f32 %v485_v25, %v391_v63  ;;  %v471_v35 = vadd.f32 1.0, %v455_v26 }
  0xfe   : > { %8548 = vst [vmem:[#allocation2_spill] sm:$0xff] %v4924_v13  ;;  %v1036_v23 = vand.u32 2139095040, %v4924_v13  ;;  %vm628_vm1 = vcmp.gt.s32.totalorder %v627_v16, 0  ;;  %v4235_v27 = vadd.s32 4294967169, %v829_v20  ;;  %v488_v31 = vmul.f32 30.0, %v472_v24 }
  0xff   : > { %v4435_v61 = vpop.f32.mrb[10].mxu0  ;;  %v4231_v30 = vadd.s32 4294967169, %v725_v22  ;;  %v629_v32 = vsel %vm628_vm1, %v627_v16, 0  ;;  %v416_v36 = vadd.f32 %v4432_v54, %v4899_v28  ;;  %v411_v38 = vadd.f32 %v4899_v28, %v410_v56 }
 0x100   : > { %v420_v0 = vpop.f32.mrb[11].mxu0  ;;  %v1037_v33 = vshrl.u32 %v1036_v23, 23  ;;  %v835_v37 = vadd.s32 1, %v4235_v27  ;;  %v4936_v39 = vand.u32 31, %v629_v32  ;;  %vm524_vm2 = vcmp.gt.s32.totalorder %v523_v29, 0 }
 0x101   : > { %v731_v40 = vadd.s32 1, %v4231_v30  ;;  %v4938_v41 = vmul.f32 %v488_v31, %v406_v5  ;;  %v487_v43 = vmul.f32 30.0, %v471_v35  ;;  %v458_v44 = vand.u32 2147483647, %v416_v36 }
 0x102   : > { %v4243_v42 = vadd.s32 4294967169, %v1037_v33  ;;  %v932_v45 = vand.u32 2139095040, %v4932_v34  ;;  %v457_v46 = vand.u32 2147483647, %v411_v38  ;;  %v525_v47 = vsel %vm524_vm2, %v523_v29, 0 }
 0x103   : > { %v4918_v6 = vpop.f32.mrb[12].mxu0  ;;  %8549 = vst [vmem:[#allocation3_spill] sm:$0xff] %v4938_v41  ;;  %vm836_vm3 = vcmp.gt.s32.totalorder %v835_v37, 0  ;;  %v4942_v49 = vsub.s32 32, %v4936_v39  ;;  %vm732_vm4 = vcmp.gt.s32.totalorder %v731_v40, 0  ;;  %v1244_v50 = vand.u32 2139095040, %v4938_v41 }
 0x104   : > { %v4920_v9 = vpop.f32.mrb[13].mxu0  ;;  %v474_v51 = vadd.f32 1.0, %v458_v44  ;;  %v1043_v52 = vadd.s32 1, %v4243_v42  ;;  %v4945_v53 = vmul.f32 %v487_v43, %v401_v18  ;;  %v473_v54 = vadd.f32 1.0, %v457_v46 }
 0x105   : > { %v426_v55 = vadd.f32 %v4435_v61, %v4899_v28  ;;  %v837_v56 = vsel %vm836_vm3, %v835_v37, 0  ;;  %v933_v57 = vshrl.u32 %v932_v45, 23  ;;  %v4949_v60 = vadd.f32 %v4899_v28, %v420_v0 }
 0x106   : > { %8550 = vst [vmem:[#allocation4_spill] sm:$0xff] %v4945_v53  ;;  %v490_v59 = vmul.f32 30.0, %v474_v51  ;;  %v4951_v62 = vshrl.u32 %v629_v32, 5  ;;  %v4953_v63 = vshrl.u32 %v525_v47, 5  ;;  %v4955_v2 = vand.u32 31, %v525_v47 }
 0x107   : > { %v4926_v15 = vpop.f32.mrb[14].mxu0  ;;  %v460_v4 = vand.u32 2147483647, %v426_v55  ;;  %v8452_v5 = vmov 2102212464   ;;  %v1245_v10 = vshrl.u32 %v1244_v50, 23 }
 0x108   : > { %v4929_v19 = vpop.f32.mrb[15].mxu0  ;;  %v643_v7 = vshll.u32 %v8452_v5, %v4936_v39  ;;  %v8479_v8 = vmov 920167782   ;;  %v489_v11 = vmul.f32 30.0, %v473_v54  ;;  %v4961_v12 = vand.u32 31, %v837_v56 }
 0x109   : > { %v644_v61 = vshrl.u32 %v8479_v8, %v4942_v49  ;;  %v733_v0 = vsel %vm732_vm4, %v731_v40, 0  ;;  %vm1044_vm5 = vcmp.gt.s32.totalorder %v1043_v52, 0  ;;  %v1140_v14 = vand.u32 2139095040, %v4945_v53 }
 0x10a   : > { %v646_v16 = vshll.u32 %v8479_v8, %v4936_v39  ;;  %v4239_v17 = vadd.s32 4294967169, %v933_v57  ;;  %v4967_v18 = vmul.f32 %v490_v59, %v416_v36  ;;  %v459_v20 = vand.u32 2147483647, %v4949_v60 }
 0x10b   : > { %v8471_v21 = vmov 1326507024   ;;  %vm652_vm6 = vcmp.lt.s32.totalorder %v4951_v62, 4  ;;  %v4974_v23 = vsub.s32 32, %v4955_v2  ;;  %v476_v24 = vadd.f32 1.0, %v460_v4 }
 0x10c   : > { %8551 = vst [vmem:[#allocation5_spill] sm:$0xff] %v4967_v18  ;;  %v647_v22 = vshrl.u32 %v8471_v21, %v4942_v49  ;;  %v4976_v25 = vand.u32 31, %v733_v0  ;;  %v1045_v26 = vsel %vm1044_vm5, %v1043_v52, 0  ;;  %v4251_v27 = vadd.s32 4294967169, %v1245_v10 }
 0x10d   : > { %v4978_v29 = vmul.f32 %v489_v11, %v411_v38  ;;  %v4980_v30 = vor.u32 %v644_v61, %v643_v7  ;;  %v4983_v31 = vsub.s32 32, %v4961_v12  ;;  %v1141_v32 = vshrl.u32 %v1140_v14, 23 }
 0x10e   : > { %v492_v33 = vmul.f32 30.0, %v476_v24  ;;  %v4985_v35 = vshrl.u32 %v837_v56, 5  ;;  %v939_v36 = vadd.s32 1, %v4239_v17  ;;  %v1452_v37 = vand.u32 2139095040, %v4967_v18 }
 0x10f   : > { %8552 = vst [vmem:[#allocation6_spill] sm:$0xff] %v4978_v29  ;;  %v475_v40 = vadd.f32 1.0, %v459_v20  ;;  %v648_v42 = vor.u32 %v647_v22, %v646_v16  ;;  %v851_v43 = vshll.u32 %v8452_v5, %v4961_v12  ;;  %v4990_v44 = vshrl.u32 %v733_v0, 5 }
 0x110   : > { %v4992_v38 = vand.u32 31, %v1045_v26  ;;  %v4995_v45 = vsub.s32 32, %v4976_v25  ;;  %v1251_v46 = vadd.s32 1, %v4251_v27  ;;  %v1348_v47 = vand.u32 2139095040, %v4978_v29 }
 0x111   : > { %v4998_v50 = vmul.f32 %v492_v33, %v426_v55  ;;  %v5003_v51 = vsel %vm652_vm6, %v4980_v30, 920167782  ;;  %v852_v52 = vshrl.u32 %v8479_v8, %v4983_v31  ;;  %v854_v54 = vshll.u32 %v8479_v8, %v4961_v12 }
 0x112   : > { %8553 = vst [vmem:[#allocation7_spill] sm:$0xff] %v4992_v38  ;;  %v4247_v56 = vadd.s32 4294967169, %v1141_v32  ;;  %v855_v57 = vshrl.u32 %v8471_v21, %v4983_v31  ;;  %vm860_vm7 = vcmp.lt.s32.totalorder %v4985_v35, 4  ;;  %vm940_vm8 = vcmp.gt.s32.totalorder %v939_v36, 0 }
 0x113   : > { %8554 = vst [vmem:[#allocation8_spill] sm:$0xff] %v4998_v50  ;;  %v1453_v55 = vshrl.u32 %v1452_v37, 23  ;;  %v491_v59 = vmul.f32 30.0, %v475_v40  ;;  %v5014_v4 = vsel %vm652_vm6, %v648_v42, 1326507024  ;;  %v747_v7 = vshll.u32 %v8452_v5, %v4976_v25 }
 0x114   : > { %v5019_v61 = vsub.s32 32, %v4992_v38  ;;  %v1660_v10 = vand.u32 2139095040, %v4998_v50  ;;  %v748_v11 = vshrl.u32 %v8479_v8, %v4995_v45  ;;  %v750_v0 = vshll.u32 %v8479_v8, %v4976_v25 }
 0x115   : > { %vm1252_vm9 = vcmp.gt.s32.totalorder %v1251_v46, 0  ;;  %v1349_v14 = vshrl.u32 %v1348_v47, 23  ;;  %v751_v16 = vshrl.u32 %v8471_v21, %v4995_v45  ;;  %vm756_vm10 = vcmp.lt.s32.totalorder %v4990_v44, 4 }
 0x116   : > { %8555 = vst [vmem:[#allocation9_spill] sm:$0xff] %v5019_v61  ;;  %v941_v17 = vsel %vm940_vm8, %v939_v36, 0  ;;  %v1147_v20 = vadd.s32 1, %v4247_v56  ;;  %v5029_v22 = vor.u32 %v852_v52, %v851_v43  ;;  %v856_v24 = vor.u32 %v855_v57, %v854_v54 }
 0x117   : > { %v4259_v27 = vadd.s32 4294967169, %v1453_v55  ;;  %v5032_v32 = vmul.f32 %v491_v59, %v4949_v60  ;;  %v1060_v33 = vshrl.u32 %v8479_v8, %v5019_v61  ;;  %v1253_v37 = vsel %vm1252_vm9, %v1251_v46, 0 }
 0x118   : > { %v1661_v40 = vshrl.u32 %v1660_v10, 23  ;;  %v436_v42 = vadd.f32 %v4918_v6, %v4899_v28  ;;  %v5038_v47 = vor.u32 %v748_v11, %v747_v7  ;;  %v1063_v36 = vshrl.u32 %v8471_v21, %v5019_v61 }
 0x119   : > { %8556 = vst [vmem:[#allocation10_spill] sm:$0xff] %v5032_v32  ;;  %v5042_v43 = vand.u32 31, %v941_v17  ;;  %v4255_v52 = vadd.s32 4294967169, %v1349_v14  ;;  %v752_v54 = vor.u32 %v751_v16, %v750_v0  ;;  %v5044_v56 = vshrl.u32 %v1045_v26, 5 }
 0x11a   : > { %v1059_v60 = vshll.u32 %v8452_v5, %v4992_v38  ;;  %vm1148_vm11 = vcmp.gt.s32.totalorder %v1147_v20, 0  ;;  %v1062_v46 = vshll.u32 %v8479_v8, %v4992_v38  ;;  %v5050_v57 = vand.u32 31, %v1253_v37 }
 0x11b   : > { %8557 = vst [vmem:[#allocation11_spill] sm:$0xff] %v5044_v56  ;;  %v1459_v6 = vadd.s32 1, %v4259_v27  ;;  %v1556_v55 = vand.u32 2139095040, %v5032_v32  ;;  %v5056_v59 = vsel %vm860_vm7, %v5029_v22, 920167782  ;;  %v4267_v26 = vadd.s32 4294967169, %v1661_v40 }
 0x11c   : > { %8558 = vst [vmem:[#allocation12_spill] sm:$0xff] %v5050_v57  ;;  %v5058_v7 = vor.u32 %v1060_v33, %v1059_v60  ;;  %v462_v10 = vand.u32 2147483647, %v436_v42  ;;  %v1064_v11 = vor.u32 %v1063_v36, %v1062_v46  ;;  %v5061_v0 = vsub.s32 32, %v5042_v43 }
 0x11d   : > { %v1149_v14 = vsel %vm1148_vm11, %v1147_v20, 0  ;;  %v1355_v16 = vadd.s32 1, %v4255_v52  ;;  %v5065_v27 = vsel %vm860_vm7, %v856_v24, 1326507024  ;;  %v5070_v5 = vsel %vm756_vm10, %v5038_v47, 920167782 }
 0x11e   : > { %8559 = vst [vmem:[#allocation13_spill] sm:$0xff] %v5058_v7  ;;  %vm1068_vm12 = vcmp.lt.s32.totalorder %v5044_v56, 4  ;;  %v1557_v33 = vshrl.u32 %v1556_v55, 23  ;;  %v5073_v40 = vshrl.u32 %v941_v17, 5  ;;  %v5076_v36 = vsub.s32 32, %v5050_v57 }
 0x11f   : > { %vm1460_vm13 = vcmp.gt.s32.totalorder %v1459_v6, 0  ;;  %v478_v20 = vadd.f32 1.0, %v462_v10  ;;  %v5080_v52 = vsel %vm756_vm10, %v752_v54, 1326507024  ;;  %v5085_v24 = vsel %vm1068_vm12, %v5058_v7, 920167782 }
 0x120   : > { %8560 = vst [vmem:[#allocation14_spill] sm:$0xff] %v5076_v36  ;;  %8561 = vst [vmem:[#allocation15_spill] sm:$0xff] %v5085_v24  ;;  %v5087_v60 = vand.u32 31, %v1149_v14  ;;  %v1667_v46 = vadd.s32 1, %v4267_v26  ;;  %v5091_v17 = vsel %vm1068_vm12, %v1064_v11, 1326507024  ;;  %v956_v55 = vshrl.u32 %v8479_v8, %v5061_v0 }
 0x121   : > { %8563 = vst [vmem:[#allocation17_spill] sm:$0xff] %v5091_v17  ;;  %v959_v10 = vshrl.u32 %v8471_v21, %v5061_v0  ;;  %vm1356_vm14 = vcmp.gt.s32.totalorder %v1355_v16, 0  ;;  %v8564_v54 = vmov 2102212464   ;;  %v1461_v32 = vsel %vm1460_vm13, %v1459_v6, 0 }
 0x122   : > { %8562 = vst [vmem:[#allocation16_spill] sm:$0xff] %v5087_v60  ;;  %v955_v50 = vshll.u32 %v8564_v54, %v5042_v43  ;;  %v4263_v18 = vadd.s32 4294967169, %v1557_v33  ;;  %v5101_v29 = vadd.f32 %v4899_v28, %v4920_v9  ;;  %v958_v26 = vshll.u32 %v8479_v8, %v5042_v43 }
 0x123   : > { %vm964_vm15 = vcmp.lt.s32.totalorder %v5073_v40, 4  ;;  %v1268_v11 = vshrl.u32 %v8479_v8, %v5076_v36  ;;  %v494_v41 = vmul.f32 30.0, %v478_v20  ;;  %v1271_v53 = vshrl.u32 %v8471_v21, %v5076_v36 }
 0x124   : > { %v5111_v7 = vsub.s32 32, %v5087_v60  ;;  %v1357_v6 = vsel %vm1356_vm14, %v1355_v16, 0  ;;  %vm1668_vm1 = vcmp.gt.s32.totalorder %v1667_v46, 0  ;;  %v5113_v33 = vor.u32 %v956_v55, %v955_v50 }
 0x125   : > { %v960_v9 = vor.u32 %v959_v10, %v958_v26  ;;  %v5115_v17 = vshrl.u32 %v1253_v37, 5  ;;  %v5117_v24 = vand.u32 31, %v1461_v32  ;;  %v1267_v56 = vshll.u32 %v8564_v54, %v5050_v57 }
 0x126   : > { %8565 = vst [vmem:[#allocation18_spill] sm:$0xff] %v5111_v7  ;;  %8566 = vst [vmem:[#allocation19_spill] sm:$0xff] %v5113_v33  ;;  %v1270_v20 = vshll.u32 %v8479_v8, %v5050_v57  ;;  %v1563_v61 = vadd.s32 1, %v4263_v18  ;;  %v461_v21 = vand.u32 2147483647, %v5101_v29  ;;  %v5124_v36 = vshrl.u32 %v1149_v14, 5 }
 0x127   : > { %8567 = vst [vmem:[#allocation20_spill] sm:$0xff] %v5115_v17  ;;  %8568 = vst [vmem:[#allocation21_spill] sm:$0xff] %v5117_v24  ;;  %v5126_v16 = vand.u32 31, %v1357_v6  ;;  %v1669_v50 = vsel %vm1668_vm1, %v1667_v46, 0  ;;  %v5128_v55 = vmul.f32 %v494_v41, %v436_v42  ;;  %v5130_v37 = vor.u32 %v1268_v11, %v1267_v56 }
 0x128   : > { %8569 = vst [vmem:[#allocation22_spill] sm:$0xff] %v5124_v36  ;;  %v1272_v10 = vor.u32 %v1271_v53, %v1270_v20  ;;  %v1164_v26 = vshrl.u32 %v8479_v8, %v5111_v7  ;;  %v8573_v38 = vmov 1326507024   ;;  %v5139_v18 = vsel %vm964_vm15, %v5113_v33, 920167782 }
 0x129   : > { %8570 = vst [vmem:[#allocation23_spill] sm:$0xff] %v5126_v16  ;;  %8571 = vst [vmem:[#allocation24_spill] sm:$0xff] %v5128_v55  ;;  %v1167_v13 = vshrl.u32 %v8573_v38, %v5111_v7  ;;  %v5143_v14 = vsel %vm964_vm15, %v960_v9, 1326507024  ;;  %v1163_v41 = vshll.u32 %v8564_v54, %v5087_v60  ;;  %v5148_v53 = vsub.s32 32, %v5117_v24 }
 0x12a   : > { %8572 = vst [vmem:[#allocation25_spill] sm:$0xff] %v5130_v37  ;;  %8574 = vst [vmem:[#allocation26_spill] sm:$0xff] %v5139_v18  ;;  %v1166_v42 = vshll.u32 %v8479_v8, %v5087_v60  ;;  %v5152_v56 = vand.u32 31, %v1669_v50  ;;  %vm1564_vm2 = vcmp.gt.s32.totalorder %v1563_v61, 0  ;;  %v477_v46 = vadd.f32 1.0, %v461_v21 }
 0x12b   : > { %8575 = vst [vmem:[#allocation27_spill] sm:$0xff] %v5148_v53  ;;  %vm1276_vm3 = vcmp.lt.s32.totalorder %v5115_v17, 4  ;;  %vm1172_vm4 = vcmp.lt.s32.totalorder %v5124_v36, 4  ;;  %v5157_v11 = vsub.s32 32, %v5126_v16  ;;  %v1868_v9 = vand.u32 2139095040, %v5128_v55 }
 0x12c   : > { %8576 = vst [vmem:[#allocation28_spill] sm:$0xff] %v5152_v56  ;;  %v5163_v20 = vsel %vm1276_vm3, %v5130_v37, 920167782  ;;  %v5167_v8 = vsel %vm1276_vm3, %v1272_v10, 1326507024  ;;  %v5169_v57 = vor.u32 %v1164_v26, %v1163_v41  ;;  %v1168_v21 = vor.u32 %v1167_v13, %v1166_v42 }
 0x12d   : > { %8577 = vst [vmem:[#allocation29_spill] sm:$0xff] %v5157_v11  ;;  %8578 = vst [vmem:[#allocation30_spill] sm:$0xff] %v5163_v20  ;;  %v8581_v60 = vmov 920167782   ;;  %v1479_v18 = vshrl.u32 %v8573_v38, %v5148_v53  ;;  %v1565_v33 = vsel %vm1564_vm2, %v1563_v61, 0  ;;  %v5177_v55 = vadd.f32 %v4926_v15, %v4899_v28 }
 0x12e   : > { %8579 = vst [vmem:[#allocation31_spill] sm:$0xff] %v5167_v8  ;;  %8580 = vst [vmem:[#allocation32_spill] sm:$0xff] %v5169_v57  ;;  %v1476_v7 = vshrl.u32 %v8581_v60, %v5148_v53  ;;  %v5179_v37 = vshrl.u32 %v1461_v32, 5  ;;  %v1475_v10 = vshll.u32 %v8564_v54, %v5117_v24  ;;  %v5184_v26 = vsub.s32 32, %v5152_v56 }
 0x12f   : > { %v493_v13 = vmul.f32 30.0, %v477_v46  ;;  %v1478_v41 = vshll.u32 %v8581_v60, %v5117_v24  ;;  %v1372_v42 = vshrl.u32 %v8581_v60, %v5157_v11  ;;  %v1375_v61 = vshrl.u32 %v8573_v38, %v5157_v11 }
 0x130   : > { %8582 = vst [vmem:[#allocation33_spill] sm:$0xff] %v5179_v37  ;;  %8583 = vst [vmem:[#allocation34_spill] sm:$0xff] %v5184_v26  ;;  %v1869_v15 = vshrl.u32 %v1868_v9, 23  ;;  %v5195_v32 = vsel %vm1172_vm4, %v5169_v57, 920167782  ;;  %v5197_v53 = vshrl.u32 %v1357_v6, 5  ;;  %v1371_v46 = vshll.u32 %v8564_v54, %v5126_v16 }
 0x131   : > { %8584 = vst [vmem:[#allocation35_spill] sm:$0xff] %v5195_v32  ;;  %v5201_v8 = vand.u32 31, %v1565_v33  ;;  %v5203_v24 = vor.u32 %v1476_v7, %v1475_v10  ;;  %v1480_v20 = vor.u32 %v1479_v18, %v1478_v41  ;;  %v1374_v17 = vshll.u32 %v8581_v60, %v5126_v16 }
 0x132   : > { %8585 = vst [vmem:[#allocation36_spill] sm:$0xff] %v5197_v53  ;;  %v464_v9 = vand.u32 2147483647, %v5177_v55  ;;  %v5210_v11 = vsel %vm1172_vm4, %v1168_v21, 1326507024  ;;  %v1684_v6 = vshrl.u32 %v8581_v60, %v5184_v26  ;;  %v5215_v57 = vmul.f32 %v493_v13, %v5101_v29 }
 0x133   : > { %8586 = vst [vmem:[#allocation37_spill] sm:$0xff] %v5201_v8  ;;  %8587 = vst [vmem:[#allocation38_spill] sm:$0xff] %v5203_v24  ;;  %v5219_v7 = vadd.f32 %v4899_v28, %v4929_v19  ;;  %vm8546_vm5 = vcmp.lt.s32.totalorder %v5179_v37, 4  ;;  %v5222_v18 = vor.u32 %v1372_v42, %v1371_v46  ;;  %v1376_v10 = vor.u32 %v1375_v61, %v1374_v17 }
 0x134   : > { %8588 = vst [vmem:[#allocation39_spill] sm:$0xff] %v5210_v11  ;;  %8589 = vst [vmem:[#allocation40_spill] sm:$0xff] %v5215_v57  ;;  %v4275_v41 = vadd.s32 4294967169, %v1869_v15  ;;  %vm8547_vm8 = vcmp.lt.s32.totalorder %v5197_v53, 4  ;;  %v5225_v21 = vshrl.u32 %v1669_v50, 5  ;;  %v1683_v16 = vshll.u32 %v8564_v54, %v5152_v56 }
 0x135   : > { %8590 = vst [vmem:[#allocation41_spill] sm:$0xff] %v5222_v18  ;;  %v5230_v29 = vsub.s32 32, %v5201_v8  ;;  %v5235_v28 = vsel %vm8546_vm5, %v5203_v24, 920167782  ;;  %v5239_v19 = vsel %vm8546_vm5, %v1480_v20, 1326507024  ;;  %v1687_v17 = vshrl.u32 %v8573_v38, %v5184_v26 }
 0x136   : > { %8591 = vst [vmem:[#allocation42_spill] sm:$0xff] %v5225_v21  ;;  %8593 = vst [vmem:[#allocation44_spill] sm:$0xff] %v5235_v28  ;;  %v480_v50 = vadd.f32 1.0, %v464_v9  ;;  %v5243_v13 = vor.u32 %v1684_v6, %v1683_v16  ;;  %v5245_v42 = vshrl.u32 %v1565_v33, 5  ;;  %v1764_v61 = vand.u32 2139095040, %v5215_v57 }
 0x137   : > { %8592 = vst [vmem:[#allocation43_spill] sm:$0xff] %v5230_v29  ;;  %8594 = vst [vmem:[#allocation45_spill] sm:$0xff] %v5239_v19  ;;  %v463_v15 = vand.u32 2147483647, %v5219_v7  ;;  %v5252_v46 = vsel %vm8547_vm8, %v5222_v18, 920167782  ;;  %v1686_v9 = vshll.u32 %v8581_v60, %v5152_v56  ;;  %v1580_v33 = vshrl.u32 %v8581_v60, %v5230_v29 }
 0x138   : > { %8595 = vst [vmem:[#allocation46_spill] sm:$0xff] %v5243_v13  ;;  %8596 = vst [vmem:[#allocation47_spill] sm:$0xff] %v5245_v42  ;;  %v5256_v20 = vsel %vm8547_vm8, %v1376_v10, 1326507024  ;;  %v1875_v16 = vadd.s32 1, %v4275_v41  ;;  %vm8531_vm9 = vcmp.lt.s32.totalorder %v5225_v21, 4  ;;  %v1583_v6 = vshrl.u32 %v8573_v38, %v5230_v29 }
 0x139   : > { %8597 = vst [vmem:[#allocation48_spill] sm:$0xff] %v5252_v46  ;;  %8598 = vst [vmem:[#allocation49_spill] sm:$0xff] %v5256_v20  ;;  %v1688_v26 = vor.u32 %v1687_v17, %v1686_v9  ;;  %v1579_v28 = vshll.u32 %v8564_v54, %v5201_v8  ;;  %v1582_v10 = vshll.u32 %v8581_v60, %v5201_v8  ;;  %v496_v24 = vmul.f32 30.0, %v480_v50 }
 0x13a   : > { %v5273_v41 = vsel %vm8531_vm9, %v5243_v13, 920167782  ;;  %vm8545_vm11 = vcmp.lt.s32.totalorder %v5245_v42, 4  ;;  %v1765_v56 = vshrl.u32 %v1764_v61, 23  ;;  %v479_v19 = vadd.f32 1.0, %v463_v15 }
 0x13b   : > { %8599 = vst [vmem:[#allocation50_spill] sm:$0xff] %v5273_v41  ;;  %vm1876_vm13 = vcmp.gt.s32.totalorder %v1875_v16, 0  ;;  %v8516_v29 = vmov 2475754826   ;;  %v8519_v9 = vmov 2131351028   ;;  %v537_v50 = vshrl.u32 %v8564_v54, %v4974_v23 }
 0x13c   : > { %v531_v17 = vshrl.u32 %v8516_v29, %v4974_v23  ;;  %v534_v57 = vshrl.u32 %v8519_v9, %v4974_v23  ;;  %v5282_v8 = vor.u32 %v1580_v33, %v1579_v28  ;;  %v1584_v13 = vor.u32 %v1583_v6, %v1582_v10 }
 0x13d   : > { %v8601_v41 = vand.u32 2147483647, %v4909_v58  ;;  %v540_v61 = vshrl.u32 %v8581_v60, %v4974_v23  ;;  %v5289_v15 = vmul.f32 %v496_v24, %v5177_v55  ;;  %v8523_v29 = vmov 683565275  }
 0x13e   : > { %8600 = vst [vmem:[#allocation51_spill] sm:$0xff] %v5282_v8  ;;  %v530_v18 = vshll.u32 %v8523_v29, %v4955_v2  ;;  %v8603_v9 = vmov 2475754826   ;;  %v8604_v28 = vmov 2131351028   ;;  %v1877_v6 = vsel %vm1876_vm13, %v1875_v16, 0 }
 0x13f   : > { %v520_v37 = vand.u32 8388607, %v8601_v41  ;;  %8602 = vst [vmem:[#allocation52_spill] sm:$0xff] %v5289_v15  ;;  %v533_v20 = vshll.u32 %v8603_v9, %v4955_v2  ;;  %v536_v33 = vshll.u32 %v8604_v28, %v4955_v2  ;;  %v4271_v10 = vadd.s32 4294967169, %v1765_v56 }
 0x140   : > { %v539_v41 = vshll.u32 %v8564_v54, %v4955_v2  ;;  %v543_v46 = vshrl.u32 %v8573_v38, %v4974_v23  ;;  %v532_v24 = vor.u32 %v531_v17, %v530_v18  ;;  %v542_v29 = vshll.u32 %v8581_v60, %v4955_v2 }
 0x141   : > { %v535_v55 = vor.u32 %v534_v57, %v533_v20  ;;  %v538_v53 = vor.u32 %v537_v50, %v536_v33  ;;  %v5305_v11 = vsel %vm8531_vm9, %v1688_v26, 1326507024  ;;  %v495_v32 = vmul.f32 30.0, %v479_v19 }
 0x142   : > { %8605 = vst [vmem:[#allocation53_spill] sm:$0xff] %v5305_v11  ;;  %v521_v36 = vor.u32 8388608, %v520_v37  ;;  %v541_v16 = vor.u32 %v540_v61, %v539_v41  ;;  %v5310_v56 = vsel %vm8545_vm11, %v5282_v8, 920167782  ;;  %v5314_v18 = vsel %vm8545_vm11, %v1584_v13, 1326507024 }
 0x143   : > { %8606 = vst [vmem:[#allocation54_spill] sm:$0xff] %v5310_v56  ;;  %8607 = vst [vmem:[#allocation55_spill] sm:$0xff] %v5314_v18  ;;  %v8608_v57 = vmov 683565275   ;;  %v544_v2 = vor.u32 %v543_v46, %v542_v29  ;;  %v5318_v17 = vshrl.u32 %v1877_v6, 5  ;;  %v5320_v26 = vand.u32 31, %v1877_v6 }
 0x144   : > { %v529_v20 = vshrl.u32 %v8608_v57, %v4974_v23  ;;  %vm545_vm14 = vcmp.lt.s32.totalorder %v4953_v63, 1  ;;  %vm548_vm1 = vcmp.lt.s32.totalorder %v4953_v63, 4  ;;  %v5324_v37 = vadd.s32 1, %v4271_v10 }
 0x145   : > { %8609 = vst [vmem:[#allocation56_spill] sm:$0xff] %v5320_v26  ;;  %v2076_v19 = vand.u32 2139095040, %v5289_v15  ;;  %v550_v50 = vsel %vm548_vm1, %v538_v53, 2102212464  ;;  %v553_v61 = vsel %vm545_vm14, %v532_v24, %v535_v55  ;;  %vm546_vm2 = vcmp.lt.s32.totalorder %v4953_v63, 2 }
 0x146   : > { %vm547_vm13 = vcmp.lt.s32.totalorder %v4953_v63, 3  ;;  %v549_v23 = vsel %vm545_vm14, %v529_v20, %v532_v24  ;;  %v554_v29 = vsel %vm548_vm1, %v541_v16, 920167782  ;;  %v557_v33 = vsel %vm545_vm14, %v535_v55, %v538_v53 }
 0x147   : > { %v551_v13 = vsel %vm547_vm13, %v535_v55, %v550_v50  ;;  %v555_v46 = vsel %vm547_vm13, %v538_v53, %v554_v29  ;;  %v558_v6 = vsel %vm548_vm1, %v544_v2, 1326507024  ;;  %v5330_v41 = vsub.s32 32, %v5320_v26 }
 0x148   : > { %v5333_v10 = vmul.f32 %v495_v32, %v5219_v7  ;;  %v556_v15 = vsel %vm546_vm2, %v553_v61, %v555_v46  ;;  %v559_v11 = vsel %vm547_vm13, %v541_v16, %v558_v6  ;;  %v5339_v21 = vshll.u32 %v8564_v54, %v5320_v26 }
 0x149   : > { %8610 = vst [vmem:[#allocation57_spill] sm:$0xff] %v5330_v41  ;;  %v560_v24 = vsel %vm546_vm2, %v557_v33, %v559_v11  ;;  %v561_v20 = vshll.u32 %v521_v36, 8  ;;  %v8533_v53 = vand.u32 2147483647, %v4906_v48  ;;  %v5346_v55 = vshll.u32 %v8581_v60, %v5320_v26 }
 0x14a   : > { %8611 = vst [vmem:[#allocation58_spill] sm:$0xff] %v5333_v10  ;;  %v552_v32 = vsel %vm546_vm2, %v549_v23, %v551_v13  ;;  %v634_v7 = vshll.u32 %v8608_v57, %v4936_v39  ;;  %v635_v16 = vshrl.u32 %v8603_v9, %v4942_v49  ;;  %vm1772_vm14 = vcmp.gt.s32.totalorder %v5324_v37, 0 }
 0x14b   : > { %v5354_v2 = vmul.u32.u64.low %v561_v20, %v560_v24  ;;  %v5355_v50 = vmul.u32.u64.high %v561_v20, %v560_v24, %v5354_v2  ;;  %v5357_v11 = vmul.u32.u64.low %v561_v20, %v556_v15  ;;  %v5358_v36 = vmul.u32.u64.high %v561_v20, %v556_v15, %v5357_v11 }
 0x14c   : > { %v2077_v61 = vshrl.u32 %v2076_v19, 23  ;;  %v624_v63 = vand.u32 8388607, %v8533_v53  ;;  %v636_v23 = vor.u32 %v635_v16, %v634_v7  ;;  %v633_v29 = vshrl.u32 %v8608_v57, %v4942_v49 }
 0x14d   : > { %v637_v13 = vshll.u32 %v8603_v9, %v4936_v39  ;;  %v638_v46 = vshrl.u32 %v8604_v28, %v4942_v49  ;;  %v641_v15 = vshrl.u32 %v8564_v54, %v4942_v49  ;;  %v568_v33 = vmul.u32 %v561_v20, %v552_v32 }
 0x14e   : > { %v625_v6 = vor.u32 8388608, %v624_v63  ;;  %v640_v19 = vshll.u32 %v8604_v28, %v4936_v39  ;;  %vm649_vm1 = vcmp.lt.s32.totalorder %v4951_v62, 1  ;;  %vm570_vm2 = vc.u32 %v5355_v50, %v5357_v11 }
 0x14f   : > { %v571_v24 = vadd.s32 1, %v5358_v36  ;;  %v639_v7 = vor.u32 %v638_v46, %v637_v13  ;;  %vm651_vm13 = vcmp.lt.s32.totalorder %v4951_v62, 3  ;;  %vm650_vm9 = vcmp.lt.s32.totalorder %v4951_v62, 2 }
 0x150   : > { %v642_v16 = vor.u32 %v641_v15, %v640_v19  ;;  %v653_v49 = vsel %vm649_vm1, %v633_v29, %v636_v23  ;;  %v663_v20 = vsel %vm651_vm13, %v4980_v30, %v5014_v4  ;;  %v665_v2 = vshll.u32 %v625_v6, 8 }
 0x151   : > { %v572_v39 = vsel %vm570_vm2, %v571_v24, %v5358_v36  ;;  %v657_v32 = vsel %vm649_vm1, %v636_v23, %v639_v7  ;;  %v8532_v63 = vand.u32 2147483647, %v4915_v3  ;;  %v1972_v19 = vand.u32 2139095040, %v5333_v10 }
 0x152   : > { %v573_v13 = vadd.s32 %v572_v39, %v568_v33  ;;  %v654_v46 = vsel %vm652_vm6, %v642_v16, 2102212464  ;;  %v659_v15 = vsel %vm651_vm13, %v642_v16, %v5003_v51  ;;  %v661_v29 = vsel %vm649_vm1, %v639_v7, %v642_v16 }
 0x153   : > { %v655_v30 = vsel %vm651_vm13, %v639_v7, %v654_v46  ;;  %v660_v4 = vsel %vm650_vm9, %v657_v32, %v659_v15  ;;  %v664_v36 = vsel %vm650_vm9, %v661_v29, %v663_v20  ;;  %v1892_v23 = vshrl.u32 %v8581_v60, %v5330_v41 }
 0x154   : > { %v574_v33 = vadd.s32 536870912, %v573_v13  ;;  %v5400_v6 = vmul.u32.u64.low %v665_v2, %v664_v36  ;;  %v5401_v24 = vmul.u32.u64.high %v665_v2, %v664_v36, %v5400_v6  ;;  %v1773_v51 = vsel %vm1772_vm14, %v5324_v37, 0 }
 0x155   : > { %v656_v7 = vsel %vm650_vm9, %v653_v49, %v655_v30  ;;  %v5408_v16 = vmul.u32.u64.low %v665_v2, %v660_v4  ;;  %v5409_v39 = vmul.u32.u64.high %v665_v2, %v660_v4, %v5408_v16  ;;  %v728_v20 = vand.u32 8388607, %v8532_v63 }
 0x156   : > { %v575_v32 = vshrl.u32 %v574_v33, 30  ;;  %v738_v46 = vshll.u32 %v8608_v57, %v4976_v25  ;;  %v739_v15 = vshrl.u32 %v8603_v9, %v4995_v45  ;;  %vm515_vm6 = vcmp.lt.s32.totalorder %v4909_v58, 0 }
 0x157   : > { %v741_v62 = vshll.u32 %v8603_v9, %v4976_v25  ;;  %v742_v37 = vshrl.u32 %v8604_v28, %v4995_v45  ;;  %v744_v49 = vshll.u32 %v8604_v28, %v4976_v25  ;;  %v745_v29 = vshrl.u32 %v8564_v54, %v4995_v45 }
 0x158   : > { %v5429_v30 = vshrl.u32 %v8573_v38, %v5330_v41  ;;  %v5431_v4 = vshrl.u32 %v1773_v51, 5  ;;  %v576_v36 = vshll.u32 %v575_v32, 30  ;;  %vm674_vm9 = vc.u32 %v5401_v24, %v5408_v16 }
 0x159   : > { %v675_v33 = vadd.s32 1, %v5409_v39  ;;  %v740_v6 = vor.u32 %v739_v15, %v738_v46  ;;  %v743_v63 = vor.u32 %v742_v37, %v741_v62  ;;  %v746_v53 = vor.u32 %v745_v29, %v744_v49 }
 0x15a   : > { %v5436_v10 = vand.u32 31, %v1773_v51  ;;  %v4283_v25 = vadd.s32 4294967169, %v2077_v61  ;;  %v5438_v26 = vsub.s32 %v573_v13, %v576_v36  ;;  %v672_v56 = vmul.u32 %v665_v2, %v656_v7 }
 0x15b   : > { %vm1900_vm14 = vcmp.lt.s32.totalorder %v5318_v17, 4  ;;  %v1973_v41 = vshrl.u32 %v1972_v19, 23  ;;  %v8612_v8 = vand.u32 2147483647, %v4909_v58  ;;  %v599_v42 = vsub.s32 4, %v575_v32 }
 0x15c   : > { %v676_v46 = vsel %vm674_vm9, %v675_v33, %v5409_v39  ;;  %v729_v15 = vor.u32 8388608, %v728_v20  ;;  %v579_v51 = vsub.s32 0, %v5438_v26  ;;  %vm753_vm2 = vcmp.lt.s32.totalorder %v4990_v44, 1 }
 0x15d   : > { %vm5443_vm1 = vcmp.le.f32.partialorder %v8612_v8, 0.7853982  ;;  %v677_v62 = vadd.s32 %v676_v46, %v672_v56  ;;  %vm755_vm13 = vcmp.lt.s32.totalorder %v4990_v44, 3  ;;  %v737_v61 = vshrl.u32 %v8608_v57, %v4995_v45 }
 0x15e   : > { %v758_v8 = vsel %vm756_vm10, %v746_v53, 2102212464  ;;  %v761_v2 = vsel %vm753_vm2, %v740_v6, %v743_v63  ;;  %v763_v13 = vsel %vm755_vm13, %v746_v53, %v5070_v5  ;;  %v4224_v19 = vmin.u32 %v579_v51, %v5438_v26 }
 0x15f   : > { %v678_v56 = vadd.s32 536870912, %v677_v62  ;;  %vm754_vm9 = vcmp.lt.s32.totalorder %v4990_v44, 2  ;;  %v765_v7 = vsel %vm753_vm2, %v743_v63, %v746_v53  ;;  %v5465_v45 = vor.u32 %v1892_v23, %v5339_v21 }
 0x160   : > { %v764_v39 = vsel %vm754_vm9, %v761_v2, %v763_v13  ;;  %v767_v20 = vsel %vm755_vm13, %v5038_v47, %v5080_v52  ;;  %v769_v5 = vshll.u32 %v729_v15, 8  ;;  %v581_v37 = vclz %v4224_v19 }
 0x161   : > { %8615 = vst [vmem:[#allocation59_spill] sm:$0xff] %v5465_v45  ;;  %v600_v49 = vsel %vm515_vm6, %v599_v42, %v575_v32  ;;  %v757_v29 = vsel %vm753_vm2, %v737_v61, %v740_v6  ;;  %v759_v21 = vsel %vm755_vm13, %v743_v63, %v758_v8  ;;  %v679_v53 = vshrl.u32 %v678_v56, 30 }
 0x162   : > { %v768_v23 = vsel %vm754_vm9, %v765_v7, %v767_v20  ;;  %v5481_v36 = vmul.u32.u64.low %v769_v5, %v764_v39  ;;  %v5482_v33 = vmul.u32.u64.high %v769_v5, %v764_v39, %v5481_v36  ;;  %v4225_v52 = vadd.s32 4294967294, %v581_v37 }
 0x163   : > { %v5487_v46 = vmul.u32.u64.low %v769_v5, %v768_v23  ;;  %v5488_v42 = vmul.u32.u64.high %v769_v5, %v768_v23, %v5487_v46  ;;  %v5491_v32 = vsub.s32 32, %v5436_v10  ;;  %v5495_v63 = vshll.u32 %v8564_v54, %v5436_v10 }
 0x164   : > { %v5499_v6 = vshll.u32 %v8581_v60, %v5436_v10  ;;  %v680_v15 = vshll.u32 %v679_v53, 30  ;;  %vm619_vm10 = vcmp.lt.s32.totalorder %v4906_v48, 0  ;;  %v5505_v51 = vsel %vm1900_vm14, %v5465_v45, 920167782 }
 0x165   : > { %8616 = vst [vmem:[#allocation60_spill] sm:$0xff] %v5505_v51  ;;  %vm4226_vm2 = vcmp.lt.s32.totalorder %v4225_v52, 0  ;;  %v602_v61 = vsel %vm5443_vm1, 0, %v600_v49  ;;  %v760_v8 = vsel %vm754_vm9, %v757_v29, %v759_v21  ;;  %v5511_v2 = vadd.s32 1, %v4283_v25 }
 0x166   : > { %v584_v13 = vsel %vm4226_vm2, 0, %v4225_v52  ;;  %v5513_v19 = vsub.s32 %v677_v62, %v680_v15  ;;  %v779_v56 = vadd.s32 1, %v5482_v33  ;;  %v5516_v7 = vadd.s32 4294967169, %v1973_v41 }
 0x167   : > { %v569_v39 = vadd.s32 %v5357_v11, %v5355_v50  ;;  %v585_v20 = vsub.s32 32, %v584_v13  ;;  %v589_v37 = vsub.s32 4294967266, %v584_v13  ;;  %v606_v23 = vadd.s32 3, %v602_v61 }
 0x168   : > { %v683_v49 = vsub.s32 0, %v5513_v19  ;;  %v776_v46 = vmul.u32 %v769_v5, %v760_v8  ;;  %vm778_vm13 = vc.u32 %v5488_v42, %v5481_v36  ;;  %v586_v44 = vshll.u32 %v5438_v26, %v584_v13 }
 0x169   : > { %v587_v25 = vshrl.u32 %v569_v39, %v585_v20  ;;  %v590_v62 = vadd.s32 127, %v589_v37  ;;  %v780_v29 = vsel %vm778_vm13, %v779_v56, %v5482_v33  ;;  %v703_v21 = vsub.s32 4, %v679_v53 }
 0x16a   : > { %v4228_v41 = vmin.u32 %v683_v49, %v5513_v19  ;;  %v781_v52 = vadd.s32 %v780_v29, %v776_v46  ;;  %v8543_v50 = vand.u32 2147483647, %v4912_v1  ;;  %v8617_v61 = vand.u32 2147483647, %v4906_v48 }
 0x16b   : > { %v588_v11 = vor.u32 %v587_v25, %v586_v44  ;;  %v591_v15 = vshll.u32 %v590_v62, 23  ;;  %v673_v26 = vadd.s32 %v5408_v16, %v5401_v24  ;;  %v5535_v8 = vand.u32 3, %v606_v23 }
 0x16c   : > { %vm5529_vm9 = vcmp.le.f32.partialorder %v8617_v61, 0.7853982  ;;  %v685_v33 = vclz %v4228_v41  ;;  %v843_v13 = vshrl.u32 %v8603_v9, %v4983_v31  ;;  %v846_v56 = vshrl.u32 %v8604_v28, %v4983_v31 }
 0x16d   : > { %v592_v39 = vor.u32 4788187, %v591_v15  ;;  %v782_v20 = vadd.s32 536870912, %v781_v52  ;;  %v842_v37 = vshll.u32 %v8608_v57, %v4961_v12  ;;  %v845_v49 = vshll.u32 %v8603_v9, %v4961_v12 }
 0x16e   : > { %v4229_v46 = vadd.s32 4294967294, %v685_v33  ;;  %v704_v24 = vsel %vm619_vm10, %v703_v21, %v679_v53  ;;  %v832_v16 = vand.u32 8388607, %v8543_v50  ;;  %v849_v23 = vshrl.u32 %v8564_v54, %v4983_v31 }
 0x16f   : > { %vm723_vm2 = vcmp.lt.s32.totalorder %v4915_v3, 0  ;;  %v593_v44 = vand.u32 2147483647, %v592_v39  ;;  %v595_v25 = vcvt.s32.f32 %v588_v11  ;;  %v783_v62 = vshrl.u32 %v782_v20, 30 }
 0x170   : > { %v848_v29 = vshll.u32 %v8604_v28, %v4961_v12  ;;  %vm4230_vm13 = vcmp.lt.s32.totalorder %v4229_v46, 0  ;;  %v841_v41 = vshrl.u32 %v8608_v57, %v4983_v31  ;;  %v844_v15 = vor.u32 %v843_v13, %v842_v37 }
 0x171   : > { %v847_v53 = vor.u32 %v846_v56, %v845_v49  ;;  %v596_v21 = vmul.f32 %v595_v25, %v593_v44  ;;  %v688_v61 = vsel %vm4230_vm13, 0, %v4229_v46  ;;  %v784_v33 = vshll.u32 %v783_v62, 30 }
 0x172   : > { %v850_v47 = vor.u32 %v849_v23, %v848_v29  ;;  %v689_v50 = vsub.s32 32, %v688_v61  ;;  %v693_v45 = vsub.s32 4294967266, %v688_v61  ;;  %v706_v39 = vsel %vm5529_vm9, 0, %v704_v24 }
 0x173   : > { %v8620_v11 = vand.u32 2147483647, %v4915_v3  ;;  %v833_v12 = vor.u32 8388608, %v832_v16  ;;  %v597_v51 = vxor.u32 2147483648, %v596_v21  ;;  %v5564_v31 = vsub.s32 %v781_v52, %v784_v33 }
 0x174   : > { %vm857_vm5 = vcmp.lt.s32.totalorder %v4985_v35, 1  ;;  %vm859_vm13 = vcmp.lt.s32.totalorder %v4985_v35, 3  ;;  %v690_v13 = vshll.u32 %v5513_v19, %v688_v61  ;;  %v691_v56 = vshrl.u32 %v673_v26, %v689_v50 }
 0x175   : > { %vm5560_vm11 = vcmp.le.f32.partialorder %v8620_v11, 0.7853982  ;;  %v694_v37 = vadd.s32 127, %v693_v45  ;;  %v807_v49 = vsub.s32 4, %v783_v62  ;;  %v598_v46 = vsel %vm515_vm6, %v597_v51, %v596_v21 }
 0x176   : > { %v787_v24 = vsub.s32 0, %v5564_v31  ;;  %v862_v16 = vsel %vm860_vm7, %v850_v47, 2102212464  ;;  %v865_v52 = vsel %vm857_vm5, %v844_v15, %v847_v53  ;;  %v601_v23 = vsel %vm5443_vm1, %v4909_v58, %v598_v46 }
 0x177   : > { %v692_v44 = vor.u32 %v691_v56, %v690_v13  ;;  %v695_v19 = vshll.u32 %v694_v37, 23  ;;  %v867_v45 = vsel %vm859_vm13, %v850_v47, %v5056_v59  ;;  %4632 = vcosq.f32 %v601_v23 }
 0x178   : > { %v710_v51 = vadd.s32 3, %v706_v39  ;;  %v4232_v50 = vmin.u32 %v787_v24, %v5564_v31  ;;  %vm858_vm6 = vcmp.lt.s32.totalorder %v4985_v35, 2  ;;  %4634 = vsinq.f32 %v601_v23 }
 0x179   : > { %v696_v26 = vor.u32 4788187, %v695_v19  ;;  %v808_v25 = vsel %vm723_vm2, %v807_v49, %v783_v62  ;;  %v869_v18 = vsel %vm857_vm5, %v847_v53, %v850_v47  ;;  %v861_v21 = vsel %vm857_vm5, %v841_v41, %v844_v15 }
 0x17a   : > { %v789_v29 = vclz %v4232_v50  ;;  %v863_v59 = vsel %vm859_vm13, %v847_v53, %v862_v16  ;;  %v868_v61 = vsel %vm858_vm6, %v865_v52, %v867_v45  ;;  %v699_v39 = vcvt.s32.f32 %v692_v44 }
 0x17b   : > { %v697_v33 = vand.u32 2147483647, %v696_v26  ;;  %v871_v62 = vsel %vm859_vm13, %v5029_v22, %v5065_v27  ;;  %v873_v11 = vshll.u32 %v833_v12, 8  ;;  %vm612_vm7 = vcmp.eq.s32.totalorder %v5535_v8, 2 }
 0x17c   : > { %v4233_v47 = vadd.s32 4294967294, %v789_v29  ;;  %v810_v41 = vsel %vm5560_vm11, 0, %v808_v25  ;;  %v872_v15 = vsel %vm858_vm6, %v869_v18, %v871_v62  ;;  %vm609_vm5 = vcmp.eq.s32.totalorder %v5535_v8, 0 }
 0x17d   : > { %v700_v53 = vmul.f32 %v699_v39, %v697_v33  ;;  %v864_v13 = vsel %vm858_vm6, %v861_v21, %v863_v59  ;;  %v5606_v56 = vmul.u32.u64.low %v873_v11, %v872_v15  ;;  %v5607_v37 = vmul.u32.u64.high %v873_v11, %v872_v15, %v5606_v56 }
 0x17e   : > { %vm608_vm1 = vcmp.lt.s32.totalorder %v5535_v8, 2  ;;  %v777_v22 = vadd.s32 %v5481_v36, %v5488_v42  ;;  %vm4234_vm13 = vcmp.lt.s32.totalorder %v4233_v47, 0  ;;  %vm605_vm8 = vweird.f32 %v4909_v58 }
 0x17f   : > { %v5612_v27 = vmul.u32.u64.low %v873_v11, %v868_v61  ;;  %v5613_v12 = vmul.u32.u64.high %v873_v11, %v868_v61, %v5612_v27  ;;  %v701_v49 = vxor.u32 2147483648, %v700_v53  ;;  %v5617_v46 = vand.u32 3, %v710_v51 }
 0x180   : > { %v792_v35 = vsel %vm4234_vm13, 0, %v4233_v47  ;;  %v929_v24 = vand.u32 2147483647, %v4932_v34  ;;  %v814_v23 = vadd.s32 3, %v810_v41  ;;  %v880_v44 = vmul.u32 %v873_v11, %v864_v13 }
 0x181   : > { %v793_v16 = vsub.s32 32, %v792_v35  ;;  %v797_v52 = vsub.s32 4294967266, %v792_v35  ;;  %v702_v36 = vsel %vm619_vm10, %v701_v49, %v700_v53  ;;  %v794_v42 = vshll.u32 %v5564_v31, %v792_v35  ;;  %v4633_v45 = vpop.eup %4632 }
 0x182   : > { %vm882_vm6 = vc.u32 %v5607_v37, %v5612_v27  ;;  %v947_v19 = vshrl.u32 %v8603_v9, %v5061_v0  ;;  %v705_v51 = vsel %vm5529_vm9, %v4906_v48, %v702_v36  ;;  %v883_v25 = vadd.s32 1, %v5613_v12  ;;  %v4635_v18 = vpop.eup %4634 }
 0x183   : > { %v795_v50 = vshrl.u32 %v777_v22, %v793_v16  ;;  %v798_v26 = vadd.s32 127, %v797_v52  ;;  %v613_v29 = vxor.u32 2147483648, %v4633_v45  ;;  %4636 = vcosq.f32 %v705_v51 }
 0x184   : > { %v936_v31 = vand.u32 8388607, %v929_v24  ;;  %v946_v21 = vshll.u32 %v8608_v57, %v5042_v43  ;;  %v610_v59 = vxor.u32 2147483648, %v4635_v18  ;;  %4638 = vsinq.f32 %v705_v51 }
 0x185   : > { %v796_v61 = vor.u32 %v795_v50, %v794_v42  ;;  %v799_v33 = vshll.u32 %v798_v26, 23  ;;  %v614_v5 = vsel %vm612_vm7, %v613_v29, %v4635_v18  ;;  %v884_v39 = vsel %vm882_vm6, %v883_v25, %v5613_v12  ;;  %v8624_v25 = vld [vmem:[#allocation26_spill] sm:$0xff] }
 0x186   : > { %v949_v62 = vshll.u32 %v8603_v9, %v5042_v43  ;;  %v950_v11 = vshrl.u32 %v8604_v28, %v5061_v0  ;;  %v611_v47 = vsel %vm609_vm5, %v4633_v45, %v610_v59  ;;  %v885_v15 = vadd.s32 %v884_v39, %v880_v44 }
 0x187   : > { %v800_v41 = vor.u32 4788187, %v799_v33  ;;  %v948_v53 = vor.u32 %v947_v19, %v946_v21  ;;  %v615_v13 = vsel %vm608_vm1, %v611_v47, %v614_v5  ;;  %v952_v22 = vshll.u32 %v8604_v28, %v5042_v43  ;;  %v8623_v19 = vld [vmem:[#allocation19_spill] sm:$0xff] }
 0x188   : > { %v951_v56 = vor.u32 %v950_v11, %v949_v62  ;;  %v953_v12 = vshrl.u32 %v8564_v54, %v5061_v0  ;;  %v616_v49 = vsel %vm605_vm8, nan, %v615_v13  ;;  %v803_v16 = vcvt.s32.f32 %v796_v61 }
 0x189   : > { %v801_v35 = vand.u32 2147483647, %v800_v41  ;;  %v886_v52 = vadd.s32 536870912, %v885_v15  ;;  %4450 = vmatprep.mubr.msk.f32.mxu1 %vm255_vm0, %v616_v49  ;;  %vm712_vm10 = vcmp.lt.s32.totalorder %v5617_v46, 2  ;;  %vm713_vm9 = vcmp.eq.s32.totalorder %v5617_v46, 0 }
 0x18a   : > { %v937_v8 = vor.u32 8388608, %v936_v31  ;;  %v954_v44 = vor.u32 %v953_v12, %v952_v22  ;;  %vm709_vm7 = vweird.f32 %v4906_v48  ;;  %vm961_vm5 = vcmp.lt.s32.totalorder %v5073_v40, 1 }
 0x18b   : > { %v804_v43 = vmul.f32 %v803_v16, %v801_v35  ;;  %v887_v36 = vshrl.u32 %v886_v52, 30  ;;  %vm963_vm1 = vcmp.lt.s32.totalorder %v5073_v40, 3  ;;  %vm716_vm8 = vcmp.eq.s32.totalorder %v5617_v46, 2 }
 0x18c   : > { %v5662_v58 = vand.u32 3, %v814_v23  ;;  %v973_v42 = vsel %vm961_vm5, %v951_v56, %v954_v44  ;;  %v975_v45 = vsel %vm963_vm1, %v8623_v19, %v5143_v14  ;;  %vm827_vm13 = vcmp.lt.s32.totalorder %v4912_v1, 0 }
 0x18d   : > { %v805_v51 = vxor.u32 2147483648, %v804_v43  ;;  %v888_v50 = vshll.u32 %v887_v36, 30  ;;  %v969_v26 = vsel %vm961_vm5, %v948_v53, %v951_v56  ;;  %v971_v23 = vsel %vm963_vm1, %v954_v44, %v8624_v25  ;;  %v4637_v18 = vpop.eup %4636 }
 0x18e   : > { %v945_v29 = vshrl.u32 %v8608_v57, %v5061_v0  ;;  %vm962_vm6 = vcmp.lt.s32.totalorder %v5073_v40, 2  ;;  %v966_v14 = vsel %vm964_vm15, %v954_v44, 2102212464  ;;  %v977_v31 = vshll.u32 %v937_v8, 8  ;;  %v4639_v21 = vpop.eup %4638 }
 0x18f   : > { %v717_v59 = vxor.u32 2147483648, %v4637_v18  ;;  %v806_v61 = vsel %vm723_vm2, %v805_v51, %v804_v43  ;;  %v5683_v33 = vsub.s32 %v885_v15, %v888_v50  ;;  %v976_v5 = vsel %vm962_vm6, %v973_v42, %v975_v45  ;;  %v8625_v15 = vld [vmem:[#allocation2_spill] sm:$0xff] }
 0x190   : > { %v714_v39 = vxor.u32 2147483648, %v4639_v21  ;;  %v809_v0 = vsel %vm5560_vm11, %v4915_v3, %v806_v61  ;;  %v911_v62 = vsub.s32 4, %v887_v36  ;;  %v972_v11 = vsel %vm962_vm6, %v969_v26, %v971_v23 }
 0x191   : > { %v718_v47 = vsel %vm716_vm8, %v717_v59, %v4639_v21  ;;  %4640 = vcosq.f32 %v809_v0  ;;  %v891_v41 = vsub.s32 0, %v5683_v33  ;;  %v1033_v13 = vand.u32 2147483647, %v8625_v15 }
 0x192   : > { %v715_v22 = vsel %vm713_vm9, %v4637_v18, %v714_v39  ;;  %4642 = vsinq.f32 %v809_v0  ;;  %v5698_v12 = vmul.u32.u64.low %v977_v31, %v976_v5  ;;  %v5699_v49 = vmul.u32.u64.high %v977_v31, %v976_v5, %v5698_v12 }
 0x193   : > { %v719_v20 = vsel %vm712_vm10, %v715_v22, %v718_v47  ;;  %v4236_v35 = vmin.u32 %v891_v41, %v5683_v33  ;;  %v965_v16 = vsel %vm961_vm5, %v945_v29, %v948_v53  ;;  %v967_v52 = vsel %vm963_vm1, %v951_v56, %v966_v14 }
 0x194   : > { %v5710_v8 = vshrl.u32 %v8581_v60, %v5491_v32  ;;  %v720_v44 = vsel %vm709_vm7, nan, %v719_v20  ;;  %v5714_v43 = vmul.u32.u64.low %v977_v31, %v972_v11  ;;  %v5715_v42 = vmul.u32.u64.high %v977_v31, %v972_v11, %v5714_v43 }
 0x195   : > { %v5720_v46 = vshrl.u32 %v8573_v38, %v5491_v32  ;;  %4451 = vmatmul.mubr.msk.f32.vlgmr.msra.gmra.mrb[0].mxu1 %vm255_vm0, %v720_v44  ;;  %vm820_vm15 = vcmp.eq.s32.totalorder %v5662_v58, 2  ;;  %v893_v53 = vclz %v4236_v35  ;;  %v1040_v56 = vand.u32 8388607, %v1033_v13 }
 0x196   : > { %vm817_vm11 = vcmp.eq.s32.totalorder %v5662_v58, 0  ;;  %v881_v48 = vadd.s32 %v5612_v27, %v5607_v37  ;;  %v5731_v19 = vsel %vm827_vm13, %v911_v62, %v887_v36  ;;  %v968_v45 = vsel %vm962_vm6, %v965_v16, %v967_v52  ;;  %v8629_v37 = vld [vmem:[#allocation7_spill] sm:$0xff]  ;;  %v8630_v36 = vld [vmem:[#allocation9_spill] sm:$0xff] }
 0x197   : > { %vm986_vm2 = vc.u32 %v5699_v49, %v5714_v43  ;;  %vm816_vm10 = vcmp.lt.s32.totalorder %v5662_v58, 2  ;;  %v8626_v51 = vand.u32 2147483647, %v4912_v1  ;;  %v4237_v26 = vadd.s32 4294967294, %v893_v53  ;;  %v8631_v16 = vld [vmem:[#allocation11_spill] sm:$0xff] }
 0x198   : > { %v1050_v27 = vshll.u32 %v8608_v57, %v8629_v37  ;;  %v1051_v25 = vshrl.u32 %v8603_v9, %v8630_v36  ;;  %v1053_v40 = vshll.u32 %v8603_v9, %v8629_v37  ;;  %vm813_vm7 = vweird.f32 %v4915_v3 }
 0x199   : > { %vm5740_vm9 = vcmp.le.f32.partialorder %v8626_v51, 0.7853982  ;;  %v987_v23 = vadd.s32 1, %v5715_v42  ;;  %v1054_v18 = vshrl.u32 %v8604_v28, %v8630_v36  ;;  %v1056_v29 = vshll.u32 %v8604_v28, %v8629_v37 }
 0x19a   : > { %v1057_v14 = vshrl.u32 %v8564_v54, %v8630_v36  ;;  %vm4238_vm5 = vcmp.lt.s32.totalorder %v4237_v26, 0  ;;  %v984_v21 = vmul.u32 %v977_v31, %v968_v45  ;;  %v1041_v59 = vor.u32 8388608, %v1040_v56 }
 0x19b   : > { %v1052_v61 = vor.u32 %v1051_v25, %v1050_v27  ;;  %vm2084_vm1 = vcmp.gt.s32.totalorder %v5511_v2, 0  ;;  %v896_v5 = vsel %vm4238_vm5, 0, %v4237_v26  ;;  %v988_v39 = vsel %vm986_vm2, %v987_v23, %v5715_v42  ;;  %v4641_v11 = vpop.eup %4640  ;;  %v8632_v26 = vld [vmem:[#allocation15_spill] sm:$0xff] }
 0x19c   : > { %v1055_v0 = vor.u32 %v1054_v18, %v1053_v40  ;;  %v1058_v62 = vor.u32 %v1057_v14, %v1056_v29  ;;  %v897_v47 = vsub.s32 32, %v896_v5  ;;  %v901_v41 = vsub.s32 4294967266, %v896_v5  ;;  %v4643_v31 = vpop.eup %4642 }
 0x19d   : > { %v989_v22 = vadd.s32 %v988_v39, %v984_v21  ;;  %v1049_v12 = vshrl.u32 %v8608_v57, %v8630_v36  ;;  %v821_v20 = vxor.u32 2147483648, %v4641_v11  ;;  %v898_v35 = vshll.u32 %v5683_v33, %v896_v5  ;;  %v8633_v5 = vld [vmem:[#allocation17_spill] sm:$0xff] }
 0x19e   : > { %vm1065_vm8 = vcmp.lt.s32.totalorder %v8631_v16, 1  ;;  %vm1067_vm6 = vcmp.lt.s32.totalorder %v8631_v16, 3  ;;  %v818_v52 = vxor.u32 2147483648, %v4643_v31  ;;  %v899_v44 = vshrl.u32 %v881_v48, %v897_v47  ;;  %v8634_v39 = vld [vmem:[#allocation13_spill] sm:$0xff] }
 0x19f   : > { %v902_v42 = vadd.s32 127, %v901_v41  ;;  %v990_v53 = vadd.s32 536870912, %v989_v22  ;;  %v822_v56 = vsel %vm820_vm15, %v821_v20, %v4643_v31  ;;  %v1070_v45 = vsel %vm1068_vm12, %v1058_v62, 2102212464 }
 0x1a0   : > { %v1073_v51 = vsel %vm1065_vm8, %v1052_v61, %v1055_v0  ;;  %v1075_v33 = vsel %vm1067_vm6, %v1058_v62, %v8632_v26  ;;  %v819_v37 = vsel %vm817_vm11, %v4641_v11, %v818_v52  ;;  %v900_v27 = vor.u32 %v899_v44, %v898_v35 }
 0x1a1   : > { %v903_v48 = vshll.u32 %v902_v42, 23  ;;  %v991_v36 = vshrl.u32 %v990_v53, 30  ;;  %v823_v25 = vsel %vm816_vm10, %v819_v37, %v822_v56  ;;  %v914_v40 = vsel %vm5740_vm9, 0, %v5731_v19  ;;  %v8636_v53 = vld [vmem:[#allocation4_spill] sm:$0xff] }
 0x1a2   : > { %vm1066_vm12 = vcmp.lt.s32.totalorder %v8631_v16, 2  ;;  %v1077_v23 = vsel %vm1065_vm8, %v1055_v0, %v1058_v62  ;;  %v824_v18 = vsel %vm813_vm7, nan, %v823_v25  ;;  %v1069_v21 = vsel %vm1065_vm8, %v1049_v12, %v1052_v61 }
 0x1a3   : > { %v904_v29 = vor.u32 4788187, %v903_v48  ;;  %v992_v14 = vshll.u32 %v991_v36, 30  ;;  %4453 = vmatprep.mubr.msk.f32.mxu1 %vm255_vm0, %v824_v18  ;;  %v1071_v58 = vsel %vm1067_vm6, %v1055_v0, %v1070_v45  ;;  %v1076_v19 = vsel %vm1066_vm12, %v1073_v51, %v1075_v33  ;;  %v8639_v48 = vld [vmem:[#allocation18_spill] sm:$0xff] }
 0x1a4   : > { %v1079_v62 = vsel %vm1067_vm6, %v8634_v39, %v8633_v5  ;;  %v1081_v3 = vshll.u32 %v1041_v59, 8  ;;  %v907_v47 = vcvt.s32.f32 %v900_v27  ;;  %vm931_vm15 = vcmp.lt.s32.totalorder %v4932_v34, 0 }
 0x1a5   : > { %v905_v11 = vand.u32 2147483647, %v904_v29  ;;  %v5800_v41 = vsub.s32 %v989_v22, %v992_v14  ;;  %v1080_v61 = vsel %vm1066_vm12, %v1077_v23, %v1079_v62  ;;  %v8635_v0 = vor.u32 %v5429_v30, %v5346_v55  ;;  %v8640_v23 = vld [vmem:[#allocation16_spill] sm:$0xff] }
 0x1a6   : > { %v918_v31 = vadd.s32 3, %v914_v40  ;;  %v5812_v20 = vmul.u32.u64.low %v1081_v3, %v1080_v61  ;;  %v5813_v35 = vmul.u32.u64.high %v1081_v3, %v1080_v61, %v5812_v20  ;;  %v5818_v59 = vsel %vm2084_vm1, %v5511_v2, 0 }
 0x1a7   : > { %v5810_v12 = vsel %vm1900_vm14, %v8635_v0, 1326507024  ;;  %v5821_v22 = vadd.s32 1, %v5516_v7  ;;  %v908_v52 = vmul.f32 %v907_v47, %v905_v11  ;;  %v995_v44 = vsub.s32 0, %v5800_v41 }
 0x1a8   : > { %v1072_v55 = vsel %vm1066_vm12, %v1069_v21, %v1071_v58  ;;  %v5826_v30 = vmul.u32.u64.low %v1081_v3, %v1076_v19  ;;  %v5827_v42 = vmul.u32.u64.high %v1081_v3, %v1076_v19, %v5826_v30  ;;  %v1137_v56 = vand.u32 2147483647, %v8636_v53 }
 0x1a9   : > { %v5833_v45 = vor.u32 %v5710_v8, %v5495_v63  ;;  %v1792_v2 = vor.u32 %v5720_v46, %v5499_v6  ;;  %v909_v7 = vxor.u32 2147483648, %v908_v52  ;;  %v4240_v51 = vmin.u32 %v995_v44, %v5800_v41 }
 0x1aa   : > { %v5839_v26 = vshrl.u32 %v5818_v59, 5  ;;  %v5841_v16 = vand.u32 3, %v918_v31  ;;  %vm5845_vm11 = vcmp.le.f32.partialorder %v929_v24, 0.7853982  ;;  %v1015_v37 = vsub.s32 4, %v991_v36 }
 0x1ab   : > { %v910_v63 = vsel %vm827_vm13, %v909_v7, %v908_v52  ;;  %v997_v8 = vclz %v4240_v51  ;;  %v1088_v27 = vmul.u32 %v1081_v3, %v1072_v55  ;;  %v1155_v25 = vshrl.u32 %v8603_v9, %v8639_v48 }
 0x1ac   : > { %v913_v40 = vsel %vm5740_vm9, %v4912_v1, %v910_v63  ;;  %vm1090_vm2 = vc.u32 %v5813_v35, %v5826_v30  ;;  %v1144_v24 = vand.u32 8388607, %v1137_v56  ;;  %v1154_v18 = vshll.u32 %v8608_v57, %v8640_v23 }
 0x1ad   : > { %4644 = vcosq.f32 %v913_v40  ;;  %v4241_v29 = vadd.s32 4294967294, %v997_v8  ;;  %v1091_v14 = vadd.s32 1, %v5827_v42  ;;  %v1157_v21 = vshll.u32 %v8603_v9, %v8640_v23 }
 0x1ae   : > { %4646 = vsinq.f32 %v913_v40  ;;  %v1158_v50 = vshrl.u32 %v8604_v28, %v8639_v48  ;;  %v1160_v58 = vshll.u32 %v8604_v28, %v8640_v23  ;;  %v1161_v19 = vshrl.u32 %v8564_v54, %v8639_v48  ;;  %v8643_v40 = vld [vmem:[#allocation39_spill] sm:$0xff] }
 0x1af   : > { %vm4242_vm13 = vcmp.lt.s32.totalorder %v4241_v29, 0  ;;  %v1016_v5 = vsel %vm931_vm15, %v1015_v37, %v991_v36  ;;  %v1092_v39 = vsel %vm1090_vm2, %v1091_v14, %v5827_v42  ;;  %v1156_v62 = vor.u32 %v1155_v25, %v1154_v18  ;;  %v8641_v36 = vld [vmem:[#allocation22_spill] sm:$0xff]  ;;  %v8642_v37 = vld [vmem:[#allocation35_spill] sm:$0xff] }
 0x1b0   : > { %v1000_v3 = vsel %vm4242_vm13, 0, %v4241_v29  ;;  %v1093_v11 = vadd.s32 %v1092_v39, %v1088_v27  ;;  %v1159_v47 = vor.u32 %v1158_v50, %v1157_v21  ;;  %v1162_v61 = vor.u32 %v1161_v19, %v1160_v58 }
 0x1b1   : > { %vm924_vm10 = vcmp.eq.s32.totalorder %v5841_v16, 2  ;;  %v985_v0 = vadd.s32 %v5714_v43, %v5699_v49  ;;  %v1001_v31 = vsub.s32 32, %v1000_v3  ;;  %v1005_v20 = vsub.s32 4294967266, %v1000_v3 }
 0x1b2   : > { %v1145_v52 = vor.u32 8388608, %v1144_v24  ;;  %v1018_v44 = vsel %vm5845_vm11, 0, %v1016_v5  ;;  %v1094_v55 = vadd.s32 536870912, %v1093_v11  ;;  %vm1169_vm9 = vcmp.lt.s32.totalorder %v8641_v36, 1 }
 0x1b3   : > { %vm1170_vm7 = vcmp.lt.s32.totalorder %v8641_v36, 2  ;;  %vm920_vm5 = vcmp.lt.s32.totalorder %v5841_v16, 2  ;;  %v1002_v42 = vshll.u32 %v5800_v41, %v1000_v3  ;;  %v1003_v7 = vshrl.u32 %v985_v0, %v1001_v31  ;;  %v8644_v41 = vld [vmem:[#allocation32_spill] sm:$0xff] }
 0x1b4   : > { %v1006_v51 = vadd.s32 127, %v1005_v20  ;;  %vm1171_vm1 = vcmp.lt.s32.totalorder %v8641_v36, 3  ;;  %v5884_v49 = vshrl.u32 %v1094_v55, 30  ;;  %v1177_v43 = vsel %vm1169_vm9, %v1156_v62, %v1159_v47 }
 0x1b5   : > { %v1179_v63 = vsel %vm1171_vm1, %v1162_v61, %v8642_v37  ;;  %v1181_v8 = vsel %vm1169_vm9, %v1159_v47, %v1162_v61  ;;  %v1004_v27 = vor.u32 %v1003_v7, %v1002_v42  ;;  %v1183_v24 = vsel %vm1171_vm1, %v8644_v41, %v8643_v40  ;;  %v8645_v7 = vld [vmem:[#allocation3_spill] sm:$0xff] }
 0x1b6   : > { %v1007_v25 = vshll.u32 %v1006_v51, 23  ;;  %v1185_v23 = vshll.u32 %v1145_v52, 8  ;;  %v1096_v18 = vshll.u32 %v5884_v49, 30  ;;  %v1153_v29 = vshrl.u32 %v8608_v57, %v8639_v48 }
 0x1b7   : > { %v1174_v14 = vsel %vm1172_vm4, %v1162_v61, 2102212464  ;;  %v1184_v21 = vsel %vm1170_vm7, %v1181_v8, %v1183_v24  ;;  %v4645_v50 = vpop.eup %4644  ;;  %v1022_v19 = vadd.s32 3, %v1018_v44  ;;  %v1180_v48 = vsel %vm1170_vm7, %v1177_v43, %v1179_v63 }
 0x1b8   : > { %v1008_v58 = vor.u32 4788187, %v1007_v25  ;;  %v5904_v5 = vmul.u32.u64.low %v1185_v23, %v1184_v21  ;;  %v5905_v39 = vmul.u32.u64.high %v1185_v23, %v1184_v21, %v5904_v5  ;;  %v4647_v3 = vpop.eup %4646  ;;  %v925_v0 = vxor.u32 2147483648, %v4645_v50 }
 0x1b9   : > { %v5907_v31 = vsub.s32 %v1093_v11, %v1096_v18  ;;  %v1173_v20 = vsel %vm1169_vm9, %v1153_v29, %v1156_v62  ;;  %v922_v61 = vxor.u32 2147483648, %v4647_v3  ;;  %v1011_v55 = vcvt.s32.f32 %v1004_v27 }
 0x1ba   : > { %v1009_v52 = vand.u32 2147483647, %v1008_v58  ;;  %v1175_v42 = vsel %vm1171_vm1, %v1159_v47, %v1174_v14  ;;  %vm921_vm4 = vcmp.eq.s32.totalorder %v5841_v16, 0  ;;  %v926_v44 = vsel %vm924_vm10, %v925_v0, %v4647_v3 }
 0x1bb   : > { %v1099_v11 = vsub.s32 0, %v5907_v31  ;;  %v1241_v51 = vand.u32 2147483647, %v8645_v7  ;;  %vm1035_vm8 = vcmp.lt.s32.totalorder %v8625_v15, 0  ;;  %v923_v62 = vsel %vm921_vm4, %v4645_v50, %v922_v61  ;;  %v8648_v50 = vld [vmem:[#allocation12_spill] sm:$0xff] }
 0x1bc   : > { %v1012_v37 = vmul.f32 %v1011_v55, %v1009_v52  ;;  %v5921_v43 = vmul.u32.u64.low %v1185_v23, %v1180_v48  ;;  %v5922_v63 = vmul.u32.u64.high %v1185_v23, %v1180_v48, %v5921_v43  ;;  %vm917_vm6 = vweird.f32 %v4912_v1 }
 0x1bd   : > { %v927_v47 = vsel %vm920_vm5, %v923_v62, %v926_v44  ;;  %v4244_v8 = vmin.u32 %v1099_v11, %v5907_v31  ;;  %v1176_v27 = vsel %vm1170_vm7, %v1173_v20, %v1175_v42  ;;  %v5932_v25 = vand.u32 31, %v5818_v59 }
 0x1be   : > { %v928_v40 = vsel %vm917_vm6, nan, %v927_v47  ;;  %v1013_v41 = vxor.u32 2147483648, %v1012_v37  ;;  %v5934_v24 = vand.u32 3, %v1022_v19  ;;  %v1089_v1 = vadd.s32 %v5826_v30, %v5813_v35  ;;  %v8650_v47 = vld [vmem:[#allocation20_spill] sm:$0xff] }
 0x1bf   : > { %4454 = vmatmul.mubr.msk.f32.gmra.mrb[2].mxu1 %vm255_vm0, %v928_v40  ;;  %v1101_v18 = vclz %v4244_v8  ;;  %v1119_v16 = vsub.s32 4, %v5884_v49  ;;  %vm1194_vm12 = vc.u32 %v5905_v39, %v5921_v43  ;;  %v1192_v59 = vmul.u32 %v1185_v23, %v1176_v27  ;;  %v8649_v23 = vld [vmem:[#allocation14_spill] sm:$0xff] }
 0x1c0   : > { %v1014_v36 = vsel %vm931_vm15, %v1013_v41, %v1012_v37  ;;  %v1195_v29 = vadd.s32 1, %v5922_v63  ;;  %v1248_v14 = vand.u32 8388607, %v1241_v51  ;;  %vm5952_vm2 = vcmp.le.f32.partialorder %v1033_v13, 0.7853982 }
 0x1c1   : > { %v1017_v21 = vsel %vm5845_vm11, %v4932_v34, %v1014_v36  ;;  %v4245_v30 = vadd.s32 4294967294, %v1101_v18  ;;  %v1258_v58 = vshll.u32 %v8608_v57, %v8648_v50  ;;  %v1259_v19 = vshrl.u32 %v8603_v9, %v8649_v23  ;;  %v8651_v18 = vld [vmem:[#allocation30_spill] sm:$0xff] }
 0x1c2   : > { %4648 = vcosq.f32 %v1017_v21  ;;  %v1196_v5 = vsel %vm1194_vm12, %v1195_v29, %v5922_v63  ;;  %v1261_v33 = vshll.u32 %v8603_v9, %v8648_v50  ;;  %v1262_v3 = vshrl.u32 %v8604_v28, %v8649_v23 }
 0x1c3   : > { %4650 = vsinq.f32 %v1017_v21  ;;  %vm4246_vm15 = vcmp.lt.s32.totalorder %v4245_v30, 0  ;;  %v1197_v13 = vadd.s32 %v1196_v5, %v1192_v59  ;;  %v1260_v0 = vor.u32 %v1259_v19, %v1258_v58  ;;  %v8652_v21 = vld [vmem:[#allocation31_spill] sm:$0xff] }
 0x1c4   : > { %v1104_v20 = vsel %vm4246_vm15, 0, %v4245_v30  ;;  %v1263_v48 = vor.u32 %v1262_v3, %v1261_v33  ;;  %v1264_v61 = vshll.u32 %v8604_v28, %v8648_v50  ;;  %v1265_v52 = vshrl.u32 %v8564_v54, %v8649_v23  ;;  %v8653_v30 = vld [vmem:[#allocation25_spill] sm:$0xff] }
 0x1c5   : > { %v1105_v55 = vsub.s32 32, %v1104_v20  ;;  %v1109_v42 = vsub.s32 4294967266, %v1104_v20  ;;  %v1120_v44 = vsel %vm1035_vm8, %v1119_v16, %v5884_v49  ;;  %v1198_v11 = vadd.s32 536870912, %v1197_v13 }
 0x1c6   : > { %v1106_v62 = vshll.u32 %v5907_v31, %v1104_v20  ;;  %v1257_v37 = vshrl.u32 %v8608_v57, %v8649_v23  ;;  %v1266_v63 = vor.u32 %v1265_v52, %v1264_v61  ;;  %vm1273_vm11 = vcmp.lt.s32.totalorder %v8650_v47, 1 }
 0x1c7   : > { %v1107_v8 = vshrl.u32 %v1089_v1, %v1105_v55  ;;  %v1110_v27 = vadd.s32 127, %v1109_v42  ;;  %v1199_v40 = vshrl.u32 %v1198_v11, 30  ;;  %vm1275_vm13 = vcmp.lt.s32.totalorder %v8650_v47, 3 }
 0x1c8   : > { %vm1024_vm10 = vcmp.lt.s32.totalorder %v5934_v24, 2  ;;  %v1249_v41 = vor.u32 8388608, %v1248_v14  ;;  %v1278_v49 = vsel %vm1276_vm3, %v1266_v63, 2102212464  ;;  %v1281_v31 = vsel %vm1273_vm11, %v1260_v0, %v1263_v48 }
 0x1c9   : > { %v1283_v16 = vsel %vm1275_vm13, %v1266_v63, %v8651_v18  ;;  %vm1796_vm9 = vcmp.lt.s32.totalorder %v5431_v4, 4  ;;  %vm1021_vm7 = vweird.f32 %v4932_v34  ;;  %v1108_v1 = vor.u32 %v1107_v8, %v1106_v62 }
 0x1ca   : > { %v1111_v36 = vshll.u32 %v1110_v27, 23  ;;  %v1200_v59 = vshll.u32 %v1199_v40, 30  ;;  %v1285_v29 = vsel %vm1273_vm11, %v1263_v48, %v1266_v63  ;;  %vm1025_vm5 = vcmp.eq.s32.totalorder %v5934_v24, 0 }
 0x1cb   : > { %vm1028_vm3 = vcmp.eq.s32.totalorder %v5934_v24, 2  ;;  %v1122_v14 = vsel %vm5952_vm2, 0, %v1120_v44  ;;  %v1287_v50 = vsel %vm1275_vm13, %v8653_v30, %v8652_v21  ;;  %vm1139_vm1 = vcmp.lt.s32.totalorder %v8636_v53, 0 }
 0x1cc   : > { %v1112_v58 = vor.u32 4788187, %v1111_v36  ;;  %v5998_v23 = vsub.s32 %v1197_v13, %v1200_v59  ;;  %vm1274_vm4 = vcmp.lt.s32.totalorder %v8650_v47, 2  ;;  %v1277_v19 = vsel %vm1273_vm11, %v1257_v37, %v1260_v0  ;;  %v4649_v5 = vpop.eup %4648  ;;  %v8654_v59 = vld [vmem:[#allocation6_spill] sm:$0xff] }
 0x1cd   : > { %v1279_v33 = vsel %vm1275_vm13, %v1263_v48, %v1278_v49  ;;  %v1284_v3 = vsel %vm1274_vm4, %v1281_v31, %v1283_v16  ;;  %v1288_v20 = vsel %vm1274_vm4, %v1285_v29, %v1287_v50  ;;  %v1289_v61 = vshll.u32 %v1249_v41, 8  ;;  %v4651_v52 = vpop.eup %4650 }
 0x1ce   : > { %v1029_v55 = vxor.u32 2147483648, %v4649_v5  ;;  %v1113_v13 = vand.u32 2147483647, %v1112_v58  ;;  %v1115_v42 = vcvt.s32.f32 %v1108_v1  ;;  %v1203_v44 = vsub.s32 0, %v5998_v23 }
 0x1cf   : > { %v1026_v11 = vxor.u32 2147483648, %v4651_v52  ;;  %v1126_v62 = vadd.s32 3, %v1122_v14  ;;  %v6010_v0 = vmul.u32.u64.low %v1289_v61, %v1288_v20  ;;  %v6011_v37 = vmul.u32.u64.high %v1289_v61, %v1288_v20, %v6010_v0 }
 0x1d0   : > { %v1030_v48 = vsel %vm1028_vm3, %v1029_v55, %v4651_v52  ;;  %v1116_v63 = vmul.f32 %v1115_v42, %v1113_v13  ;;  %v4248_v8 = vmin.u32 %v1203_v44, %v5998_v23  ;;  %v1223_v27 = vsub.s32 4, %v1199_v40 }
 0x1d1   : > { %v1027_v41 = vsel %vm1025_vm5, %v4649_v5, %v1026_v11  ;;  %v1280_v49 = vsel %vm1274_vm4, %v1277_v19, %v1279_v33  ;;  %v6020_v31 = vmul.u32.u64.low %v1289_v61, %v1284_v3  ;;  %v6021_v18 = vmul.u32.u64.high %v1289_v61, %v1284_v3, %v6020_v31  ;;  %v8656_v33 = vld [vmem:[#allocation23_spill] sm:$0xff] }
 0x1d2   : > { %v1031_v16 = vsel %vm1024_vm10, %v1027_v41, %v1030_v48  ;;  %v1117_v1 = vxor.u32 2147483648, %v1116_v63  ;;  %v1205_v36 = vclz %v4248_v8  ;;  %v1345_v29 = vand.u32 2147483647, %v8654_v59 }
 0x1d3   : > { %v6030_v14 = vsel %vm1796_vm9, %v5833_v45, 920167782  ;;  %v6037_v47 = vsel %vm1796_vm9, %v1792_v2, 1326507024  ;;  %v1032_v24 = vsel %vm1021_vm7, nan, %v1031_v16  ;;  %v6041_v21 = vand.u32 3, %v1126_v62 }
 0x1d4   : > { %4456 = vmatprep.mubr.msk.f32.mxu1 %vm255_vm0, %v1032_v24  ;;  %v1118_v30 = vsel %vm1035_vm8, %v1117_v1, %v1116_v63  ;;  %v1193_v50 = vadd.s32 %v5921_v43, %v5905_v39  ;;  %v4249_v58 = vadd.s32 4294967294, %v1205_v36  ;;  %vm1298_vm6 = vc.u32 %v6011_v37, %v6020_v31  ;;  %v8655_v43 = vld [vmem:[#allocation29_spill] sm:$0xff]  ;;  %v8659_v1 = vld [vmem:[#allocation36_spill] sm:$0xff] }
 0x1d5   : > { %v1121_v6 = vsel %vm5952_vm2, %v8625_v15, %v1118_v30  ;;  %v6055_v34 = vsel %vm1139_vm1, %v1223_v27, %v1199_v40  ;;  %v1296_v46 = vmul.u32 %v1289_v61, %v1280_v49  ;;  %v1299_v2 = vadd.s32 1, %v6021_v18 }
 0x1d6   : > { %4652 = vcosq.f32 %v1121_v6  ;;  %vm4250_vm8 = vcmp.lt.s32.totalorder %v4249_v58, 0  ;;  %v1352_v39 = vand.u32 8388607, %v1345_v29  ;;  %v1363_v19 = vshrl.u32 %v8603_v9, %v8655_v43 }
 0x1d7   : > { %4654 = vsinq.f32 %v1121_v6  ;;  %v1208_v5 = vsel %vm4250_vm8, 0, %v4249_v58  ;;  %v1300_v35 = vsel %vm1298_vm6, %v1299_v2, %v6021_v18  ;;  %v1362_v3 = vshll.u32 %v8608_v57, %v8656_v33  ;;  %v8661_v58 = vld [vmem:[#allocation48_spill] sm:$0xff] }
 0x1d8   : > { %v1209_v40 = vsub.s32 32, %v1208_v5  ;;  %v1210_v20 = vshll.u32 %v5998_v23, %v1208_v5  ;;  %v1213_v61 = vsub.s32 4294967266, %v1208_v5  ;;  %v1301_v52 = vadd.s32 %v1300_v35, %v1296_v46  ;;  %v8663_v46 = vld [vmem:[#allocation41_spill] sm:$0xff] }
 0x1d9   : > { %v1364_v55 = vor.u32 %v1363_v19, %v1362_v3  ;;  %v1365_v13 = vshll.u32 %v8603_v9, %v8656_v33  ;;  %v1366_v42 = vshrl.u32 %v8604_v28, %v8655_v43  ;;  %v1368_v44 = vshll.u32 %v8604_v28, %v8656_v33 }
 0x1da   : > { %v1211_v11 = vshrl.u32 %v1193_v50, %v1209_v40  ;;  %v1214_v62 = vadd.s32 127, %v1213_v61  ;;  %v1302_v0 = vadd.s32 536870912, %v1301_v52  ;;  %v1369_v48 = vshrl.u32 %v8564_v54, %v8655_v43 }
 0x1db   : > { %vm1129_vm12 = vcmp.eq.s32.totalorder %v6041_v21, 0  ;;  %vm1132_vm2 = vcmp.eq.s32.totalorder %v6041_v21, 2  ;;  %vm6078_vm15 = vcmp.le.f32.partialorder %v1137_v56, 0.7853982  ;;  %v1367_v63 = vor.u32 %v1366_v42, %v1365_v13 }
 0x1dc   : > { %vm1980_vm11 = vcmp.gt.s32.totalorder %v5821_v22, 0  ;;  %v1212_v8 = vor.u32 %v1211_v11, %v1210_v20  ;;  %v1215_v27 = vshll.u32 %v1214_v62, 23  ;;  %v6083_v41 = vshrl.u32 %v1302_v0, 30 }
 0x1dd   : > { %v1370_v49 = vor.u32 %v1369_v48, %v1368_v44  ;;  %vm1125_vm13 = vweird.f32 %v8625_v15  ;;  %v1226_v18 = vsel %vm6078_vm15, 0, %v6055_v34  ;;  %v1353_v16 = vor.u32 8388608, %v1352_v39  ;;  %v8662_v34 = vld [vmem:[#allocation49_spill] sm:$0xff] }
 0x1de   : > { %v1361_v56 = vshrl.u32 %v8608_v57, %v8655_v43  ;;  %vm1377_vm10 = vcmp.lt.s32.totalorder %v8659_v1, 1  ;;  %v1216_v36 = vor.u32 4788187, %v1215_v27  ;;  %v1304_v24 = vshll.u32 %v6083_v41, 30 }
 0x1df   : > { %vm1379_vm7 = vcmp.lt.s32.totalorder %v8659_v1, 3  ;;  %v1385_v30 = vsel %vm1377_vm10, %v1364_v55, %v1367_v63  ;;  %vm1378_vm5 = vcmp.lt.s32.totalorder %v8659_v1, 2  ;;  %vm8660_vm3 = vcmp.lt.s32.totalorder %v8659_v1, 4 }
 0x1e0   : > { %v1382_v50 = vsel %vm8660_vm3, %v1370_v49, 2102212464  ;;  %v1387_v6 = vsel %vm1379_vm7, %v1370_v49, %v8661_v58  ;;  %v1391_v2 = vsel %vm1379_vm7, %v8663_v46, %v8662_v34  ;;  %v4653_v39 = vpop.eup %4652  ;;  %v1217_v43 = vand.u32 2147483647, %v1216_v36  ;;  %v8664_v34 = vld [vmem:[#allocation5_spill] sm:$0xff] }
 0x1e1   : > { %v1219_v19 = vcvt.s32.f32 %v1212_v8  ;;  %v6106_v5 = vsub.s32 %v1301_v52, %v1304_v24  ;;  %v1389_v35 = vsel %vm1377_vm10, %v1367_v63, %v1370_v49  ;;  %v4655_v33 = vpop.eup %4654  ;;  %v1133_v3 = vxor.u32 2147483648, %v4653_v39 }
 0x1e2   : > { %v1381_v40 = vsel %vm1377_vm10, %v1361_v56, %v1364_v55  ;;  %v1388_v20 = vsel %vm1378_vm5, %v1385_v30, %v1387_v6  ;;  %v1393_v61 = vshll.u32 %v1353_v16, 8  ;;  %vm1243_vm4 = vcmp.lt.s32.totalorder %v8645_v7, 0 }
 0x1e3   : > { %v1130_v13 = vxor.u32 2147483648, %v4655_v33  ;;  %v1220_v42 = vmul.f32 %v1219_v19, %v1217_v43  ;;  %v1307_v44 = vsub.s32 0, %v6106_v5  ;;  %v1383_v52 = vsel %vm1379_vm7, %v1367_v63, %v1382_v50 }
 0x1e4   : > { %v1134_v11 = vsel %vm1132_vm2, %v1133_v3, %v4655_v33  ;;  %v1392_v62 = vsel %vm1378_vm5, %v1389_v35, %v1391_v2  ;;  %v6122_v55 = vmul.u32.u64.low %v1393_v61, %v1388_v20  ;;  %v6123_v0 = vmul.u32.u64.high %v1393_v61, %v1388_v20, %v6122_v55  ;;  %v8667_v33 = vld [vmem:[#allocation27_spill] sm:$0xff] }
 0x1e5   : > { %vm1128_vm6 = vcmp.lt.s32.totalorder %v6041_v21, 2  ;;  %v1131_v48 = vsel %vm1129_vm12, %v4653_v39, %v1130_v13  ;;  %v1221_v8 = vxor.u32 2147483648, %v1220_v42  ;;  %v4252_v27 = vmin.u32 %v1307_v44, %v6106_v5  ;;  %v8668_v13 = vld [vmem:[#allocation21_spill] sm:$0xff] }
 0x1e6   : > { %v1135_v49 = vsel %vm1128_vm6, %v1131_v48, %v1134_v11  ;;  %v1230_v63 = vadd.s32 3, %v1226_v18  ;;  %v6130_v16 = vmul.u32.u64.low %v1393_v61, %v1392_v62  ;;  %v6131_v56 = vmul.u32.u64.high %v1393_v61, %v1392_v62, %v6130_v16 }
 0x1e7   : > { %v1136_v36 = vsel %vm1125_vm13, nan, %v1135_v49  ;;  %v1222_v24 = vsel %vm1139_vm1, %v1221_v8, %v1220_v42  ;;  %v1309_v30 = vclz %v4252_v27  ;;  %v1384_v50 = vsel %vm1378_vm5, %v1381_v40, %v1383_v52 }
 0x1e8   : > { %v6142_v21 = vsel %vm1980_vm11, %v5821_v22, 0  ;;  %4457 = vmatmul.mubr.msk.f32.gmra.mrb[4].mxu1 %vm255_vm0, %v1136_v36  ;;  %v1225_v18 = vsel %vm6078_vm15, %v8636_v53, %v1222_v24  ;;  %v1327_v15 = vsub.s32 4, %v6083_v41  ;;  %v1403_v58 = vadd.s32 1, %v6123_v0 }
 0x1e9   : > { %v6151_v6 = vsub.s32 32, %v5932_v25  ;;  %4656 = vcosq.f32 %v1225_v18  ;;  %v4253_v1 = vadd.s32 4294967294, %v1309_v30  ;;  %v1449_v46 = vand.u32 2147483647, %v8664_v34 }
 0x1ea   : > { %4658 = vsinq.f32 %v1225_v18  ;;  %vm6156_vm1 = vcmp.le.f32.partialorder %v1241_v51, 0.7853982  ;;  %v1400_v23 = vmul.u32 %v1393_v61, %v1384_v50  ;;  %vm1402_vm8 = vc.u32 %v6131_v56, %v6122_v55 }
 0x1eb   : > { %v1231_v2 = vand.u32 3, %v1230_v63  ;;  %v1297_v39 = vadd.s32 %v6020_v31, %v6011_v37  ;;  %vm4254_vm12 = vcmp.lt.s32.totalorder %v4253_v1, 0  ;;  %v1404_v43 = vsel %vm1402_vm8, %v1403_v58, %v6123_v0 }
 0x1ec   : > { %v1312_v19 = vsel %vm4254_vm12, 0, %v4253_v1  ;;  %v1328_v35 = vsel %vm1243_vm4, %v1327_v15, %v6083_v41  ;;  %v1405_v51 = vadd.s32 %v1404_v43, %v1400_v23  ;;  %v1467_v3 = vshrl.u32 %v8603_v9, %v8667_v33  ;;  %v8669_v15 = vld [vmem:[#allocation33_spill] sm:$0xff] }
 0x1ed   : > { %v1313_v40 = vsub.s32 32, %v1312_v19  ;;  %v1317_v20 = vsub.s32 4294967266, %v1312_v19  ;;  %v1456_v61 = vand.u32 8388607, %v1449_v46  ;;  %v1466_v37 = vshll.u32 %v8608_v57, %v8668_v13  ;;  %v8670_v43 = vld [vmem:[#allocation45_spill] sm:$0xff] }
 0x1ee   : > { %v1314_v31 = vshll.u32 %v6106_v5, %v1312_v19  ;;  %v1406_v42 = vadd.s32 536870912, %v1405_v51  ;;  %v1469_v44 = vshll.u32 %v8603_v9, %v8668_v13  ;;  %v1470_v41 = vshrl.u32 %v8604_v28, %v8667_v33  ;;  %v8671_v19 = vld [vmem:[#allocation38_spill] sm:$0xff] }
 0x1ef   : > { %vm1232_vm2 = vcmp.lt.s32.totalorder %v1231_v2, 2  ;;  %v1315_v52 = vshrl.u32 %v1297_v39, %v1313_v40  ;;  %v1318_v11 = vadd.s32 127, %v1317_v20  ;;  %v1472_v62 = vshll.u32 %v8604_v28, %v8668_v13  ;;  %v8672_v20 = vld [vmem:[#allocation44_spill] sm:$0xff] }
 0x1f0   : > { %v1473_v0 = vshrl.u32 %v8564_v54, %v8667_v33  ;;  %vm1229_vm15 = vweird.f32 %v8636_v53  ;;  %vm1233_vm11 = vcmp.eq.s32.totalorder %v1231_v2, 0  ;;  %v1407_v5 = vshrl.u32 %v1406_v42, 30 }
 0x1f1   : > { %v1468_v48 = vor.u32 %v1467_v3, %v1466_v37  ;;  %v1471_v8 = vor.u32 %v1470_v41, %v1469_v44  ;;  %vm1236_vm13 = vcmp.eq.s32.totalorder %v1231_v2, 2  ;;  %v1316_v27 = vor.u32 %v1315_v52, %v1314_v31 }
 0x1f2   : > { %v1319_v49 = vshll.u32 %v1318_v11, 23  ;;  %v1474_v63 = vor.u32 %v1473_v0, %v1472_v62  ;;  %v1330_v16 = vsel %vm6156_vm1, 0, %v1328_v35  ;;  %v1408_v36 = vshll.u32 %v1407_v5, 30 }
 0x1f3   : > { %v1457_v24 = vor.u32 8388608, %v1456_v61  ;;  %v1465_v30 = vshrl.u32 %v8608_v57, %v8667_v33  ;;  %v4657_v50 = vpop.eup %4656  ;;  %vm1347_vm10 = vcmp.lt.s32.totalorder %v8654_v59, 0  ;;  %vm1481_vm7 = vcmp.lt.s32.totalorder %v8669_v15, 1 }
 0x1f4   : > { %v1320_v18 = vor.u32 4788187, %v1319_v49  ;;  %vm1482_vm5 = vcmp.lt.s32.totalorder %v8669_v15, 2  ;;  %vm1483_vm3 = vcmp.lt.s32.totalorder %v8669_v15, 3  ;;  %v4659_v58 = vpop.eup %4658  ;;  %v1237_v1 = vxor.u32 2147483648, %v4657_v50 }
 0x1f5   : > { %v6192_v23 = vsub.s32 %v1405_v51, %v1408_v36  ;;  %v1489_v39 = vsel %vm1481_vm7, %v1468_v48, %v1471_v8  ;;  %v1495_v35 = vsel %vm1483_vm3, %v8671_v19, %v8670_v43  ;;  %v1234_v33 = vxor.u32 2147483648, %v4659_v58 }
 0x1f6   : > { %v1321_v3 = vand.u32 2147483647, %v1320_v18  ;;  %v1323_v40 = vcvt.s32.f32 %v1316_v27  ;;  %v1491_v61 = vsel %vm1483_vm3, %v1474_v63, %v8672_v20  ;;  %v1238_v13 = vsel %vm1236_vm13, %v1237_v1, %v4659_v58 }
 0x1f7   : > { %v1411_v51 = vsub.s32 0, %v6192_v23  ;;  %v1431_v37 = vsub.s32 4, %v1407_v5  ;;  %vm8673_vm6 = vcmp.lt.s32.totalorder %v8669_v15, 4  ;;  %v1235_v42 = vsel %vm1233_vm11, %v4657_v50, %v1234_v33 }
 0x1f8   : > { %v1486_v31 = vsel %vm8673_vm6, %v1474_v63, 2102212464  ;;  %v1324_v44 = vmul.f32 %v1323_v40, %v1321_v3  ;;  %v1493_v41 = vsel %vm1481_vm7, %v1471_v8, %v1474_v63  ;;  %v1497_v52 = vshll.u32 %v1457_v24, 8 }
 0x1f9   : > { %v1239_v11 = vsel %vm1232_vm2, %v1235_v42, %v1238_v13  ;;  %v4256_v62 = vmin.u32 %v1411_v51, %v6192_v23  ;;  %v1492_v0 = vsel %vm1482_vm5, %v1489_v39, %v1491_v61  ;;  %v1496_v27 = vsel %vm1482_vm5, %v1493_v41, %v1495_v35 }
 0x1fa   : > { %v1240_v49 = vsel %vm1229_vm15, nan, %v1239_v11  ;;  %v1325_v36 = vxor.u32 2147483648, %v1324_v44  ;;  %v6218_v50 = vmul.u32.u64.low %v1497_v52, %v1496_v27  ;;  %v6219_v18 = vmul.u32.u64.high %v1497_v52, %v1496_v27, %v6218_v50 }
 0x1fb   : > { %4459 = vmatprep.mubr.msk.f32.mxu1 %vm255_vm0, %v1240_v49  ;;  %v1334_v63 = vadd.s32 3, %v1330_v16  ;;  %v1413_v2 = vclz %v4256_v62  ;;  %v1485_v24 = vsel %vm1481_vm7, %v1465_v30, %v1468_v48  ;;  %v1487_v58 = vsel %vm1483_vm3, %v1471_v8, %v1486_v31  ;;  %v8674_v8 = vld [vmem:[#allocation10_spill] sm:$0xff]  ;;  %v8677_v31 = vld [vmem:[#allocation43_spill] sm:$0xff] }
 0x1fc   : > { %v6228_v1 = vshll.u32 %v8564_v54, %v5932_v25  ;;  %v1326_v53 = vsel %vm1243_vm4, %v1325_v36, %v1324_v44  ;;  %v6232_v39 = vmul.u32.u64.low %v1497_v52, %v1492_v0  ;;  %v6233_v43 = vmul.u32.u64.high %v1497_v52, %v1492_v0, %v6232_v39  ;;  %v8678_v44 = vld [vmem:[#allocation37_spill] sm:$0xff] }
 0x1fd   : > { %v1329_v16 = vsel %vm6156_vm1, %v8645_v7, %v1326_v53  ;;  %v4257_v19 = vadd.s32 4294967294, %v1413_v2  ;;  %v1432_v48 = vsel %vm1347_vm10, %v1431_v37, %v1407_v5  ;;  %v1553_v30 = vand.u32 2147483647, %v8674_v8 }
 0x1fe   : > { %v6243_v35 = vand.u32 31, %v6142_v21  ;;  %4660 = vcosq.f32 %v1329_v16  ;;  %vm6247_vm4 = vcmp.le.f32.partialorder %v1345_v29, 0.7853982  ;;  %v1488_v22 = vsel %vm1482_vm5, %v1485_v24, %v1487_v58 }
 0x1ff   : > { %4662 = vsinq.f32 %v1329_v16  ;;  %v6253_v3 = vand.u32 3, %v1334_v63  ;;  %vm4258_vm1 = vcmp.lt.s32.totalorder %v4257_v19, 0  ;;  %vm1506_vm8 = vc.u32 %v6219_v18, %v6232_v39 }
 0x200   : > { %v1401_v5 = vadd.s32 %v6122_v55, %v6131_v56  ;;  %v1416_v40 = vsel %vm4258_vm1, 0, %v4257_v19  ;;  %v1434_v29 = vsel %vm6247_vm4, 0, %v1432_v48  ;;  %v1507_v20 = vadd.s32 1, %v6233_v43  ;;  %v8679_v19 = vld [vmem:[#allocation47_spill] sm:$0xff] }
 0x201   : > { %v1417_v61 = vsub.s32 32, %v1416_v40  ;;  %v1421_v13 = vsub.s32 4294967266, %v1416_v40  ;;  %v1504_v15 = vmul.u32 %v1497_v52, %v1488_v22  ;;  %v1560_v51 = vand.u32 8388607, %v1553_v30 }
 0x202   : > { %v1508_v37 = vsel %vm1506_vm8, %v1507_v20, %v6233_v43  ;;  %v1571_v42 = vshrl.u32 %v8603_v9, %v8677_v31  ;;  %v1573_v55 = vshll.u32 %v8603_v9, %v8678_v44  ;;  %v1574_v56 = vshrl.u32 %v8604_v28, %v8677_v31  ;;  %v8680_v20 = vld [vmem:[#allocation55_spill] sm:$0xff] }
 0x203   : > { %vm1337_vm12 = vcmp.eq.s32.totalorder %v6253_v3, 0  ;;  %v1418_v41 = vshll.u32 %v6192_v23, %v1416_v40  ;;  %v1419_v11 = vshrl.u32 %v1401_v5, %v1417_v61  ;;  %v1422_v52 = vadd.s32 127, %v1421_v13  ;;  %v8681_v61 = vld [vmem:[#allocation51_spill] sm:$0xff] }
 0x204   : > { %v1509_v62 = vadd.s32 %v1508_v37, %v1504_v15  ;;  %vm1336_vm2 = vcmp.lt.s32.totalorder %v6253_v3, 2  ;;  %v1570_v0 = vshll.u32 %v8608_v57, %v8678_v44  ;;  %v1575_v27 = vor.u32 %v1574_v56, %v1573_v55  ;;  %v8683_v55 = vld [vmem:[#allocation54_spill] sm:$0xff] }
 0x205   : > { %v1576_v49 = vshll.u32 %v8604_v28, %v8678_v44  ;;  %v1577_v36 = vshrl.u32 %v8564_v54, %v8677_v31  ;;  %vm1333_vm15 = vweird.f32 %v8645_v7  ;;  %vm1340_vm11 = vcmp.eq.s32.totalorder %v6253_v3, 2 }
 0x206   : > { %v1420_v23 = vor.u32 %v1419_v11, %v1418_v41  ;;  %v1423_v50 = vshll.u32 %v1422_v52, 23  ;;  %v1510_v63 = vadd.s32 536870912, %v1509_v62  ;;  %v1438_v2 = vadd.s32 3, %v1434_v29 }
 0x207   : > { %v1569_v24 = vshrl.u32 %v8608_v57, %v8677_v31  ;;  %v1572_v58 = vor.u32 %v1571_v42, %v1570_v0  ;;  %v1578_v53 = vor.u32 %v1577_v36, %v1576_v49  ;;  %vm1585_vm13 = vcmp.lt.s32.totalorder %v8679_v19, 1 }
 0x208   : > { %v1424_v43 = vor.u32 4788187, %v1423_v50  ;;  %v1511_v16 = vshrl.u32 %v1510_v63, 30  ;;  %vm1587_vm7 = vcmp.lt.s32.totalorder %v8679_v19, 3  ;;  %v4661_v48 = vpop.eup %4660  ;;  %v1427_v22 = vcvt.s32.f32 %v1420_v23 }
 0x209   : > { %v1561_v5 = vor.u32 8388608, %v1560_v51  ;;  %v1597_v40 = vsel %vm1585_vm13, %v1575_v27, %v1578_v53  ;;  %v1599_v29 = vsel %vm1587_vm7, %v8681_v61, %v8680_v20  ;;  %v4663_v13 = vpop.eup %4662  ;;  %vm1451_vm5 = vcmp.lt.s32.totalorder %v8664_v34, 0 }
 0x20a   : > { %v1341_v15 = vxor.u32 2147483648, %v4661_v48  ;;  %v1425_v37 = vand.u32 2147483647, %v1424_v43  ;;  %v1512_v31 = vshll.u32 %v1511_v16, 30  ;;  %vm8682_vm3 = vcmp.lt.s32.totalorder %v8679_v19, 4 }
 0x20b   : > { %v1590_v42 = vsel %vm8682_vm3, %v1578_v53, 2102212464  ;;  %v1338_v44 = vxor.u32 2147483648, %v4663_v13  ;;  %vm1586_vm6 = vcmp.lt.s32.totalorder %v8679_v19, 2  ;;  %v1593_v51 = vsel %vm1585_vm13, %v1572_v58, %v1575_v27 }
 0x20c   : > { %v1595_v56 = vsel %vm1587_vm7, %v1578_v53, %v8683_v55  ;;  %v1342_v41 = vsel %vm1340_vm11, %v1341_v15, %v4663_v13  ;;  %v1428_v11 = vmul.f32 %v1427_v22, %v1425_v37  ;;  %v6303_v52 = vsub.s32 %v1509_v62, %v1512_v31  ;;  %v8684_v37 = vld [vmem:[#allocation8_spill] sm:$0xff] }
 0x20d   : > { %v1600_v0 = vsel %vm1586_vm6, %v1597_v40, %v1599_v29  ;;  %v1339_v49 = vsel %vm1337_vm12, %v4661_v48, %v1338_v44  ;;  %v1589_v36 = vsel %vm1585_vm13, %v1569_v24, %v1572_v58  ;;  %v1591_v23 = vsel %vm1587_vm7, %v1575_v27, %v1590_v42 }
 0x20e   : > { %v1601_v50 = vshll.u32 %v1561_v5, 8  ;;  %v1343_v63 = vsel %vm1336_vm2, %v1339_v49, %v1342_v41  ;;  %v1429_v53 = vxor.u32 2147483648, %v1428_v11  ;;  %v1515_v62 = vsub.s32 0, %v6303_v52  ;;  %v8688_v41 = vld [vmem:[#allocation34_spill] sm:$0xff] }
 0x20f   : > { %v1596_v43 = vsel %vm1586_vm6, %v1593_v51, %v1595_v56  ;;  %v1344_v22 = vsel %vm1333_vm15, nan, %v1343_v63  ;;  %v1535_v48 = vsub.s32 4, %v1511_v16  ;;  %v6325_v27 = vshrl.u32 %v8581_v60, %v6151_v6 }
 0x210   : > { %v6320_v40 = vmul.u32.u64.low %v1601_v50, %v1600_v0  ;;  %v6321_v20 = vmul.u32.u64.high %v1601_v50, %v1600_v0, %v6320_v40  ;;  %v6329_v3 = vshll.u32 %v8581_v60, %v5932_v25  ;;  %4460 = vmatmul.mubr.msk.f32.gmra.mrb[6].mxu1 %vm255_vm0, %v1344_v22  ;;  %v1430_v24 = vsel %vm1347_vm10, %v1429_v53, %v1428_v11 }
 0x211   : > { %v4260_v7 = vmin.u32 %v1515_v62, %v6303_v52  ;;  %v1433_v58 = vsel %vm6247_vm4, %v8654_v59, %v1430_v24  ;;  %v1592_v5 = vsel %vm1586_vm6, %v1589_v36, %v1591_v23  ;;  %v6344_v13 = vand.u32 3, %v1438_v2  ;;  %v8687_v2 = vld [vmem:[#allocation28_spill] sm:$0xff] }
 0x212   : > { %v6340_v61 = vmul.u32.u64.low %v1601_v50, %v1596_v43  ;;  %v6341_v29 = vmul.u32.u64.high %v1601_v50, %v1596_v43, %v6340_v61  ;;  %4664 = vcosq.f32 %v1433_v58  ;;  %v1657_v31 = vand.u32 2147483647, %v8684_v37 }
 0x213   : > { %v1517_v15 = vclz %v4260_v7  ;;  %v6348_v42 = vsub.s32 32, %v6243_v35  ;;  %4666 = vsinq.f32 %v1433_v58  ;;  %vm6352_vm10 = vcmp.le.f32.partialorder %v1449_v46, 0.7853982  ;;  %v8689_v58 = vld [vmem:[#allocation42_spill] sm:$0xff] }
 0x214   : > { %v1536_v19 = vsel %vm1451_vm5, %v1535_v48, %v1511_v16  ;;  %v1608_v51 = vmul.u32 %v1601_v50, %v1592_v5  ;;  %vm1610_vm4 = vc.u32 %v6321_v20, %v6340_v61  ;;  %v1674_v55 = vshll.u32 %v8608_v57, %v8687_v2 }
 0x215   : > { %v4261_v44 = vadd.s32 4294967294, %v1517_v15  ;;  %v1611_v56 = vadd.s32 1, %v6341_v29  ;;  %v1675_v11 = vshrl.u32 %v8603_v9, %v8688_v41  ;;  %v1677_v46 = vshll.u32 %v8603_v9, %v8687_v2 }
 0x216   : > { %v1678_v0 = vshrl.u32 %v8604_v28, %v8688_v41  ;;  %vm1444_vm1 = vcmp.eq.s32.totalorder %v6344_v13, 2  ;;  %v1664_v16 = vand.u32 8388607, %v1657_v31  ;;  %v1680_v49 = vshll.u32 %v8604_v28, %v8687_v2 }
 0x217   : > { %vm4262_vm8 = vcmp.lt.s32.totalorder %v4261_v44, 0  ;;  %v1681_v36 = vshrl.u32 %v8564_v54, %v8688_v41  ;;  %vm1441_vm12 = vcmp.eq.s32.totalorder %v6344_v13, 0  ;;  %v1612_v50 = vsel %vm1610_vm4, %v1611_v56, %v6341_v29 }
 0x218   : > { %v1520_v23 = vsel %vm4262_vm8, 0, %v4261_v44  ;;  %v1676_v63 = vor.u32 %v1675_v11, %v1674_v55  ;;  %v1679_v53 = vor.u32 %v1678_v0, %v1677_v46  ;;  %vm1440_vm2 = vcmp.lt.s32.totalorder %v6344_v13, 2  ;;  %v8692_v46 = vld [vmem:[#allocation50_spill] sm:$0xff] }
 0x219   : > { %v1505_v62 = vadd.s32 %v6232_v39, %v6219_v18  ;;  %v1521_v43 = vsub.s32 32, %v1520_v23  ;;  %v1525_v22 = vsub.s32 4294967266, %v1520_v23  ;;  %v1613_v48 = vadd.s32 %v1612_v50, %v1608_v51  ;;  %v8690_v51 = vld [vmem:[#allocation53_spill] sm:$0xff] }
 0x21a   : > { %vm1437_vm15 = vweird.f32 %v8654_v59  ;;  %v1522_v40 = vshll.u32 %v6303_v52, %v1520_v23  ;;  %v1538_v24 = vsel %vm6352_vm10, 0, %v1536_v19  ;;  %v1682_v7 = vor.u32 %v1681_v36, %v1680_v49  ;;  %v8691_v52 = vld [vmem:[#allocation46_spill] sm:$0xff] }
 0x21b   : > { %vm1689_vm11 = vcmp.lt.s32.totalorder %v8689_v58, 1  ;;  %v1523_v5 = vshrl.u32 %v1505_v62, %v1521_v43  ;;  %v1526_v29 = vadd.s32 127, %v1525_v22  ;;  %v1614_v15 = vadd.s32 536870912, %v1613_v48 }
 0x21c   : > { %vm1691_vm13 = vcmp.lt.s32.totalorder %v8689_v58, 3  ;;  %v1665_v44 = vor.u32 8388608, %v1664_v16  ;;  %v1697_v18 = vsel %vm1689_vm11, %v1676_v63, %v1679_v53  ;;  %v1701_v39 = vsel %vm1689_vm11, %v1679_v53, %v1682_v7  ;;  %v4665_v2 = vpop.eup %4664 }
 0x21d   : > { %v1703_v19 = vsel %vm1691_vm13, %v8691_v52, %v8690_v51  ;;  %v1524_v55 = vor.u32 %v1523_v5, %v1522_v40  ;;  %v1527_v56 = vshll.u32 %v1526_v29, 23  ;;  %v6395_v11 = vshrl.u32 %v1614_v15, 30  ;;  %v4667_v16 = vpop.eup %4666 }
 0x21e   : > { %v1699_v0 = vsel %vm1691_vm13, %v1682_v7, %v8692_v46  ;;  %v1445_v49 = vxor.u32 2147483648, %v4665_v2  ;;  %v1542_v36 = vadd.s32 3, %v1538_v24  ;;  %v1673_v23 = vshrl.u32 %v8608_v57, %v8688_v41 }
 0x21f   : > { %vm1690_vm7 = vcmp.lt.s32.totalorder %v8689_v58, 2  ;;  %v1442_v50 = vxor.u32 2147483648, %v4667_v16  ;;  %v1528_v62 = vor.u32 4788187, %v1527_v56  ;;  %v1616_v43 = vshll.u32 %v6395_v11, 30 }
 0x220   : > { %v1704_v22 = vsel %vm1690_vm7, %v1701_v39, %v1703_v19  ;;  %v1446_v40 = vsel %vm1444_vm1, %v1445_v49, %v4667_v16  ;;  %vm8693_vm3 = vcmp.lt.s32.totalorder %v8689_v58, 4  ;;  %v1700_v24 = vsel %vm1690_vm7, %v1697_v18, %v1699_v0  ;;  %v8694_v58 = vld [vmem:[#allocation40_spill] sm:$0xff] }
 0x221   : > { %v1694_v5 = vsel %vm8693_vm3, %v1682_v7, 2102212464  ;;  %v1705_v29 = vshll.u32 %v1665_v44, 8  ;;  %v1443_v41 = vsel %vm1441_vm12, %v4665_v2, %v1442_v50  ;;  %v1529_v15 = vand.u32 2147483647, %v1528_v62 }
 0x222   : > { %v1531_v51 = vcvt.s32.f32 %v1524_v55  ;;  %v6414_v52 = vsub.s32 %v1613_v48, %v1616_v43  ;;  %v1447_v39 = vsel %vm1440_vm2, %v1443_v41, %v1446_v40  ;;  %v1693_v19 = vsel %vm1689_vm11, %v1673_v23, %v1676_v63 }
 0x223   : > { %v6420_v56 = vmul.u32.u64.low %v1705_v29, %v1704_v22  ;;  %v6421_v46 = vmul.u32.u64.high %v1705_v29, %v1704_v22, %v6420_v56  ;;  %v1448_v7 = vsel %vm1437_vm15, nan, %v1447_v39  ;;  %v1695_v2 = vsel %vm1691_vm13, %v1679_v53, %v1694_v5 }
 0x224   : > { %v1532_v44 = vmul.f32 %v1531_v51, %v1529_v15  ;;  %v1619_v18 = vsub.s32 0, %v6414_v52  ;;  %v6430_v48 = vshrl.u32 %v8573_v38, %v6151_v6  ;;  %v6433_v13 = vshrl.u32 %v6142_v21, 5  ;;  %4462 = vmatprep.mubr.msk.f32.mxu1 %vm255_vm0, %v1448_v7 }
 0x225   : > { %v6436_v63 = vmul.u32.u64.low %v1705_v29, %v1700_v24  ;;  %v6437_v55 = vmul.u32.u64.high %v1705_v29, %v1700_v24, %v6436_v63  ;;  %vm1555_vm6 = vcmp.lt.s32.totalorder %v8674_v8, 0  ;;  %v6443_v59 = vshll.u32 %v8564_v54, %v6243_v35 }
 0x226   : > { %v6447_v53 = vshll.u32 %v8581_v60, %v6243_v35  ;;  %v1533_v0 = vxor.u32 2147483648, %v1532_v44  ;;  %v4264_v21 = vmin.u32 %v1619_v18, %v6414_v52  ;;  %v6452_v16 = vor.u32 %v6325_v27, %v6228_v1 }
 0x227   : > { %v6456_v49 = vshrl.u32 %v8581_v60, %v6348_v42  ;;  %v6460_v23 = vshrl.u32 %v8573_v38, %v6348_v42  ;;  %v1696_v50 = vsel %vm1690_vm7, %v1693_v19, %v1695_v2  ;;  %v6466_v43 = vand.u32 3, %v1542_v36 }
 0x228   : > { %v1534_v62 = vsel %vm1451_vm5, %v1533_v0, %v1532_v44  ;;  %v1609_v1 = vadd.s32 %v6340_v61, %v6321_v20  ;;  %v1621_v27 = vclz %v4264_v21  ;;  %v1639_v40 = vsub.s32 4, %v6395_v11 }
 0x229   : > { %v1537_v22 = vsel %vm6352_vm10, %v8664_v34, %v1534_v62  ;;  %vm1714_vm4 = vc.u32 %v6421_v46, %v6436_v63  ;;  %v1761_v5 = vand.u32 2147483647, %v8694_v58  ;;  %vm6479_vm5 = vcmp.le.f32.partialorder %v1553_v30, 0.7853982 }
 0x22a   : > { %4668 = vcosq.f32 %v1537_v22  ;;  %v4265_v20 = vadd.s32 4294967294, %v1621_v27  ;;  %v1712_v61 = vmul.u32 %v1705_v29, %v1696_v50  ;;  %v1715_v24 = vadd.s32 1, %v6437_v55 }
 0x22b   : > { %4670 = vsinq.f32 %v1537_v22  ;;  %v1779_v33 = vshrl.u32 %v8603_v9, %v5491_v32  ;;  %v1781_v41 = vshll.u32 %v8603_v9, %v5436_v10  ;;  %v1782_v15 = vshrl.u32 %v8604_v28, %v5491_v32 }
 0x22c   : > { %vm4266_vm10 = vcmp.lt.s32.totalorder %v4265_v20, 0  ;;  %v1716_v30 = vsel %vm1714_vm4, %v1715_v24, %v6437_v55  ;;  %v1784_v51 = vshll.u32 %v8604_v28, %v5436_v10  ;;  %v1785_v29 = vshrl.u32 %v8564_v54, %v5491_v32 }
 0x22d   : > { %v1624_v39 = vsel %vm4266_vm10, 0, %v4265_v20  ;;  %v1717_v19 = vadd.s32 %v1716_v30, %v1712_v61  ;;  %v1768_v56 = vand.u32 8388607, %v1761_v5  ;;  %v1778_v7 = vshll.u32 %v8608_v57, %v5436_v10 }
 0x22e   : > { %v1625_v44 = vsub.s32 32, %v1624_v39  ;;  %v1629_v18 = vsub.s32 4294967266, %v1624_v39  ;;  %v1783_v2 = vor.u32 %v1782_v15, %v1781_v41  ;;  %v1786_v0 = vor.u32 %v1785_v29, %v1784_v51 }
 0x22f   : > { %vm1545_vm1 = vcmp.eq.s32.totalorder %v6466_v43, 0  ;;  %vm1548_vm8 = vcmp.eq.s32.totalorder %v6466_v43, 2  ;;  %v1640_v55 = vsel %vm1555_vm6, %v1639_v40, %v6395_v11  ;;  %v1718_v21 = vadd.s32 536870912, %v1717_v19 }
 0x230   : > { %v1777_v50 = vshrl.u32 %v8608_v57, %v5491_v32  ;;  %vm1544_vm12 = vcmp.lt.s32.totalorder %v6466_v43, 2  ;;  %v1626_v10 = vshll.u32 %v6414_v52, %v1624_v39  ;;  %v1627_v62 = vshrl.u32 %v1609_v1, %v1625_v44 }
 0x231   : > { %v1630_v27 = vadd.s32 127, %v1629_v18  ;;  %v1780_v22 = vor.u32 %v1779_v33, %v1778_v7  ;;  %vm1541_vm2 = vweird.f32 %v8664_v34  ;;  %v6509_v20 = vshrl.u32 %v1718_v21, 30 }
 0x232   : > { %v1769_v61 = vor.u32 8388608, %v1768_v56  ;;  %vm1793_vm15 = vcmp.lt.s32.totalorder %v5431_v4, 1  ;;  %vm1795_vm11 = vcmp.lt.s32.totalorder %v5431_v4, 3  ;;  %v1628_v11 = vor.u32 %v1627_v62, %v1626_v10 }
 0x233   : > { %v1631_v40 = vshll.u32 %v1630_v27, 23  ;;  %v1798_v32 = vsel %vm1796_vm9, %v1786_v0, 2102212464  ;;  %v1805_v24 = vsel %vm1793_vm15, %v1783_v2, %v1786_v0  ;;  %v1642_v52 = vsel %vm6479_vm5, 0, %v1640_v55 }
 0x234   : > { %v1720_v1 = vshll.u32 %v6509_v20, 30  ;;  %vm1794_vm13 = vcmp.lt.s32.totalorder %v5431_v4, 2  ;;  %v1807_v33 = vsel %vm1795_vm11, %v5833_v45, %v6037_v47  ;;  %v4669_v41 = vpop.eup %4668  ;;  %v1797_v30 = vsel %vm1793_vm15, %v1777_v50, %v1780_v22 }
 0x235   : > { %v1632_v15 = vor.u32 4788187, %v1631_v40  ;;  %v1801_v51 = vsel %vm1793_vm15, %v1780_v22, %v1783_v2  ;;  %v1803_v29 = vsel %vm1795_vm11, %v1786_v0, %v6030_v14  ;;  %v4671_v39 = vpop.eup %4670  ;;  %v1549_v56 = vxor.u32 2147483648, %v4669_v41  ;;  %v8697_v40 = vld [vmem:[#allocation24_spill] sm:$0xff] }
 0x236   : > { %v6526_v7 = vsub.s32 %v1717_v19, %v1720_v1  ;;  %v1799_v44 = vsel %vm1795_vm11, %v1783_v2, %v1798_v32  ;;  %v1808_v18 = vsel %vm1794_vm13, %v1805_v24, %v1807_v33  ;;  %v1546_v55 = vxor.u32 2147483648, %v4671_v39 }
 0x237   : > { %v1633_v45 = vand.u32 2147483647, %v1632_v15  ;;  %v1635_v47 = vcvt.s32.f32 %v1628_v11  ;;  %v1809_v21 = vshll.u32 %v1769_v61, 8  ;;  %v1550_v50 = vsel %vm1548_vm8, %v1549_v56, %v4671_v39  ;;  %v8700_v39 = vld [vmem:[#allocation56_spill] sm:$0xff] }
 0x238   : > { %v1646_v10 = vadd.s32 3, %v1642_v52  ;;  %v1723_v14 = vsub.s32 0, %v6526_v7  ;;  %v1804_v19 = vsel %vm1794_vm13, %v1801_v51, %v1803_v29  ;;  %v1547_v0 = vsel %vm1545_vm1, %v4669_v41, %v1546_v55 }
 0x239   : > { %v1636_v2 = vmul.f32 %v1635_v47, %v1633_v45  ;;  %v6539_v62 = vmul.u32.u64.low %v1809_v21, %v1808_v18  ;;  %v6540_v27 = vmul.u32.u64.high %v1809_v21, %v1808_v18, %v6539_v62  ;;  %vm1659_vm9 = vcmp.lt.s32.totalorder %v8684_v37, 0 }
 0x23a   : > { %v1551_v22 = vsel %vm1544_vm12, %v1547_v0, %v1550_v50  ;;  %v4268_v61 = vmin.u32 %v1723_v14, %v6526_v7  ;;  %v1800_v11 = vsel %vm1794_vm13, %v1797_v30, %v1799_v44  ;;  %v1865_v32 = vand.u32 2147483647, %v8697_v40  ;;  %v8701_v44 = vld [vmem:[#allocation57_spill] sm:$0xff] }
 0x23b   : > { %v1552_v24 = vsel %vm1541_vm2, nan, %v1551_v22  ;;  %v1637_v52 = vxor.u32 2147483648, %v1636_v2  ;;  %v6551_v1 = vmul.u32.u64.low %v1809_v21, %v1804_v19  ;;  %v6552_v33 = vmul.u32.u64.high %v1809_v21, %v1804_v19, %v6551_v1 }
 0x23c   : > { %v6557_v41 = vor.u32 %v6456_v49, %v6443_v59  ;;  %v2000_v43 = vor.u32 %v6460_v23, %v6447_v53  ;;  %4463 = vmatmul.mubr.msk.f32.gmra.mrb[8].mxu1 %vm255_vm0, %v1552_v24  ;;  %v6562_v4 = vand.u32 3, %v1646_v10  ;;  %v1725_v15 = vclz %v4268_v61 }
 0x23d   : > { %v1638_v34 = vsel %vm1555_vm6, %v1637_v52, %v1636_v2  ;;  %v1743_v30 = vsub.s32 4, %v6509_v20  ;;  %v1816_v51 = vmul.u32 %v1809_v21, %v1800_v11  ;;  %vm1818_vm7 = vc.u32 %v6540_v27, %v6551_v1 }
 0x23e   : > { %v1641_v59 = vsel %vm6479_vm5, %v8674_v8, %v1638_v34  ;;  %vm6574_vm3 = vcmp.le.f32.partialorder %v1657_v31, 0.7853982  ;;  %v4269_v29 = vadd.s32 4294967294, %v1725_v15  ;;  %v1882_v56 = vshll.u32 %v8608_v57, %v8700_v39 }
 0x23f   : > { %v1883_v18 = vshrl.u32 %v8603_v9, %v8701_v44  ;;  %4672 = vcosq.f32 %v1641_v59  ;;  %v1819_v55 = vadd.s32 1, %v6552_v33  ;;  %v1872_v36 = vand.u32 8388607, %v1865_v32 }
 0x240   : > { %v1885_v45 = vshll.u32 %v8603_v9, %v8700_v39  ;;  %4674 = vsinq.f32 %v1641_v59  ;;  %vm4270_vm6 = vcmp.lt.s32.totalorder %v4269_v29, 0  ;;  %v1886_v47 = vshrl.u32 %v8604_v28, %v8701_v44 }
 0x241   : > { %v1884_v31 = vor.u32 %v1883_v18, %v1882_v56  ;;  %v1728_v21 = vsel %vm4270_vm6, 0, %v4269_v29  ;;  %v1820_v50 = vsel %vm1818_vm7, %v1819_v55, %v6552_v33  ;;  %v1888_v10 = vshll.u32 %v8604_v28, %v8700_v39  ;;  %v8703_v39 = vld [vmem:[#allocation59_spill] sm:$0xff] }
 0x242   : > { %v1889_v14 = vshrl.u32 %v8564_v54, %v8701_v44  ;;  %v1713_v19 = vadd.s32 %v6436_v63, %v6421_v46  ;;  %v1729_v0 = vsub.s32 32, %v1728_v21  ;;  %v1733_v2 = vsub.s32 4294967266, %v1728_v21 }
 0x243   : > { %v1821_v62 = vadd.s32 %v1820_v50, %v1816_v51  ;;  %v1730_v22 = vshll.u32 %v6526_v7, %v1728_v21  ;;  %v1744_v61 = vsel %vm1659_vm9, %v1743_v30, %v6509_v20  ;;  %v1887_v11 = vor.u32 %v1886_v47, %v1885_v45  ;;  %v8702_v30 = vld [vmem:[#allocation60_spill] sm:$0xff] }
 0x244   : > { %v1890_v24 = vor.u32 %v1889_v14, %v1888_v10  ;;  %v1731_v52 = vshrl.u32 %v1713_v19, %v1729_v0  ;;  %v1734_v33 = vadd.s32 127, %v1733_v2  ;;  %vm1897_vm4 = vcmp.lt.s32.totalorder %v5318_v17, 1 }
 0x245   : > { %v1822_v15 = vadd.s32 536870912, %v1821_v62  ;;  %vm1648_vm5 = vcmp.lt.s32.totalorder %v6562_v4, 2  ;;  %vm1649_vm10 = vcmp.eq.s32.totalorder %v6562_v4, 0  ;;  %v1873_v46 = vor.u32 8388608, %v1872_v36 }
 0x246   : > { %vm1899_vm1 = vcmp.lt.s32.totalorder %v5318_v17, 3  ;;  %v1905_v63 = vsel %vm1897_vm4, %v1884_v31, %v1887_v11  ;;  %vm2004_vm8 = vcmp.lt.s32.totalorder %v6433_v13, 4  ;;  %v1732_v20 = vor.u32 %v1731_v52, %v1730_v22 }
 0x247   : > { %v1735_v7 = vshll.u32 %v1734_v33, 23  ;;  %v6607_v34 = vshrl.u32 %v1822_v15, 30  ;;  %v1907_v51 = vsel %vm1899_vm1, %v1890_v24, %v8702_v30  ;;  %vm1652_vm12 = vcmp.eq.s32.totalorder %v6562_v4, 2 }
 0x248   : > { %v1746_v59 = vsel %vm6574_vm3, 0, %v1744_v61  ;;  %v1909_v29 = vsel %vm1897_vm4, %v1887_v11, %v1890_v24  ;;  %v1911_v56 = vsel %vm1899_vm1, %v8703_v39, %v5810_v12  ;;  %v1881_v36 = vshrl.u32 %v8608_v57, %v8701_v44 }
 0x249   : > { %v1736_v18 = vor.u32 4788187, %v1735_v7  ;;  %v1824_v55 = vshll.u32 %v6607_v34, 30  ;;  %vm1898_vm2 = vcmp.lt.s32.totalorder %v5318_v17, 2  ;;  %v4673_v45 = vpop.eup %4672  ;;  %v1902_v47 = vsel %vm1900_vm14, %v1890_v24, 2102212464 }
 0x24a   : > { %v1908_v21 = vsel %vm1898_vm2, %v1905_v63, %v1907_v51  ;;  %v1912_v50 = vsel %vm1898_vm2, %v1909_v29, %v1911_v56  ;;  %v1913_v10 = vshll.u32 %v1873_v46, 8  ;;  %v4675_v12 = vpop.eup %4674  ;;  %v1653_v14 = vxor.u32 2147483648, %v4673_v45 }
 0x24b   : > { %v1737_v19 = vand.u32 2147483647, %v1736_v18  ;;  %v1739_v0 = vcvt.s32.f32 %v1732_v20  ;;  %v6631_v2 = vsub.s32 %v1821_v62, %v1824_v55  ;;  %v1650_v44 = vxor.u32 2147483648, %v4675_v12 }
 0x24c   : > { %v1901_v22 = vsel %vm1897_vm4, %v1881_v36, %v1884_v31  ;;  %v6635_v61 = vmul.u32.u64.low %v1913_v10, %v1912_v50  ;;  %v6636_v52 = vmul.u32.u64.high %v1913_v10, %v1912_v50, %v6635_v61  ;;  %v1654_v24 = vsel %vm1652_vm12, %v1653_v14, %v4675_v12 }
 0x24d   : > { %v1740_v33 = vmul.f32 %v1739_v0, %v1737_v19  ;;  %v1827_v15 = vsub.s32 0, %v6631_v2  ;;  %v1903_v46 = vsel %vm1899_vm1, %v1887_v11, %v1902_v47  ;;  %vm1763_vm14 = vcmp.lt.s32.totalorder %v8694_v58, 0 }
 0x24e   : > { %v1651_v62 = vsel %vm1649_vm10, %v4673_v45, %v1650_v44  ;;  %v1750_v63 = vadd.s32 3, %v1746_v59  ;;  %v6646_v20 = vmul.u32.u64.low %v1913_v10, %v1908_v21  ;;  %v6647_v31 = vmul.u32.u64.high %v1913_v10, %v1908_v21, %v6646_v20  ;;  %v8706_v45 = vld [vmem:[#allocation58_spill] sm:$0xff] }
 0x24f   : > { %vm1645_vm15 = vweird.f32 %v8674_v8  ;;  %v1655_v7 = vsel %vm1648_vm5, %v1651_v62, %v1654_v24  ;;  %v1741_v30 = vxor.u32 2147483648, %v1740_v33  ;;  %v4272_v51 = vmin.u32 %v1827_v15, %v6631_v2 }
 0x250   : > { %v6657_v11 = vsel %vm2004_vm8, %v6557_v41, 920167782  ;;  %v2014_v59 = vsel %vm2004_vm8, %v2000_v43, 1326507024  ;;  %v1656_v29 = vsel %vm1645_vm15, nan, %v1655_v7  ;;  %v1904_v8 = vsel %vm1898_vm2, %v1901_v22, %v1903_v46 }
 0x251   : > { %4465 = vmatprep.mubr.msk.f32.mxu1 %vm255_vm0, %v1656_v29  ;;  %v1742_v4 = vsel %vm1659_vm9, %v1741_v30, %v1740_v33  ;;  %vm6671_vm11 = vcmp.le.f32.partialorder %v1761_v5, 0.7853982  ;;  %v1829_v56 = vclz %v4272_v51  ;;  %vm1922_vm13 = vc.u32 %v6636_v52, %v6646_v20 }
 0x252   : > { %v1745_v17 = vsel %vm6574_vm3, %v8684_v37, %v1742_v4  ;;  %v6680_v53 = vand.u32 3, %v1750_v63  ;;  %v1817_v23 = vadd.s32 %v6551_v1, %v6540_v27  ;;  %v1923_v43 = vadd.s32 1, %v6647_v31 }
 0x253   : > { %4676 = vcosq.f32 %v1745_v17  ;;  %v4273_v5 = vadd.s32 4294967294, %v1829_v56  ;;  %v1847_v18 = vsub.s32 4, %v6607_v34  ;;  %v1920_v55 = vmul.u32 %v1913_v10, %v1904_v8 }
 0x254   : > { %4678 = vsinq.f32 %v1745_v17  ;;  %v1924_v36 = vsel %vm1922_vm13, %v1923_v43, %v6647_v31  ;;  %v1969_v47 = vand.u32 2147483647, %v8706_v45  ;;  %v1987_v49 = vshrl.u32 %v8603_v9, %v6348_v42 }
 0x255   : > { %vm4274_vm9 = vcmp.lt.s32.totalorder %v4273_v5, 0  ;;  %v1925_v21 = vadd.s32 %v1924_v36, %v1920_v55  ;;  %v1986_v27 = vshll.u32 %v8608_v57, %v6243_v35  ;;  %v1990_v1 = vshrl.u32 %v8604_v28, %v6348_v42 }
 0x256   : > { %v1832_v50 = vsel %vm4274_vm9, 0, %v4273_v5  ;;  %v1989_v10 = vshll.u32 %v8603_v9, %v6243_v35  ;;  %v1992_v12 = vshll.u32 %v8604_v28, %v6243_v35  ;;  %v1993_v14 = vshrl.u32 %v8564_v54, %v6348_v42 }
 0x257   : > { %vm1756_vm7 = vcmp.eq.s32.totalorder %v6680_v53, 2  ;;  %v1833_v19 = vsub.s32 32, %v1832_v50  ;;  %v1837_v0 = vsub.s32 4294967266, %v1832_v50  ;;  %v1848_v44 = vsel %vm1763_vm14, %v1847_v18, %v6607_v34 }
 0x258   : > { %v1926_v22 = vadd.s32 536870912, %v1925_v21  ;;  %v1976_v61 = vand.u32 8388607, %v1969_v47  ;;  %v1988_v24 = vor.u32 %v1987_v49, %v1986_v27  ;;  %v1991_v33 = vor.u32 %v1990_v1, %v1989_v10 }
 0x259   : > { %v1994_v15 = vor.u32 %v1993_v14, %v1992_v12  ;;  %vm1752_vm3 = vcmp.lt.s32.totalorder %v6680_v53, 2  ;;  %v1834_v35 = vshll.u32 %v6631_v2, %v1832_v50  ;;  %v1835_v46 = vshrl.u32 %v1817_v23, %v1833_v19 }
 0x25a   : > { %v1838_v62 = vadd.s32 127, %v1837_v0  ;;  %v6708_v63 = vshrl.u32 %v1926_v22, 30  ;;  %vm1749_vm6 = vweird.f32 %v8684_v37  ;;  %v1850_v34 = vsel %vm6671_vm11, 0, %v1848_v44 }
 0x25b   : > { %v1985_v31 = vshrl.u32 %v8608_v57, %v6348_v42  ;;  %vm2001_vm4 = vcmp.lt.s32.totalorder %v6433_v13, 1  ;;  %vm2003_vm5 = vcmp.lt.s32.totalorder %v6433_v13, 3  ;;  %v1836_v7 = vor.u32 %v1835_v46, %v1834_v35  ;;  %v8707_v35 = vld [vmem:[#allocation52_spill] sm:$0xff] }
 0x25c   : > { %v1839_v30 = vshll.u32 %v1838_v62, 23  ;;  %v1928_v2 = vshll.u32 %v6708_v63, 30  ;;  %v2006_v51 = vsel %vm2004_vm8, %v1994_v15, 2102212464  ;;  %v1977_v29 = vor.u32 8388608, %v1976_v61 }
 0x25d   : > { %vm2002_vm10 = vcmp.lt.s32.totalorder %v6433_v13, 2  ;;  %v2013_v8 = vsel %vm2001_vm4, %v1991_v33, %v1994_v15  ;;  %v2015_v4 = vsel %vm2003_vm5, %v6557_v41, %v2014_v59  ;;  %v4677_v42 = vpop.eup %4676  ;;  %v2005_v23 = vsel %vm2001_vm4, %v1985_v31, %v1988_v24 }
 0x25e   : > { %v1840_v56 = vor.u32 4788187, %v1839_v30  ;;  %v6724_v17 = vsub.s32 %v1925_v21, %v1928_v2  ;;  %v2009_v43 = vsel %vm2001_vm4, %v1988_v24, %v1991_v33  ;;  %v4679_v5 = vpop.eup %4678  ;;  %v1757_v18 = vxor.u32 2147483648, %v4677_v42 }
 0x25f   : > { %v1843_v55 = vcvt.s32.f32 %v1836_v7  ;;  %v2007_v36 = vsel %vm2003_vm5, %v1991_v33, %v2006_v51  ;;  %v2011_v49 = vsel %vm2003_vm5, %v1994_v15, %v6657_v11  ;;  %v1754_v27 = vxor.u32 2147483648, %v4679_v5 }
 0x260   : > { %v1841_v1 = vand.u32 2147483647, %v1840_v56  ;;  %v1931_v41 = vsub.s32 0, %v6724_v17  ;;  %v2016_v59 = vsel %vm2002_vm10, %v2013_v8, %v2015_v4  ;;  %vm1753_vm1 = vcmp.eq.s32.totalorder %v6680_v53, 0 }
 0x261   : > { %v1758_v21 = vsel %vm1756_vm7, %v1757_v18, %v4679_v5  ;;  %v1854_v50 = vadd.s32 3, %v1850_v34  ;;  %v2017_v10 = vshll.u32 %v1977_v29, 8  ;;  %v1755_v12 = vsel %vm1753_vm1, %v4677_v42, %v1754_v27 }
 0x262   : > { %v1844_v14 = vmul.f32 %v1843_v55, %v1841_v1  ;;  %v4276_v19 = vmin.u32 %v1931_v41, %v6724_v17  ;;  %v2012_v11 = vsel %vm2002_vm10, %v2009_v43, %v2011_v49  ;;  %v1759_v0 = vsel %vm1752_vm3, %v1755_v12, %v1758_v21 }
 0x263   : > { %v2008_v44 = vsel %vm2002_vm10, %v2005_v23, %v2007_v36  ;;  %v6744_v22 = vmul.u32.u64.low %v2017_v10, %v2016_v59  ;;  %v6745_v61 = vmul.u32.u64.high %v2017_v10, %v2016_v59, %v6744_v22  ;;  %v1760_v24 = vsel %vm1749_vm6, nan, %v1759_v0 }
 0x264   : > { %v1845_v33 = vxor.u32 2147483648, %v1844_v14  ;;  %v1933_v15 = vclz %v4276_v19  ;;  %v2073_v46 = vand.u32 2147483647, %v8707_v35  ;;  %v2104_v62 = vor.u32 %v6430_v48, %v6329_v3  ;;  %4466 = vmatmul.mubr.msk.f32.gmra.mrb[10].mxu1 %vm255_vm0, %v1760_v24 }
 0x265   : > { %vm2108_vm8 = vcmp.lt.s32.totalorder %v5839_v26, 4  ;;  %v6754_v53 = vmul.u32.u64.low %v2017_v10, %v2012_v11  ;;  %v6755_v13 = vmul.u32.u64.high %v2017_v10, %v2012_v11, %v6754_v53  ;;  %vm1867_vm12 = vcmp.lt.s32.totalorder %v8697_v40, 0 }
 0x266   : > { %v2114_v37 = vsel %vm2108_vm8, %v6452_v16, 920167782  ;;  %v1846_v34 = vsel %vm1763_vm14, %v1845_v33, %v1844_v14  ;;  %v6764_v31 = vand.u32 3, %v1854_v50  ;;  %v4277_v3 = vadd.s32 4294967294, %v1933_v15 }
 0x267   : > { %v1849_v48 = vsel %vm6671_vm11, %v8694_v58, %v1846_v34  ;;  %v1921_v7 = vadd.s32 %v6646_v20, %v6636_v52  ;;  %v1951_v30 = vsub.s32 4, %v6708_v63  ;;  %v2024_v2 = vmul.u32 %v2017_v10, %v2008_v44 }
 0x268   : > { %4680 = vcosq.f32 %v1849_v48  ;;  %vm4278_vm2 = vcmp.lt.s32.totalorder %v4277_v3, 0  ;;  %vm2026_vm15 = vc.u32 %v6745_v61, %v6754_v53  ;;  %v2080_v51 = vand.u32 8388607, %v2073_v46 }
 0x269   : > { %4682 = vsinq.f32 %v1849_v48  ;;  %v1936_v29 = vsel %vm4278_vm2, 0, %v4277_v3  ;;  %v2027_v8 = vadd.s32 1, %v6755_v13  ;;  %v2091_v39 = vshrl.u32 %v8603_v9, %v6151_v6 }
 0x26a   : > { %v1937_v4 = vsub.s32 32, %v1936_v29  ;;  %v1938_v52 = vshll.u32 %v6724_v17, %v1936_v29  ;;  %v1941_v20 = vsub.s32 4294967266, %v1936_v29  ;;  %v2090_v42 = vshll.u32 %v8608_v57, %v5932_v25 }
 0x26b   : > { %v2028_v56 = vsel %vm2026_vm15, %v2027_v8, %v6755_v13  ;;  %v2093_v23 = vshll.u32 %v8603_v9, %v5932_v25  ;;  %v2094_v43 = vshrl.u32 %v8604_v28, %v6151_v6  ;;  %v2096_v5 = vshll.u32 %v8604_v28, %v5932_v25 }
 0x26c   : > { %v1939_v18 = vshrl.u32 %v1921_v7, %v1937_v4  ;;  %v1942_v55 = vadd.s32 127, %v1941_v20  ;;  %v2029_v36 = vadd.s32 %v2028_v56, %v2024_v2  ;;  %v2097_v17 = vshrl.u32 %v8564_v54, %v6151_v6  ;;  %v6834_v2 = vld [vmem:[%s8450_s4] ss:$0 sm:$0xff] }
 0x26d   : > { %v2118_v49 = vsel %vm2108_vm8, %v2104_v62, 1326507024  ;;  %vm1857_vm14 = vcmp.eq.s32.totalorder %v6764_v31, 0  ;;  %v2092_v27 = vor.u32 %v2091_v39, %v2090_v42  ;;  %v2095_v1 = vor.u32 %v2094_v43, %v2093_v23 }
 0x26e   : > { %vm1856_vm11 = vcmp.lt.s32.totalorder %v6764_v31, 2  ;;  %v1940_v41 = vor.u32 %v1939_v18, %v1938_v52  ;;  %v1943_v59 = vshll.u32 %v1942_v55, 23  ;;  %v2030_v21 = vadd.s32 536870912, %v2029_v36 }
 0x26f   : > { %v2098_v50 = vor.u32 %v2097_v17, %v2096_v5  ;;  %vm1853_vm13 = vweird.f32 %v8694_v58  ;;  %vm1860_vm9 = vcmp.eq.s32.totalorder %v6764_v31, 2  ;;  %vm6799_vm7 = vcmp.le.f32.partialorder %v1865_v32, 0.7853982 }
 0x270   : > { %v1952_v10 = vsel %vm1867_vm12, %v1951_v30, %v6708_v63  ;;  %v2081_v12 = vor.u32 8388608, %v2080_v51  ;;  %vm2107_vm3 = vcmp.lt.s32.totalorder %v5839_v26, 3  ;;  %v1944_v14 = vor.u32 4788187, %v1943_v59  ;;  %v4452_v30 = vpop.f32.mrb[0].mxu1 }
 0x271   : > { %v6807_v19 = vshrl.u32 %v2030_v21, 30  ;;  %vm2105_vm6 = vcmp.lt.s32.totalorder %v5839_v26, 1  ;;  %v2119_v11 = vsel %vm2107_vm3, %v6452_v16, %v2118_v49  ;;  %v2089_v32 = vshrl.u32 %v8608_v57, %v6151_v6  ;;  %v2302_v4 = vpop.f32.mrb[1].mxu1 }
 0x272   : > { %v2113_v0 = vsel %vm2105_vm6, %v2092_v27, %v2095_v1  ;;  %v2115_v63 = vsel %vm2107_vm3, %v2098_v50, %v2114_v37  ;;  %v2117_v44 = vsel %vm2105_vm6, %v2095_v1, %v2098_v50  ;;  %v4681_v22 = vpop.eup %4680  ;;  %v1945_v24 = vand.u32 2147483647, %v1944_v14 }
 0x273   : > { %v1947_v33 = vcvt.s32.f32 %v1940_v41  ;;  %v2032_v15 = vshll.u32 %v6807_v19, 30  ;;  %vm2106_vm4 = vcmp.lt.s32.totalorder %v5839_v26, 2  ;;  %v4683_v16 = vpop.eup %4682  ;;  %v1861_v62 = vxor.u32 2147483648, %v4681_v22 }
 0x274   : > { %v2110_v6 = vsel %vm2108_vm8, %v2098_v50, 2102212464  ;;  %v2120_v13 = vsel %vm2106_vm4, %v2117_v44, %v2119_v11  ;;  %v2121_v34 = vshll.u32 %v2081_v12, 8  ;;  %v1858_v37 = vxor.u32 2147483648, %v4683_v16 }
 0x275   : > { %v1948_v3 = vmul.f32 %v1947_v33, %v1945_v24  ;;  %v6827_v48 = vsub.s32 %v2029_v36, %v2032_v15  ;;  %v2116_v7 = vsel %vm2106_vm4, %v2113_v0, %v2115_v63  ;;  %v1862_v51 = vsel %vm1860_vm9, %v1861_v62, %v4683_v16 }
 0x276   : > { %v2109_v29 = vsel %vm2105_vm6, %v2089_v32, %v2092_v27  ;;  %v6840_v8 = vmul.u32.u64.low %v2121_v34, %v2120_v13  ;;  %v6841_v39 = vmul.u32.u64.high %v2121_v34, %v2120_v13, %v6840_v8  ;;  %v1859_v52 = vsel %vm1857_vm14, %v4681_v22, %v1858_v37 }
 0x277   : > { %v1949_v20 = vxor.u32 2147483648, %v1948_v3  ;;  %v2035_v42 = vsub.s32 0, %v6827_v48  ;;  %v2111_v56 = vsel %vm2107_vm3, %v2095_v1, %v2110_v6  ;;  %v1863_v23 = vsel %vm1856_vm11, %v1859_v52, %v1862_v51  ;;  %v4760_v1 = vld [vmem:[%s4850_s7 + $0x8] sm:$0xff]  ;;  %v4761_v6 = vld [vmem:[%s4850_s7] sm:$0xff] }
 0x278   : > { %v6850_v43 = vmul.u32.u64.low %v2121_v34, %v2116_v7  ;;  %v6851_v5 = vmul.u32.u64.high %v2121_v34, %v2116_v7, %v6850_v43  ;;  %v2308_v18 = vadd.f32 %v4452_v30, %v6834_v2  ;;  %v1864_v55 = vsel %vm1853_vm13, nan, %v1863_v23 }
 0x279   : > { %v1950_v36 = vsel %vm1867_vm12, %v1949_v20, %v1948_v3  ;;  %v1954_v17 = vsel %vm6799_vm7, 0, %v1952_v10  ;;  %v4280_v49 = vmin.u32 %v2035_v42, %v6827_v48  ;;  %4468 = vmatprep.mubr.msk.f32.mxu1 %vm255_vm0, %v1864_v55  ;;  %v2112_v27 = vsel %vm2106_vm4, %v2109_v29, %v2111_v56 }
 0x27a   : > { %v1953_v31 = vsel %vm6799_vm7, %v8697_v40, %v1950_v36  ;;  %v2382_v58 = vadd.f32 %v4760_v1, %v2308_v18  ;;  %vm2130_vm5 = vc.u32 %v6841_v39, %v6850_v43  ;;  %v1958_v59 = vadd.s32 3, %v1954_v17 }
 0x27b   : > { %4684 = vcosq.f32 %v1953_v31  ;;  %v2037_v41 = vclz %v4280_v49  ;;  %v2131_v21 = vadd.s32 1, %v6851_v5  ;;  %v2128_v12 = vmul.u32 %v2121_v34, %v2112_v27 }
 0x27c   : > { %4686 = vsinq.f32 %v1953_v31  ;;  %v2398_v50 = vand.u32 2147483647, %v2382_v58  ;;  %v2055_v25 = vsub.s32 4, %v6807_v19  ;;  %v2303_v11 = vadd.f32 %v6834_v2, %v2302_v4 }
 0x27d   : > { %v4281_v10 = vadd.s32 4294967294, %v2037_v41  ;;  %v2132_v26 = vsel %vm2130_vm5, %v2131_v21, %v6851_v5  ;;  %vm1971_vm1 = vcmp.lt.s32.totalorder %v8706_v45, 0  ;;  %v1959_v0 = vand.u32 3, %v1958_v59 }
 0x27e   : > { %v2414_v14 = vadd.f32 1.0, %v2398_v50  ;;  %v2133_v32 = vadd.s32 %v2132_v26, %v2128_v12  ;;  %v2025_v22 = vadd.s32 %v6754_v53, %v6745_v61  ;;  %v2056_v16 = vsel %vm1971_vm1, %v2055_v25, %v6807_v19 }
 0x27f   : > { %vm4282_vm10 = vcmp.lt.s32.totalorder %v4281_v10, 0  ;;  %v2381_v13 = vadd.f32 %v4761_v6, %v2303_v11  ;;  %vm2075_vm8 = vcmp.lt.s32.totalorder %v8707_v35, 0  ;;  %vm1960_vm12 = vcmp.lt.s32.totalorder %v1959_v0, 2 }
 0x280   : > { %v2040_v63 = vsel %vm4282_vm10, 0, %v4281_v10  ;;  %v2430_v44 = vmul.f32 30.0, %v2414_v14  ;;  %v2134_v15 = vadd.s32 536870912, %v2133_v32  ;;  %vm6888_vm2 = vcmp.le.f32.partialorder %v1969_v47, 0.7853982 }
 0x281   : > { %v2041_v24 = vsub.s32 32, %v2040_v63  ;;  %v2045_v33 = vsub.s32 4294967266, %v2040_v63  ;;  %v2042_v34 = vshll.u32 %v6827_v48, %v2040_v63  ;;  %vm1961_vm15 = vcmp.eq.s32.totalorder %v1959_v0, 0 }
 0x282   : > { %v6881_v62 = vmul.f32 %v2430_v44, %v2382_v58  ;;  %v2135_v7 = vshrl.u32 %v2134_v15, 30  ;;  %vm1964_vm14 = vcmp.eq.s32.totalorder %v1959_v0, 2  ;;  %v2058_v52 = vsel %vm6888_vm2, 0, %v2056_v16 }
 0x283   : > { %v2043_v37 = vshrl.u32 %v2025_v22, %v2041_v24  ;;  %v2046_v3 = vadd.s32 127, %v2045_v33  ;;  %v2397_v23 = vand.u32 2147483647, %v2381_v13  ;;  %vm1957_vm11 = vweird.f32 %v8697_v40 }
 0x284   : > { %v2565_v53 = vand.u32 2147483647, %v6881_v62  ;;  %v2568_v19 = vand.u32 2139095040, %v6881_v62  ;;  %v2136_v8 = vshll.u32 %v2135_v7, 30  ;;  %v2159_v18 = vsub.s32 4, %v2135_v7 }
 0x285   : > { %v4685_v30 = vpop.eup %4684  ;;  %v2044_v51 = vor.u32 %v2043_v37, %v2042_v34  ;;  %v2047_v29 = vshll.u32 %v2046_v3, 23  ;;  %v2062_v58 = vadd.s32 3, %v2058_v52  ;;  %v2413_v10 = vadd.f32 1.0, %v2397_v23 }
 0x286   : > { %v4687_v48 = vpop.eup %4686  ;;  %v1965_v4 = vxor.u32 2147483648, %v4685_v30  ;;  %v2569_v20 = vshrl.u32 %v2568_v19, 23  ;;  %v6896_v56 = vsub.s32 %v2133_v32, %v2136_v8  ;;  %v2572_v36 = vand.u32 8388607, %v2565_v53 }
 0x287   : > { %v1962_v47 = vxor.u32 2147483648, %v4687_v48  ;;  %v2048_v42 = vor.u32 4788187, %v2047_v29  ;;  %v2051_v31 = vcvt.s32.f32 %v2044_v51  ;;  %v6908_v12 = vsel %vm2075_vm8, %v2159_v18, %v2135_v7 }
 0x288   : > { %v1966_v5 = vsel %vm1964_vm14, %v1965_v4, %v4687_v48  ;;  %v4308_v55 = vadd.s32 4294967169, %v2569_v20  ;;  %v2139_v27 = vsub.s32 0, %v6896_v56  ;;  %v2573_v25 = vor.u32 8388608, %v2572_v36 }
 0x289   : > { %v1963_v17 = vsel %vm1961_vm15, %v4685_v30, %v1962_v47  ;;  %v2049_v49 = vand.u32 2147483647, %v2048_v42  ;;  %v2429_v11 = vmul.f32 30.0, %v2413_v10  ;;  %v6910_v32 = vand.u32 3, %v2062_v58 }
 0x28a   : > { %v1967_v1 = vsel %vm1960_vm12, %v1963_v17, %v1966_v5  ;;  %v2575_v41 = vadd.s32 1, %v4308_v55  ;;  %v4284_v50 = vmin.u32 %v2139_v27, %v6896_v56  ;;  %vm6914_vm9 = vcmp.le.f32.partialorder %v2073_v46, 0.7853982 }
 0x28b   : > { %v1968_v59 = vsel %vm1957_vm11, nan, %v1967_v1  ;;  %v2052_v21 = vmul.f32 %v2051_v31, %v2049_v49  ;;  %v2129_v63 = vadd.s32 %v6850_v43, %v6841_v39  ;;  %v2162_v33 = vsel %vm6914_vm9, 0, %v6908_v12 }
 0x28c   : > { %4469 = vmatmul.mubr.msk.f32.gmra.mrb[12].mxu1 %vm255_vm0, %v1968_v59  ;;  %vm2576_vm13 = vcmp.gt.s32.totalorder %v2575_v41, 0  ;;  %v2141_v14 = vclz %v4284_v50  ;;  %v6931_v16 = vshll.u32 %v2573_v25, 8  ;;  %v6933_v39 = vmul.f32 %v2429_v11, %v2381_v13 }
 0x28d   : > { %v2053_v26 = vxor.u32 2147483648, %v2052_v21  ;;  %v2577_v40 = vsel %vm2576_vm13, %v2575_v41, 0  ;;  %vm2068_vm6 = vcmp.eq.s32.totalorder %v6910_v32, 2  ;;  %vm2065_vm4 = vcmp.eq.s32.totalorder %v6910_v32, 0 }
 0x28e   : > { %v6920_v44 = vshrl.u32 %v2577_v40, 5  ;;  %v4285_v24 = vadd.s32 4294967294, %v2141_v14  ;;  %v2579_v15 = vand.u32 31, %v2577_v40  ;;  %vm2061_vm10 = vweird.f32 %v8706_v45 }
 0x28f   : > { %v2054_v22 = vsel %vm1971_vm1, %v2053_v26, %v2052_v21  ;;  %vm2165_vm13 = vweird.f32 %v8707_v35 }
 0x290   : > { %v2057_v46 = vsel %vm6888_vm2, %v8706_v45, %v2054_v22  ;;  %vm2597_vm7 = vcmp.lt.s32.totalorder %v6920_v44, 1  ;;  %vm4286_vm3 = vcmp.lt.s32.totalorder %v4285_v24, 0  ;;  %v2580_v43 = vsub.s32 32, %v2579_v15 }
 0x291   : > { %4688 = vcosq.f32 %v2057_v46  ;;  %v2582_v6 = vshll.u32 %v8608_v57, %v2579_v15  ;;  %v2144_v34 = vsel %vm4286_vm3, 0, %v4285_v24  ;;  %v2585_v37 = vshll.u32 %v8603_v9, %v2579_v15 }
 0x292   : > { %4690 = vsinq.f32 %v2057_v46  ;;  %v2588_v3 = vshll.u32 %v8604_v28, %v2579_v15  ;;  %v2145_v7 = vsub.s32 32, %v2144_v34  ;;  %v2146_v61 = vshll.u32 %v6896_v56, %v2144_v34 }
 0x293   : > { %v2149_v19 = vsub.s32 4294967266, %v2144_v34  ;;  %v2581_v30 = vshrl.u32 %v8608_v57, %v2580_v43  ;;  %v2583_v13 = vshrl.u32 %v8603_v9, %v2580_v43  ;;  %v2586_v51 = vshrl.u32 %v8604_v28, %v2580_v43 }
 0x294   : > { %v2589_v29 = vshrl.u32 %v8564_v54, %v2580_v43  ;;  %v2591_v8 = vshll.u32 %v8564_v54, %v2579_v15  ;;  %v2147_v48 = vshrl.u32 %v2129_v63, %v2145_v7  ;;  %v2592_v52 = vshrl.u32 %v8581_v60, %v2580_v43 }
 0x295   : > { %v2150_v4 = vadd.s32 127, %v2149_v19  ;;  %v2594_v20 = vshll.u32 %v8581_v60, %v2579_v15  ;;  %v2584_v47 = vor.u32 %v2583_v13, %v2582_v6  ;;  %v2587_v42 = vor.u32 %v2586_v51, %v2585_v37  ;;  %v4455_v15 = vpop.f32.mrb[2].mxu1 }
 0x296   : > { %v2590_v56 = vor.u32 %v2589_v29, %v2588_v3  ;;  %v2595_v23 = vshrl.u32 %v8573_v38, %v2580_v43  ;;  %v2148_v5 = vor.u32 %v2147_v48, %v2146_v61  ;;  %v2593_v55 = vor.u32 %v2592_v52, %v2591_v8  ;;  %v2312_v37 = vpop.f32.mrb[3].mxu1 }
 0x297   : > { %v2151_v18 = vshll.u32 %v2150_v4, 23  ;;  %vm2600_vm5 = vcmp.lt.s32.totalorder %v6920_v44, 4  ;;  %vm2598_vm1 = vcmp.lt.s32.totalorder %v6920_v44, 2  ;;  %v2605_v49 = vsel %vm2597_vm7, %v2584_v47, %v2587_v42 }
 0x298   : > { %v2596_v36 = vor.u32 %v2595_v23, %v2594_v20  ;;  %v2602_v17 = vsel %vm2600_vm5, %v2590_v56, 2102212464  ;;  %vm2599_vm12 = vcmp.lt.s32.totalorder %v6920_v44, 3  ;;  %v2601_v27 = vsel %vm2597_vm7, %v2581_v30, %v2584_v47 }
 0x299   : > { %v2152_v31 = vor.u32 4788187, %v2151_v18  ;;  %v2606_v1 = vsel %vm2600_vm5, %v2593_v55, 920167782  ;;  %v2155_v58 = vcvt.s32.f32 %v2148_v5  ;;  %v2609_v59 = vsel %vm2597_vm7, %v2587_v42, %v2590_v56 }
 0x29a   : > { %v2607_v41 = vsel %vm2599_vm12, %v2590_v56, %v2606_v1  ;;  %v2610_v21 = vsel %vm2600_vm5, %v2596_v36, 1326507024  ;;  %v2603_v25 = vsel %vm2599_vm12, %v2587_v42, %v2602_v17  ;;  %v2461_v61 = vand.u32 2147483647, %v6933_v39  ;;  %v4762_v42 = vld [vmem:[%s4850_s7 + $0x18] sm:$0xff] }
 0x29b   : > { %v4689_v50 = vpop.eup %4688  ;;  %v2153_v10 = vand.u32 2147483647, %v2152_v31  ;;  %v2608_v26 = vsel %vm2598_vm1, %v2605_v49, %v2607_v41  ;;  %v2611_v14 = vsel %vm2599_vm12, %v2593_v55, %v2610_v21  ;;  %v2604_v7 = vsel %vm2598_vm1, %v2601_v27, %v2603_v25  ;;  %v4763_v49 = vld [vmem:[%s4850_s7 + $0x10] sm:$0xff] }
 0x29c   : > { %v4691_v40 = vpop.eup %4690  ;;  %v2069_v11 = vxor.u32 2147483648, %v4689_v50  ;;  %v2612_v63 = vsel %vm2598_vm1, %v2609_v59, %v2611_v14  ;;  %v6964_v22 = vmul.u32.u64.low %v6931_v16, %v2608_v26  ;;  %v6965_v24 = vmul.u32.u64.high %v6931_v16, %v2608_v26, %v6964_v22 }
 0x29d   : > { %v2066_v46 = vxor.u32 2147483648, %v4691_v40  ;;  %v2156_v43 = vmul.f32 %v2155_v58, %v2153_v10  ;;  %v6968_v6 = vmul.u32.u64.low %v6931_v16, %v2612_v63  ;;  %v6969_v34 = vmul.u32.u64.high %v6931_v16, %v2612_v63, %v6968_v6 }
 0x29e   : > { %v2070_v3 = vsel %vm2068_vm6, %v2069_v11, %v4691_v40  ;;  %v2464_v19 = vand.u32 2139095040, %v6933_v39  ;;  %vm2064_vm2 = vcmp.lt.s32.totalorder %v6910_v32, 2  ;;  %v2318_v51 = vadd.f32 %v4455_v15, %v6834_v2 }
 0x29f   : > { %v2067_v30 = vsel %vm2065_vm4, %v4689_v50, %v2066_v46  ;;  %v2157_v13 = vxor.u32 2147483648, %v2156_v43  ;;  %v2166_v44 = vadd.s32 3, %v2162_v33  ;;  %v2623_v8 = vadd.s32 1, %v6965_v24 }
 0x2a0   : > { %v2071_v29 = vsel %vm2064_vm2, %v2067_v30, %v2070_v3  ;;  %v2465_v48 = vshrl.u32 %v2464_v19, 23  ;;  %v2620_v52 = vmul.u32 %v6931_v16, %v2604_v7  ;;  %vm2622_vm15 = vc.u32 %v6969_v34, %v6964_v22 }
 0x2a1   : > { %v2072_v4 = vsel %vm2061_vm10, nan, %v2071_v29  ;;  %v2158_v32 = vsel %vm2075_vm8, %v2157_v13, %v2156_v43  ;;  %v2624_v33 = vsel %vm2622_vm15, %v2623_v8, %v6965_v24  ;;  %v2468_v45 = vand.u32 8388607, %v2461_v61 }
 0x2a2   : > { %4471 = vmatprep.mubr.msk.f32.mxu1 %vm255_vm0, %v2072_v4  ;;  %v2161_v12 = vsel %vm6914_vm9, %v8707_v35, %v2158_v32  ;;  %v4304_v20 = vadd.s32 4294967169, %v2465_v48  ;;  %v2625_v47 = vadd.s32 %v2624_v33, %v2620_v52  ;;  %v7000_v56 = vadd.f32 %v4762_v42, %v2318_v51 }
 0x2a3   : > { %4692 = vcosq.f32 %v2161_v12  ;;  %v2313_v16 = vadd.f32 %v6834_v2, %v2312_v37  ;;  %v2167_v5 = vand.u32 3, %v2166_v44  ;;  %v2469_v0 = vor.u32 8388608, %v2468_v45 }
 0x2a4   : > { %4694 = vsinq.f32 %v2161_v12  ;;  %v2471_v23 = vadd.s32 1, %v4304_v20  ;;  %v2626_v18 = vadd.s32 536870912, %v2625_v47  ;;  %v2400_v17 = vand.u32 2147483647, %v7000_v56 }
 0x2a5   : > { %v7007_v31 = vadd.f32 %v4763_v49, %v2313_v16  ;;  %vm2168_vm14 = vcmp.lt.s32.totalorder %v2167_v5, 2  ;;  %vm2169_vm11 = vcmp.eq.s32.totalorder %v2167_v5, 0  ;;  %vm2172_vm9 = vcmp.eq.s32.totalorder %v2167_v5, 2 }
 0x2a6   : > { %vm2472_vm8 = vcmp.gt.s32.totalorder %v2471_v23, 0  ;;  %v7003_v55 = vshrl.u32 %v2626_v18, 30  ;;  %v2621_v58 = vadd.s32 %v6964_v22, %v6969_v34  ;;  %v7012_v59 = vshll.u32 %v2469_v0, 8 }
 0x2a7   : > { %v2473_v36 = vsel %vm2472_vm8, %v2471_v23, 0  ;;  %v2416_v10 = vadd.f32 1.0, %v2400_v17  ;;  %v2399_v25 = vand.u32 2147483647, %v7007_v31  ;;  %vm2567_vm10 = vcmp.lt.s32.totalorder %v6881_v62, 0 }
 0x2a8   : > { %v2475_v27 = vand.u32 31, %v2473_v36  ;;  %v2628_v1 = vshll.u32 %v7003_v55, 30  ;;  %v7016_v50 = vshrl.u32 %v2473_v36, 5  ;;  %v2651_v26 = vsub.s32 4, %v7003_v55 }
 0x2a9   : > { %v2432_v52 = vmul.f32 30.0, %v2416_v10  ;;  %v2415_v20 = vadd.f32 1.0, %v2399_v25  ;;  %vm7085_vm12 = vcmp.le.f32.partialorder %v2565_v53, 0.7853982  ;;  %vm7102_vm2 = vcmp.le.f32.partialorder %v2461_v61, 0.7853982 }
 0x2aa   : > { %v2476_v41 = vsub.s32 32, %v2475_v27  ;;  %v7014_v21 = vsub.s32 %v2625_v47, %v2628_v1  ;;  %v2478_v14 = vshll.u32 %v8608_v57, %v2475_v27  ;;  %v2481_v24 = vshll.u32 %v8603_v9, %v2475_v27 }
 0x2ab   : > { %v2484_v34 = vshll.u32 %v8604_v28, %v2475_v27  ;;  %v2487_v37 = vshll.u32 %v8564_v54, %v2475_v27  ;;  %v2490_v13 = vshll.u32 %v8581_v60, %v2475_v27  ;;  %vm2493_vm7 = vcmp.lt.s32.totalorder %v7016_v50, 1 }
 0x2ac   : > { %v2479_v40 = vshrl.u32 %v8603_v9, %v2476_v41  ;;  %v2482_v11 = vshrl.u32 %v8604_v28, %v2476_v41  ;;  %v2631_v22 = vsub.s32 0, %v7014_v21  ;;  %v2485_v15 = vshrl.u32 %v8564_v54, %v2476_v41 }
 0x2ad   : > { %v4693_v63 = vpop.eup %4692  ;;  %v2488_v46 = vshrl.u32 %v8581_v60, %v2476_v41  ;;  %v2491_v3 = vshrl.u32 %v8573_v38, %v2476_v41  ;;  %v2477_v33 = vshrl.u32 %v8608_v57, %v2476_v41  ;;  %vm2495_vm3 = vcmp.lt.s32.totalorder %v7016_v50, 3 }
 0x2ae   : > { %v4695_v43 = vpop.eup %4694  ;;  %v2173_v6 = vxor.u32 2147483648, %v4693_v63  ;;  %v4309_v19 = vmin.u32 %v2631_v22, %v7014_v21  ;;  %v2480_v30 = vor.u32 %v2479_v40, %v2478_v14  ;;  %v2483_v29 = vor.u32 %v2482_v11, %v2481_v24 }
 0x2af   : > { %v2170_v7 = vxor.u32 2147483648, %v4695_v43  ;;  %v2486_v44 = vor.u32 %v2485_v15, %v2484_v34  ;;  %v2489_v8 = vor.u32 %v2488_v46, %v2487_v37  ;;  %v2492_v32 = vor.u32 %v2491_v3, %v2490_v13 }
 0x2b0   : > { %v2174_v51 = vsel %vm2172_vm9, %v2173_v6, %v4695_v43  ;;  %v2633_v4 = vclz %v4309_v19  ;;  %vm2496_vm6 = vcmp.lt.s32.totalorder %v7016_v50, 4  ;;  %v2501_v16 = vsel %vm2493_vm7, %v2480_v30, %v2483_v29 }
 0x2b1   : > { %v2171_v48 = vsel %vm2169_vm11, %v4693_v63, %v2170_v7  ;;  %v2498_v42 = vsel %vm2496_vm6, %v2486_v44, 2102212464  ;;  %v2502_v23 = vsel %vm2496_vm6, %v2489_v8, 920167782  ;;  %v2505_v5 = vsel %vm2493_vm7, %v2483_v29, %v2486_v44 }
 0x2b2   : > { %v2175_v12 = vsel %vm2168_vm14, %v2171_v48, %v2174_v51  ;;  %v4310_v47 = vadd.s32 4294967294, %v2633_v4  ;;  %vm2494_vm5 = vcmp.lt.s32.totalorder %v7016_v50, 2  ;;  %v2503_v35 = vsel %vm2495_vm3, %v2486_v44, %v2502_v23 }
 0x2b3   : > { %v2176_v45 = vsel %vm2165_vm13, nan, %v2175_v12  ;;  %v2506_v18 = vsel %vm2496_vm6, %v2492_v32, 1326507024  ;;  %v2497_v36 = vsel %vm2493_vm7, %v2477_v33, %v2480_v30  ;;  %v2504_v17 = vsel %vm2494_vm5, %v2501_v16, %v2503_v35 }
 0x2b4   : > { %4472 = vmatmul.mubr.msk.f32.gmra.mrb[14].mxu1 %vm255_vm0, %v2176_v45  ;;  %vm4311_vm4 = vcmp.lt.s32.totalorder %v4310_v47, 0  ;;  %v2507_v49 = vsel %vm2495_vm3, %v2489_v8, %v2506_v18  ;;  %v2499_v41 = vsel %vm2495_vm3, %v2483_v29, %v2498_v42  ;;  %v7069_v15 = vmul.f32 %v2432_v52, %v7000_v56 }
 0x2b5   : > { %v2636_v0 = vsel %vm4311_vm4, 0, %v4310_v47  ;;  %v2508_v10 = vsel %vm2494_vm5, %v2505_v5, %v2507_v49  ;;  %v7064_v40 = vmul.u32.u64.low %v7012_v59, %v2504_v17  ;;  %v7065_v11 = vmul.u32.u64.high %v7012_v59, %v2504_v17, %v7064_v40 }
 0x2b6   : > { %v2637_v27 = vsub.s32 32, %v2636_v0  ;;  %v2641_v1 = vsub.s32 4294967266, %v2636_v0  ;;  %v7060_v25 = vmul.u32.u64.low %v7012_v59, %v2508_v10  ;;  %v7061_v14 = vmul.u32.u64.high %v7012_v59, %v2508_v10, %v7060_v25 }
 0x2b7   : > { %v2638_v63 = vshll.u32 %v7014_v21, %v2636_v0  ;;  %v2500_v46 = vsel %vm2494_vm5, %v2497_v36, %v2499_v41  ;;  %v2431_v43 = vmul.f32 30.0, %v2415_v20  ;;  %v2652_v37 = vsel %vm2567_vm10, %v2651_v26, %v7003_v55 }
 0x2b8   : > { %v2639_v22 = vshrl.u32 %v2621_v58, %v2637_v27  ;;  %v2642_v24 = vadd.s32 127, %v2641_v1  ;;  %v2773_v58 = vand.u32 2147483647, %v7069_v15  ;;  %vm2518_vm1 = vc.u32 %v7061_v14, %v7064_v40 }
 0x2b9   : > { %v2519_v56 = vadd.s32 1, %v7065_v11  ;;  %v2776_v21 = vand.u32 2139095040, %v7069_v15  ;;  %v2516_v7 = vmul.u32 %v7012_v59, %v2500_v46  ;;  %v2654_v55 = vsel %vm7085_vm12, 0, %v2652_v37 }
 0x2ba   : > { %v2640_v6 = vor.u32 %v2639_v22, %v2638_v63  ;;  %v2643_v34 = vshll.u32 %v2642_v24, 23  ;;  %v7094_v30 = vmul.f32 %v2431_v43, %v7007_v31  ;;  %v2780_v53 = vand.u32 8388607, %v2773_v58 }
 0x2bb   : > { %v2520_v26 = vsel %vm2518_vm1, %v2519_v56, %v7065_v11  ;;  %v2777_v19 = vshrl.u32 %v2776_v21, 23  ;;  %v2658_v4 = vadd.s32 3, %v2654_v55  ;;  %v4458_v31 = vpop.f32.mrb[4].mxu1  ;;  %vm2463_vm15 = vcmp.lt.s32.totalorder %v6933_v39, 0 }
 0x2bc   : > { %v2644_v3 = vor.u32 4788187, %v2643_v34  ;;  %v2647_v51 = vcvt.s32.f32 %v2640_v6  ;;  %v2521_v29 = vadd.s32 %v2520_v26, %v2516_v7  ;;  %v2672_v8 = vand.u32 2139095040, %v7094_v30  ;;  %v7117_v36 = vpop.f32.mrb[5].mxu1 }
 0x2bd   : > { %v4316_v44 = vadd.s32 4294967169, %v2777_v19  ;;  %v2781_v33 = vor.u32 8388608, %v2780_v53  ;;  %v2669_v20 = vand.u32 2147483647, %v7094_v30  ;;  %v7112_v18 = vand.u32 3, %v2658_v4 }
 0x2be   : > { %v2645_v13 = vand.u32 2147483647, %v2644_v3  ;;  %v2522_v59 = vadd.s32 536870912, %v2521_v29  ;;  %v2673_v47 = vshrl.u32 %v2672_v8, 23  ;;  %v7115_v61 = vadd.s32 %v7064_v40, %v7061_v14 }
 0x2bf   : > { %v2783_v32 = vadd.s32 1, %v4316_v44  ;;  %v7121_v49 = vshll.u32 %v2781_v33, 8  ;;  %v7125_v27 = vand.u32 8388607, %v2669_v20  ;;  %vm2664_vm14 = vcmp.eq.s32.totalorder %v7112_v18, 2 }
 0x2c0   : > { %v2648_v48 = vmul.f32 %v2647_v51, %v2645_v13  ;;  %v2523_v12 = vshrl.u32 %v2522_v59, 30  ;;  %v4312_v10 = vadd.s32 4294967169, %v2673_v47  ;;  %v7145_v37 = vadd.f32 %v4458_v31, %v6834_v2 }
 0x2c1   : > { %vm2784_vm8 = vcmp.gt.s32.totalorder %v2783_v32, 0  ;;  %v2677_v34 = vor.u32 8388608, %v7125_v27  ;;  %vm2661_vm11 = vcmp.eq.s32.totalorder %v7112_v18, 0  ;;  %vm2660_vm13 = vcmp.lt.s32.totalorder %v7112_v18, 2 }
 0x2c2   : > { %v2649_v52 = vxor.u32 2147483648, %v2648_v48  ;;  %v2524_v16 = vshll.u32 %v2523_v12, 30  ;;  %v2547_v23 = vsub.s32 4, %v2523_v12  ;;  %v2785_v5 = vsel %vm2784_vm8, %v2783_v32, 0 }
 0x2c3   : > { %v2787_v0 = vand.u32 31, %v2785_v5  ;;  %v7127_v1 = vshrl.u32 %v2785_v5, 5  ;;  %v2679_v19 = vadd.s32 1, %v4312_v10  ;;  %vm2657_vm9 = vweird.f32 %v6881_v62 }
 0x2c4   : > { %v2650_v42 = vsel %vm2567_vm10, %v2649_v52, %v2648_v48  ;;  %v7119_v17 = vsub.s32 %v2521_v29, %v2524_v16  ;;  %v7132_v14 = vsel %vm2463_vm15, %v2547_v23, %v2523_v12 }
 0x2c5   : > { %v2653_v35 = vsel %vm7085_vm12, %v6881_v62, %v2650_v42  ;;  %v2788_v41 = vsub.s32 32, %v2787_v0  ;;  %v2790_v40 = vshll.u32 %v8608_v57, %v2787_v0  ;;  %v2793_v11 = vshll.u32 %v8603_v9, %v2787_v0 }
 0x2c6   : > { %4696 = vcosq.f32 %v2653_v35  ;;  %v2527_v25 = vsub.s32 0, %v7119_v17  ;;  %v2796_v24 = vshll.u32 %v8604_v28, %v2787_v0  ;;  %v2799_v3 = vshll.u32 %v8564_v54, %v2787_v0 }
 0x2c7   : > { %4698 = vsinq.f32 %v2653_v35  ;;  %v2791_v63 = vshrl.u32 %v8603_v9, %v2788_v41  ;;  %v2794_v22 = vshrl.u32 %v8604_v28, %v2788_v41  ;;  %v2797_v46 = vshrl.u32 %v8564_v54, %v2788_v41 }
 0x2c8   : > { %v4305_v43 = vmin.u32 %v2527_v25, %v7119_v17  ;;  %v2800_v6 = vshrl.u32 %v8581_v60, %v2788_v41  ;;  %v2550_v55 = vsel %vm7102_vm2, 0, %v7132_v14  ;;  %v2789_v26 = vshrl.u32 %v8608_v57, %v2788_v41 }
 0x2c9   : > { %v2792_v56 = vor.u32 %v2791_v63, %v2790_v40  ;;  %v2795_v21 = vor.u32 %v2794_v22, %v2793_v11  ;;  %v2798_v50 = vor.u32 %v2797_v46, %v2796_v24  ;;  %v2802_v51 = vshll.u32 %v8581_v60, %v2787_v0 }
 0x2ca   : > { %v2529_v7 = vclz %v4305_v43  ;;  %v2801_v13 = vor.u32 %v2800_v6, %v2799_v3  ;;  %v2803_v29 = vshrl.u32 %v8573_v38, %v2788_v41  ;;  %vm2805_vm7 = vcmp.lt.s32.totalorder %v7127_v1, 1 }
 0x2cb   : > { %vm2806_vm3 = vcmp.lt.s32.totalorder %v7127_v1, 2  ;;  %vm2807_vm6 = vcmp.lt.s32.totalorder %v7127_v1, 3  ;;  %vm2808_vm4 = vcmp.lt.s32.totalorder %v7127_v1, 4  ;;  %v2813_v48 = vsel %vm2805_vm7, %v2792_v56, %v2795_v21 }
 0x2cc   : > { %v4306_v53 = vadd.s32 4294967294, %v2529_v7  ;;  %v2804_v44 = vor.u32 %v2803_v29, %v2802_v51  ;;  %v2810_v8 = vsel %vm2808_vm4, %v2798_v50, 2102212464  ;;  %v2814_v59 = vsel %vm2808_vm4, %v2801_v13, 920167782 }
 0x2cd   : > { %v2809_v32 = vsel %vm2805_vm7, %v2789_v26, %v2792_v56  ;;  %v2811_v52 = vsel %vm2807_vm6, %v2795_v21, %v2810_v8  ;;  %v2815_v12 = vsel %vm2807_vm6, %v2798_v50, %v2814_v59  ;;  %v2817_v16 = vsel %vm2805_vm7, %v2795_v21, %v2798_v50 }
 0x2ce   : > { %vm4307_vm5 = vcmp.lt.s32.totalorder %v4306_v53, 0  ;;  %v2816_v42 = vsel %vm2806_vm3, %v2813_v48, %v2815_v12  ;;  %v2818_v10 = vsel %vm2808_vm4, %v2804_v44, 1326507024  ;;  %v2812_v24 = vsel %vm2806_vm3, %v2809_v32, %v2811_v52 }
 0x2cf   : > { %v2532_v47 = vsel %vm4307_vm5, 0, %v4306_v53  ;;  %v7183_v25 = vmul.u32.u64.low %v7121_v49, %v2816_v42  ;;  %v7184_v14 = vmul.u32.u64.high %v7121_v49, %v2816_v42, %v7183_v25  ;;  %v2819_v63 = vsel %vm2807_vm6, %v2801_v13, %v2818_v10  ;;  %v4764_v53 = vld [vmem:[%s4850_s7 + $0x28] sm:$0xff] }
 0x2d0   : > { %v4697_v4 = vpop.eup %4696  ;;  %v2533_v5 = vsub.s32 32, %v2532_v47  ;;  %v2534_v35 = vshll.u32 %v7119_v17, %v2532_v47  ;;  %v2537_v0 = vsub.s32 4294967266, %v2532_v47  ;;  %v2820_v46 = vsel %vm2806_vm3, %v2817_v16, %v2819_v63 }
 0x2d1   : > { %v4699_v33 = vpop.eup %4698  ;;  %v2665_v31 = vxor.u32 2147483648, %v4697_v4  ;;  %vm2680_vm10 = vcmp.gt.s32.totalorder %v2679_v19, 0  ;;  %v7210_v21 = vmul.u32.u64.low %v7121_v49, %v2820_v46  ;;  %v7211_v18 = vmul.u32.u64.high %v7121_v49, %v2820_v46, %v7210_v21 }
 0x2d2   : > { %v2662_v23 = vxor.u32 2147483648, %v4699_v33  ;;  %v2535_v40 = vshrl.u32 %v7115_v61, %v2533_v5  ;;  %v2538_v11 = vadd.s32 127, %v2537_v0  ;;  %v2681_v56 = vsel %vm2680_vm10, %v2679_v19, 0 }
 0x2d3   : > { %v2666_v41 = vsel %vm2664_vm14, %v2665_v31, %v4699_v33  ;;  %v2831_v3 = vadd.s32 1, %v7184_v14  ;;  %v2683_v7 = vand.u32 31, %v2681_v56  ;;  %v2554_v1 = vadd.s32 3, %v2550_v55 }
 0x2d4   : > { %v2663_v17 = vsel %vm2661_vm11, %v4697_v4, %v2662_v23  ;;  %v2536_v6 = vor.u32 %v2535_v40, %v2534_v35  ;;  %v2539_v61 = vshll.u32 %v2538_v11, 23  ;;  %v2828_v26 = vmul.u32 %v7121_v49, %v2812_v24 }
 0x2d5   : > { %v2667_v22 = vsel %vm2660_vm13, %v2663_v17, %v2666_v41  ;;  %v7215_v13 = vshrl.u32 %v2681_v56, 5  ;;  %v7219_v62 = vshll.u32 %v2677_v34, 8  ;;  %v2684_v29 = vsub.s32 32, %v2683_v7 }
 0x2d6   : > { %v2668_v43 = vsel %vm2657_vm9, nan, %v2667_v22  ;;  %v2540_v50 = vor.u32 4788187, %v2539_v61  ;;  %v2543_v51 = vcvt.s32.f32 %v2536_v6  ;;  %v2386_v44 = vadd.f32 %v4764_v53, %v7145_v37 }
 0x2d7   : > { %4126 = vst.msk [vmem:[%s7192_s23 + $0x8] sm:$0xff] %vm255_vm0, %v2668_v43  ;;  %vm2830_vm1 = vc.u32 %v7211_v18, %v7183_v25  ;;  %v2686_v8 = vshll.u32 %v8608_v57, %v2683_v7  ;;  %v2689_v55 = vshll.u32 %v8603_v9, %v2683_v7  ;;  %v2692_v49 = vshll.u32 %v8604_v28, %v2683_v7 }
 0x2d8   : > { %v2541_v19 = vand.u32 2147483647, %v2540_v50  ;;  %v2832_v27 = vsel %vm2830_vm1, %v2831_v3, %v7184_v14  ;;  %v2687_v34 = vshrl.u32 %v8603_v9, %v2684_v29  ;;  %v2695_v59 = vshll.u32 %v8564_v54, %v2683_v7 }
 0x2d9   : > { %v2833_v4 = vadd.s32 %v2832_v27, %v2828_v26  ;;  %v2690_v32 = vshrl.u32 %v8604_v28, %v2684_v29  ;;  %v2693_v37 = vshrl.u32 %v8564_v54, %v2684_v29  ;;  %v2696_v52 = vshrl.u32 %v8581_v60, %v2684_v29 }
 0x2da   : > { %v2544_v48 = vmul.f32 %v2543_v51, %v2541_v19  ;;  %v2688_v33 = vor.u32 %v2687_v34, %v2686_v8  ;;  %v2698_v31 = vshll.u32 %v8581_v60, %v2683_v7  ;;  %v2699_v47 = vshrl.u32 %v8573_v38, %v2684_v29 }
 0x2db   : > { %v2834_v42 = vadd.s32 536870912, %v2833_v4  ;;  %v2691_v16 = vor.u32 %v2690_v32, %v2689_v55  ;;  %v2694_v23 = vor.u32 %v2693_v37, %v2692_v49  ;;  %v2697_v5 = vor.u32 %v2696_v52, %v2695_v59 }
 0x2dc   : > { %v2545_v12 = vxor.u32 2147483648, %v2544_v48  ;;  %v2700_v0 = vor.u32 %v2699_v47, %v2698_v31  ;;  %vm2701_vm12 = vcmp.lt.s32.totalorder %v7215_v13, 1  ;;  %v2402_v41 = vand.u32 2147483647, %v2386_v44 }
 0x2dd   : > { %v2835_v14 = vshrl.u32 %v2834_v42, 30  ;;  %vm2703_vm8 = vcmp.lt.s32.totalorder %v7215_v13, 3  ;;  %vm2704_vm14 = vcmp.lt.s32.totalorder %v7215_v13, 4  ;;  %v2685_v17 = vshrl.u32 %v8608_v57, %v2684_v29 }
 0x2de   : > { %v2546_v35 = vsel %vm2463_vm15, %v2545_v12, %v2544_v48  ;;  %v2709_v40 = vsel %vm2701_vm12, %v2688_v33, %v2691_v16  ;;  %v2710_v11 = vsel %vm2704_vm14, %v2697_v5, 920167782  ;;  %v2706_v22 = vsel %vm2704_vm14, %v2694_v23, 2102212464 }
 0x2df   : > { %v2549_v10 = vsel %vm7102_vm2, %v6933_v39, %v2546_v35  ;;  %v2836_v63 = vshll.u32 %v2835_v14, 30  ;;  %v2713_v24 = vsel %vm2701_vm12, %v2691_v16, %v2694_v23  ;;  %vm2702_vm2 = vcmp.lt.s32.totalorder %v7215_v13, 2 }
 0x2e0   : > { %4700 = vcosq.f32 %v2549_v10  ;;  %v2711_v45 = vsel %vm2703_vm8, %v2694_v23, %v2710_v11  ;;  %v2714_v46 = vsel %vm2704_vm14, %v2700_v0, 1326507024  ;;  %v2418_v43 = vadd.f32 1.0, %v2402_v41 }
 0x2e1   : > { %4702 = vsinq.f32 %v2549_v10  ;;  %v7252_v6 = vsub.s32 %v2833_v4, %v2836_v63  ;;  %v2705_v61 = vsel %vm2701_vm12, %v2685_v17, %v2688_v33  ;;  %v2712_v56 = vsel %vm2702_vm2, %v2709_v40, %v2711_v45  ;;  %v4765_v40 = vld [vmem:[%s4850_s7 + $0x20] sm:$0xff] }
 0x2e2   : > { %v2715_v21 = vsel %vm2703_vm8, %v2697_v5, %v2714_v46  ;;  %v2707_v50 = vsel %vm2703_vm8, %v2691_v16, %v2706_v22  ;;  %v7265_v7 = vmul.u32.u64.low %v7219_v62, %v2712_v56  ;;  %v7266_v26 = vmul.u32.u64.high %v7219_v62, %v2712_v56, %v7265_v7 }
 0x2e3   : > { %v2716_v3 = vsel %vm2702_vm2, %v2713_v24, %v2715_v21  ;;  %v2555_v19 = vand.u32 3, %v2554_v1  ;;  %v2839_v51 = vsub.s32 0, %v7252_v6  ;;  %v2859_v8 = vsub.s32 4, %v2835_v14  ;;  %v4461_v49 = vpop.f32.mrb[6].mxu1 }
 0x2e4   : > { %v7271_v29 = vmul.u32.u64.low %v7219_v62, %v2716_v3  ;;  %v7272_v53 = vmul.u32.u64.high %v7219_v62, %v2716_v3, %v7271_v29  ;;  %v2434_v55 = vmul.f32 30.0, %v2418_v43  ;;  %v2708_v27 = vsel %vm2702_vm2, %v2705_v61, %v2707_v50 }
 0x2e5   : > { %v4317_v48 = vmin.u32 %v2839_v51, %v7252_v6  ;;  %vm2553_vm15 = vweird.f32 %v6933_v39  ;;  %vm2775_vm11 = vcmp.lt.s32.totalorder %v7069_v15, 0  ;;  %v2727_v1 = vadd.s32 1, %v7266_v26 }
 0x2e6   : > { %v7280_v34 = vmul.f32 %v2434_v55, %v2386_v44  ;;  %vm2556_vm13 = vcmp.lt.s32.totalorder %v2555_v19, 2  ;;  %vm2557_vm9 = vcmp.eq.s32.totalorder %v2555_v19, 0  ;;  %vm7284_vm7 = vcmp.le.f32.partialorder %v2773_v58, 0.7853982 }
 0x2e7   : > { %v2841_v4 = vclz %v4317_v48  ;;  %v2860_v13 = vsel %vm2775_vm11, %v2859_v8, %v2835_v14  ;;  %v2724_v37 = vmul.u32 %v7219_v62, %v2708_v27  ;;  %vm2726_vm3 = vc.u32 %v7272_v53, %v7265_v7  ;;  %v7321_v48 = vpop.f32.mrb[7].mxu1 }
 0x2e8   : > { %v2323_v44 = vadd.f32 %v6834_v2, %v7117_v36  ;;  %v2728_v58 = vsel %vm2726_vm3, %v2727_v1, %v7266_v26  ;;  %v2984_v31 = vand.u32 2139095040, %v7280_v34  ;;  %vm2560_vm6 = vcmp.eq.s32.totalorder %v2555_v19, 2 }
 0x2e9   : > { %v4318_v33 = vadd.s32 4294967294, %v2841_v4  ;;  %v2729_v42 = vadd.s32 %v2728_v58, %v2724_v37  ;;  %v2981_v16 = vand.u32 2147483647, %v7280_v34  ;;  %v2829_v23 = vadd.s32 %v7183_v25, %v7211_v18 }
 0x2ea   : > { %v4701_v32 = vpop.eup %4700  ;;  %v2985_v36 = vshrl.u32 %v2984_v31, 23  ;;  %v2862_v0 = vsel %vm7284_vm7, 0, %v2860_v13  ;;  %v7305_v11 = vadd.f32 %v4765_v40, %v2323_v44  ;;  %v2338_v43 = vadd.f32 %v4461_v49, %v6834_v2 }
 0x2eb   : > { %v4703_v52 = vpop.eup %4702  ;;  %v2561_v12 = vxor.u32 2147483648, %v4701_v32  ;;  %vm4319_vm4 = vcmp.lt.s32.totalorder %v4318_v33, 0  ;;  %v2730_v41 = vadd.s32 536870912, %v2729_v42  ;;  %v2988_v22 = vand.u32 8388607, %v2981_v16 }
 0x2ec   : > { %v2558_v47 = vxor.u32 2147483648, %v4703_v52  ;;  %v2844_v35 = vsel %vm4319_vm4, 0, %v4318_v33  ;;  %v4324_v63 = vadd.s32 4294967169, %v2985_v36  ;;  %v2866_v39 = vadd.s32 3, %v2862_v0 }
 0x2ed   : > { %v2562_v62 = vsel %vm2560_vm6, %v2561_v12, %v4703_v52  ;;  %v2845_v14 = vsub.s32 32, %v2844_v35  ;;  %v2849_v17 = vsub.s32 4294967266, %v2844_v35  ;;  %v2731_v18 = vshrl.u32 %v2730_v41, 30 }
 0x2ee   : > { %v2559_v5 = vsel %vm2557_vm9, %v4701_v32, %v2558_v47  ;;  %v2846_v24 = vshll.u32 %v7252_v6, %v2844_v35  ;;  %v2991_v56 = vadd.s32 1, %v4324_v63  ;;  %v2989_v26 = vor.u32 8388608, %v2988_v22  ;;  %v4766_v6 = vld [vmem:[%s4850_s7 + $0x38] sm:$0xff] }
 0x2ef   : > { %v2563_v10 = vsel %vm2556_vm13, %v2559_v5, %v2562_v62  ;;  %v2847_v45 = vshrl.u32 %v2829_v23, %v2845_v14  ;;  %v2850_v46 = vadd.s32 127, %v2849_v17  ;;  %v2732_v61 = vshll.u32 %v2731_v18, 30 }
 0x2f0   : > { %v2564_v25 = vsel %vm2553_vm15, nan, %v2563_v10  ;;  %vm2992_vm5 = vcmp.gt.s32.totalorder %v2991_v56, 0  ;;  %v2401_v19 = vand.u32 2147483647, %v7305_v11  ;;  %v2755_v29 = vsub.s32 4, %v2731_v18 }
 0x2f1   : > { %4125 = vst.msk [vmem:[%s7192_s23] sm:$0xff] %vm255_vm0, %v2564_v25  ;;  %v2848_v21 = vor.u32 %v2847_v45, %v2846_v24  ;;  %v2851_v50 = vshll.u32 %v2850_v46, 23  ;;  %v7315_v3 = vsub.s32 %v2729_v42, %v2732_v61  ;;  %v2993_v8 = vsel %vm2992_vm5, %v2991_v56, 0 }
 0x2f2   : > { %v7319_v55 = vadd.f32 %v4766_v6, %v2338_v43  ;;  %v2995_v49 = vand.u32 31, %v2993_v8  ;;  %v7324_v4 = vand.u32 3, %v2866_v39  ;;  %vm2671_vm10 = vcmp.lt.s32.totalorder %v7094_v30, 0 }
 0x2f3   : > { %v2852_v51 = vor.u32 4788187, %v2851_v50  ;;  %v2735_v2 = vsub.s32 0, %v7315_v3  ;;  %v2855_v1 = vcvt.s32.f32 %v2848_v21  ;;  %v2725_v32 = vadd.s32 %v7265_v7, %v7272_v53 }
 0x2f4   : > { %v2996_v37 = vsub.s32 32, %v2995_v49  ;;  %v7330_v44 = vshll.u32 %v2989_v26, 8  ;;  %v7334_v12 = vsel %vm2671_vm10, %v2755_v29, %v2731_v18  ;;  %v2417_v33 = vadd.f32 1.0, %v2401_v19 }
 0x2f5   : > { %v2853_v27 = vand.u32 2147483647, %v2852_v51  ;;  %v4313_v13 = vmin.u32 %v2735_v2, %v7315_v3  ;;  %v2404_v58 = vand.u32 2147483647, %v7319_v55  ;;  %v7337_v47 = vshrl.u32 %v2993_v8, 5 }
 0x2f6   : > { %v2998_v42 = vshll.u32 %v8608_v57, %v2995_v49  ;;  %v3001_v7 = vshll.u32 %v8603_v9, %v2995_v49  ;;  %v2999_v62 = vshrl.u32 %v8603_v9, %v2996_v37  ;;  %v3002_v23 = vshrl.u32 %v8604_v28, %v2996_v37 }
 0x2f7   : > { %v2856_v52 = vmul.f32 %v2855_v1, %v2853_v27  ;;  %v2737_v31 = vclz %v4313_v13  ;;  %v3004_v36 = vshll.u32 %v8604_v28, %v2995_v49  ;;  %v3005_v35 = vshrl.u32 %v8564_v54, %v2996_v37 }
 0x2f8   : > { %v3007_v0 = vshll.u32 %v8564_v54, %v2995_v49  ;;  %v3008_v41 = vshrl.u32 %v8581_v60, %v2996_v37  ;;  %v3000_v14 = vor.u32 %v2999_v62, %v2998_v42  ;;  %v3010_v17 = vshll.u32 %v8581_v60, %v2995_v49 }
 0x2f9   : > { %v2857_v53 = vxor.u32 2147483648, %v2856_v52  ;;  %v4314_v5 = vadd.s32 4294967294, %v2737_v31  ;;  %v3011_v40 = vshrl.u32 %v8573_v38, %v2996_v37  ;;  %v3003_v18 = vor.u32 %v3002_v23, %v3001_v7 }
 0x2fa   : > { %v3006_v63 = vor.u32 %v3005_v35, %v3004_v36  ;;  %vm7356_vm12 = vcmp.le.f32.partialorder %v2669_v20, 0.7853982  ;;  %v3009_v45 = vor.u32 %v3008_v41, %v3007_v0  ;;  %v2433_v56 = vmul.f32 30.0, %v2417_v33 }
 0x2fb   : > { %v2858_v10 = vsel %vm2775_vm11, %v2857_v53, %v2856_v52  ;;  %vm4315_vm1 = vcmp.lt.s32.totalorder %v4314_v5, 0  ;;  %v3012_v46 = vor.u32 %v3011_v40, %v3010_v17  ;;  %v2997_v21 = vshrl.u32 %v8608_v57, %v2996_v37 }
 0x2fc   : > { %v2861_v25 = vsel %vm7284_vm7, %v7069_v15, %v2858_v10  ;;  %v2740_v24 = vsel %vm4315_vm1, 0, %v4314_v5  ;;  %vm3013_vm8 = vcmp.lt.s32.totalorder %v7337_v47, 1  ;;  %vm3015_vm14 = vcmp.lt.s32.totalorder %v7337_v47, 3 }
 0x2fd   : > { %4704 = vcosq.f32 %v2861_v25  ;;  %v2741_v43 = vsub.s32 32, %v2740_v24  ;;  %v2745_v61 = vsub.s32 4294967266, %v2740_v24  ;;  %v2742_v59 = vshll.u32 %v7315_v3, %v2740_v24 }
 0x2fe   : > { %4706 = vsinq.f32 %v2861_v25  ;;  %vm3016_vm2 = vcmp.lt.s32.totalorder %v7337_v47, 4  ;;  %v3021_v39 = vsel %vm3013_vm8, %v3000_v14, %v3003_v18  ;;  %v3025_v51 = vsel %vm3013_vm8, %v3003_v18, %v3006_v63 }
 0x2ff   : > { %v2743_v50 = vshrl.u32 %v2725_v32, %v2741_v43  ;;  %v2746_v20 = vadd.s32 127, %v2745_v61  ;;  %v3018_v26 = vsel %vm3016_vm2, %v3006_v63, 2102212464  ;;  %v3022_v19 = vsel %vm3016_vm2, %v3009_v45, 920167782 }
 0x300   : > { %v3026_v29 = vsel %vm3016_vm2, %v3012_v46, 1326507024  ;;  %vm3014_vm15 = vcmp.lt.s32.totalorder %v7337_v47, 2  ;;  %v3023_v6 = vsel %vm3015_vm14, %v3006_v63, %v3022_v19  ;;  %vm2868_vm11 = vcmp.lt.s32.totalorder %v7324_v4, 2 }
 0x301   : > { %v2744_v3 = vor.u32 %v2743_v50, %v2742_v59  ;;  %v2747_v8 = vshll.u32 %v2746_v20, 23  ;;  %v3024_v2 = vsel %vm3014_vm15, %v3021_v39, %v3023_v6  ;;  %v3027_v49 = vsel %vm3015_vm14, %v3009_v45, %v3026_v29 }
 0x302   : > { %v7378_v27 = vmul.f32 %v2433_v56, %v7305_v11  ;;  %v2420_v1 = vadd.f32 1.0, %v2404_v58  ;;  %v3017_v13 = vsel %vm3013_vm8, %v2997_v21, %v3000_v14  ;;  %v3019_v37 = vsel %vm3015_vm14, %v3003_v18, %v3018_v26 }
 0x303   : > { %v2748_v32 = vor.u32 4788187, %v2747_v8  ;;  %v3028_v52 = vsel %vm3014_vm15, %v3025_v51, %v3027_v49  ;;  %v7391_v42 = vmul.u32.u64.low %v7330_v44, %v3024_v2  ;;  %v7392_v7 = vmul.u32.u64.high %v7330_v44, %v3024_v2, %v7391_v42  ;;  %v4768_v2 = vld [vmem:[%s4850_s7 + $0x30] sm:$0xff] }
 0x304   : > { %v7387_v33 = vmul.u32.u64.low %v7330_v44, %v3028_v52  ;;  %v7388_v31 = vmul.u32.u64.high %v7330_v44, %v3028_v52, %v7387_v33  ;;  %v2751_v58 = vcvt.s32.f32 %v2744_v3  ;;  %v2758_v53 = vsel %vm7356_vm12, 0, %v7334_v12 }
 0x305   : > { %v2749_v11 = vand.u32 2147483647, %v2748_v32  ;;  %v2880_v62 = vand.u32 2139095040, %v7378_v27  ;;  %vm2869_vm13 = vcmp.eq.s32.totalorder %v7324_v4, 0  ;;  %v3020_v36 = vsel %vm3014_vm15, %v3017_v13, %v3019_v37 }
 0x306   : > { %v2877_v5 = vand.u32 2147483647, %v7378_v27  ;;  %v2436_v35 = vmul.f32 30.0, %v2420_v1  ;;  %vm2872_vm9 = vcmp.eq.s32.totalorder %v7324_v4, 2  ;;  %v2762_v40 = vadd.s32 3, %v2758_v53 }
 0x307   : > { %v4705_v23 = vpop.eup %4704  ;;  %v2752_v10 = vmul.f32 %v2751_v58, %v2749_v11  ;;  %v2881_v14 = vshrl.u32 %v2880_v62, 23  ;;  %vm3038_vm7 = vc.u32 %v7388_v31, %v7391_v42  ;;  %v3039_v12 = vadd.s32 1, %v7392_v7  ;;  %v7431_v4 = vld [vmem:[%s8450_s4] ss:$0 sm:$0xff] }
 0x308   : > { %v4707_v0 = vpop.eup %4706  ;;  %v2873_v41 = vxor.u32 2147483648, %v4705_v23  ;;  %v3036_v47 = vmul.u32 %v7330_v44, %v3020_v36  ;;  %v2884_v46 = vand.u32 8388607, %v2877_v5  ;;  %v7412_v43 = vmul.f32 %v2436_v35, %v7319_v55 }
 0x309   : > { %v2870_v17 = vxor.u32 2147483648, %v4707_v0  ;;  %v2753_v18 = vxor.u32 2147483648, %v2752_v10  ;;  %v4320_v63 = vadd.s32 4294967169, %v2881_v14  ;;  %v3040_v45 = vsel %vm3038_vm7, %v3039_v12, %v7392_v7 }
 0x30a   : > { %v2874_v25 = vsel %vm2872_vm9, %v2873_v41, %v4707_v0  ;;  %vm2865_vm3 = vweird.f32 %v7069_v15  ;;  %v3041_v56 = vadd.s32 %v3040_v45, %v3036_v47  ;;  %v7426_v55 = vand.u32 3, %v2762_v40 }
 0x30b   : > { %v2871_v24 = vsel %vm2869_vm13, %v4705_v23, %v2870_v17  ;;  %v2754_v44 = vsel %vm2671_vm10, %v2753_v18, %v2752_v10  ;;  %v2887_v50 = vadd.s32 1, %v4320_v63  ;;  %v2333_v39 = vadd.f32 %v7431_v4, %v7321_v48 }
 0x30c   : > { %v2875_v61 = vsel %vm2868_vm11, %v2871_v24, %v2874_v25  ;;  %v2757_v21 = vsel %vm7356_vm12, %v7094_v30, %v2754_v44  ;;  %v3042_v15 = vadd.s32 536870912, %v3041_v56  ;;  %v2885_v26 = vor.u32 8388608, %v2884_v46 }
 0x30d   : > { %v2876_v59 = vsel %vm2865_vm3, nan, %v2875_v61  ;;  %4708 = vcosq.f32 %v2757_v21  ;;  %vm2888_vm6 = vcmp.gt.s32.totalorder %v2887_v50, 0  ;;  %v3192_v19 = vand.u32 2139095040, %v7412_v43 }
 0x30e   : > { %4128 = vst.msk [vmem:[%s7192_s23 + $0x18] sm:$0xff] %vm255_vm0, %v2876_v59  ;;  %4710 = vsinq.f32 %v2757_v21  ;;  %v3043_v51 = vshrl.u32 %v3042_v15, 30  ;;  %v2889_v29 = vsel %vm2888_vm6, %v2887_v50, 0  ;;  %v3189_v3 = vand.u32 2147483647, %v7412_v43 }
 0x30f   : > { %v7422_v20 = vpop.f32.mrb[8].mxu1  ;;  %v2891_v8 = vand.u32 31, %v2889_v29  ;;  %vm2768_vm4 = vcmp.eq.s32.totalorder %v7426_v55, 2  ;;  %vm2983_vm5 = vcmp.lt.s32.totalorder %v7280_v34, 0  ;;  %v7442_v49 = vadd.f32 %v4768_v2, %v2333_v39 }
 0x310   : > { %v7435_v22 = vpop.f32.mrb[9].mxu1  ;;  %v3044_v6 = vshll.u32 %v3043_v51, 30  ;;  %vm2765_vm10 = vcmp.eq.s32.totalorder %v7426_v55, 0  ;;  %v7446_v48 = vadd.s32 %v7391_v42, %v7388_v31  ;;  %v7448_v32 = vshll.u32 %v2885_v26, 8 }
 0x311   : > { %v2892_v1 = vsub.s32 32, %v2891_v8  ;;  %v3193_v13 = vshrl.u32 %v3192_v19, 23  ;;  %vm2764_vm1 = vcmp.lt.s32.totalorder %v7426_v55, 2  ;;  %v3067_v52 = vsub.s32 4, %v3043_v51 }
 0x312   : > { %v7451_v37 = vsub.s32 %v3041_v56, %v3044_v6  ;;  %v7453_v33 = vshrl.u32 %v2889_v29, 5  ;;  %v7457_v7 = vand.u32 8388607, %v3189_v3  ;;  %vm2761_vm12 = vweird.f32 %v7094_v30 }
 0x313   : > { %v2894_v31 = vshll.u32 %v8608_v57, %v2891_v8  ;;  %v2895_v42 = vshrl.u32 %v8603_v9, %v2892_v1  ;;  %v2897_v11 = vshll.u32 %v8603_v9, %v2891_v8  ;;  %v2898_v58 = vshrl.u32 %v8604_v28, %v2892_v1 }
 0x314   : > { %v3047_v53 = vsub.s32 0, %v7451_v37  ;;  %v2900_v62 = vshll.u32 %v8604_v28, %v2891_v8  ;;  %v2901_v23 = vshrl.u32 %v8564_v54, %v2892_v1  ;;  %v2904_v36 = vshrl.u32 %v8581_v60, %v2892_v1 }
 0x315   : > { %v2903_v35 = vshll.u32 %v8564_v54, %v2891_v8  ;;  %v2907_v0 = vshrl.u32 %v8573_v38, %v2892_v1  ;;  %v4332_v41 = vadd.s32 4294967169, %v3193_v13  ;;  %v2403_v10 = vand.u32 2147483647, %v7442_v49 }
 0x316   : > { %v4325_v17 = vmin.u32 %v3047_v53, %v7451_v37  ;;  %v2896_v40 = vor.u32 %v2895_v42, %v2894_v31  ;;  %v2899_v12 = vor.u32 %v2898_v58, %v2897_v11  ;;  %v2902_v25 = vor.u32 %v2901_v23, %v2900_v62 }
 0x317   : > { %v4709_v14 = vpop.eup %4708  ;;  %v3068_v63 = vsel %vm2983_vm5, %v3067_v52, %v3043_v51  ;;  %v2905_v24 = vor.u32 %v2904_v36, %v2903_v35  ;;  %v2906_v45 = vshll.u32 %v8581_v60, %v2891_v8  ;;  %vm7477_vm8 = vcmp.le.f32.partialorder %v2981_v16, 0.7853982 }
 0x318   : > { %v4711_v18 = vpop.eup %4710  ;;  %v2769_v47 = vxor.u32 2147483648, %v4709_v14  ;;  %v3049_v44 = vclz %v4325_v17  ;;  %v2893_v56 = vshrl.u32 %v8608_v57, %v2892_v1  ;;  %vm2909_vm14 = vcmp.lt.s32.totalorder %v7453_v33, 1 }
 0x319   : > { %v2766_v46 = vxor.u32 2147483648, %v4711_v18  ;;  %v2908_v21 = vor.u32 %v2907_v0, %v2906_v45  ;;  %vm2910_vm2 = vcmp.lt.s32.totalorder %v7453_v33, 2  ;;  %vm2912_vm15 = vcmp.lt.s32.totalorder %v7453_v33, 4 }
 0x31a   : > { %v2770_v59 = vsel %vm2768_vm4, %v2769_v47, %v4711_v18  ;;  %v4326_v50 = vadd.s32 4294967294, %v3049_v44  ;;  %v2914_v15 = vsel %vm2912_vm15, %v2902_v25, 2102212464  ;;  %v2917_v39 = vsel %vm2909_vm14, %v2896_v40, %v2899_v12 }
 0x31b   : > { %v2767_v16 = vsel %vm2765_vm10, %v4709_v14, %v2766_v46  ;;  %vm2911_vm11 = vcmp.lt.s32.totalorder %v7453_v33, 3  ;;  %v2913_v19 = vsel %vm2909_vm14, %v2893_v56, %v2896_v40  ;;  %v2918_v51 = vsel %vm2912_vm15, %v2905_v24, 920167782 }
 0x31c   : > { %v2771_v26 = vsel %vm2764_vm1, %v2767_v16, %v2770_v59  ;;  %vm4327_vm13 = vcmp.lt.s32.totalorder %v4326_v50, 0  ;;  %v2919_v8 = vsel %vm2911_vm11, %v2902_v25, %v2918_v51  ;;  %v2921_v6 = vsel %vm2909_vm14, %v2899_v12, %v2902_v25 }
 0x31d   : > { %v2772_v29 = vsel %vm2761_vm12, nan, %v2771_v26  ;;  %v3052_v55 = vsel %vm4327_vm13, 0, %v4326_v50  ;;  %v2915_v2 = vsel %vm2911_vm11, %v2899_v12, %v2914_v15  ;;  %v2920_v1 = vsel %vm2910_vm2, %v2917_v39, %v2919_v8 }
 0x31e   : > { %4127 = vst.msk [vmem:[%s7192_s23 + $0x10] sm:$0xff] %vm255_vm0, %v2772_v29  ;;  %v2922_v13 = vsel %vm2912_vm15, %v2908_v21, 1326507024  ;;  %v3053_v52 = vsub.s32 32, %v3052_v55  ;;  %v3054_v31 = vshll.u32 %v7451_v37, %v3052_v55  ;;  %v3057_v30 = vsub.s32 4294967266, %v3052_v55 }
 0x31f   : > { %v2923_v42 = vsel %vm2911_vm11, %v2905_v24, %v2922_v13  ;;  %v7514_v58 = vmul.u32.u64.low %v7448_v32, %v2920_v1  ;;  %v7515_v53 = vmul.u32.u64.high %v7448_v32, %v2920_v1, %v7514_v58  ;;  %v3199_v62 = vadd.s32 1, %v4332_v41 }
 0x320   : > { %v2924_v11 = vsel %vm2910_vm2, %v2921_v6, %v2923_v42  ;;  %v3055_v23 = vshrl.u32 %v7446_v48, %v3053_v52  ;;  %v3058_v36 = vadd.s32 127, %v3057_v30  ;;  %v3070_v37 = vsel %vm7477_vm8, 0, %v3068_v63 }
 0x321   : > { %v7520_v35 = vmul.u32.u64.low %v7448_v32, %v2924_v11  ;;  %v7521_v0 = vmul.u32.u64.high %v7448_v32, %v2924_v11, %v7520_v35  ;;  %v2916_v14 = vsel %vm2910_vm2, %v2913_v19, %v2915_v2  ;;  %vm3200_vm9 = vcmp.gt.s32.totalorder %v3199_v62, 0 }
 0x322   : > { %v2419_v17 = vadd.f32 1.0, %v2403_v10  ;;  %v3056_v40 = vor.u32 %v3055_v23, %v3054_v31  ;;  %v3059_v12 = vshll.u32 %v3058_v36, 23  ;;  %v3201_v25 = vsel %vm3200_vm9, %v3199_v62, 0 }
 0x323   : > { %v2935_v41 = vadd.s32 1, %v7515_v53  ;;  %v3197_v48 = vor.u32 8388608, %v7457_v7  ;;  %v3203_v18 = vand.u32 31, %v3201_v25  ;;  %v2348_v47 = vadd.f32 %v7431_v4, %v7422_v20 }
 0x324   : > { %v3060_v24 = vor.u32 4788187, %v3059_v12  ;;  %v3074_v45 = vadd.s32 3, %v3070_v37  ;;  %v2932_v63 = vmul.u32 %v7448_v32, %v2916_v14  ;;  %vm2934_vm7 = vc.u32 %v7521_v0, %v7514_v58 }
 0x325   : > { %v2936_v33 = vsel %vm2934_vm7, %v2935_v41, %v7515_v53  ;;  %v7535_v10 = vshrl.u32 %v3201_v25, 5  ;;  %v3204_v46 = vsub.s32 32, %v3203_v18  ;;  %v2435_v44 = vmul.f32 30.0, %v2419_v17 }
 0x326   : > { %v3061_v56 = vand.u32 2147483647, %v3060_v24  ;;  %v3063_v59 = vcvt.s32.f32 %v3056_v40  ;;  %v2937_v7 = vadd.s32 %v2936_v33, %v2932_v63  ;;  %v3206_v21 = vshll.u32 %v8608_v57, %v3203_v18  ;;  %v4769_v24 = vld [vmem:[%s4850_s7 + $0x48] sm:$0xff] }
 0x327   : > { %v3207_v20 = vshrl.u32 %v8603_v9, %v3204_v46  ;;  %v3209_v16 = vshll.u32 %v8603_v9, %v3203_v18  ;;  %v3210_v32 = vshrl.u32 %v8604_v28, %v3204_v46  ;;  %v3213_v50 = vshrl.u32 %v8564_v54, %v3204_v46 }
 0x328   : > { %v3064_v15 = vmul.f32 %v3063_v59, %v3061_v56  ;;  %v2938_v39 = vadd.s32 536870912, %v2937_v7  ;;  %v3215_v26 = vshll.u32 %v8564_v54, %v3203_v18  ;;  %v3216_v19 = vshrl.u32 %v8581_v60, %v3204_v46 }
 0x329   : > { %v3208_v51 = vor.u32 %v3207_v20, %v3206_v21  ;;  %v3211_v29 = vor.u32 %v3210_v32, %v3209_v16  ;;  %v3212_v8 = vshll.u32 %v8604_v28, %v3203_v18  ;;  %v3219_v6 = vshrl.u32 %v8573_v38, %v3204_v46 }
 0x32a   : > { %v3065_v55 = vxor.u32 2147483648, %v3064_v15  ;;  %v7546_v2 = vand.u32 3, %v3074_v45  ;;  %v2939_v1 = vshrl.u32 %v2938_v39, 30  ;;  %v3217_v13 = vor.u32 %v3216_v19, %v3215_v26 }
 0x32b   : > { %v3214_v52 = vor.u32 %v3213_v50, %v3212_v8  ;;  %v3218_v31 = vshll.u32 %v8581_v60, %v3203_v18  ;;  %v7549_v30 = vshll.u32 %v3197_v48, 8  ;;  %v7552_v42 = vmul.f32 %v2435_v44, %v7442_v49 }
 0x32c   : > { %v3066_v11 = vsel %vm2983_vm5, %v3065_v55, %v3064_v15  ;;  %v2940_v53 = vshll.u32 %v2939_v1, 30  ;;  %vm3221_vm3 = vcmp.lt.s32.totalorder %v7535_v10, 1  ;;  %vm3224_vm6 = vcmp.lt.s32.totalorder %v7535_v10, 4 }
 0x32d   : > { %v3069_v62 = vsel %vm7477_vm8, %v7280_v34, %v3066_v11  ;;  %v3220_v23 = vor.u32 %v3219_v6, %v3218_v31  ;;  %v3229_v36 = vsel %vm3221_vm3, %v3208_v51, %v3211_v29  ;;  %v3230_v49 = vsel %vm3224_vm6, %v3217_v13, 920167782 }
 0x32e   : > { %4712 = vcosq.f32 %v3069_v62  ;;  %v7565_v35 = vsub.s32 %v2937_v7, %v2940_v53  ;;  %v3205_v37 = vshrl.u32 %v8608_v57, %v3204_v46  ;;  %vm3223_vm4 = vcmp.lt.s32.totalorder %v7535_v10, 3 }
 0x32f   : > { %4714 = vsinq.f32 %v3069_v62  ;;  %vm3222_vm5 = vcmp.lt.s32.totalorder %v7535_v10, 2  ;;  %v3226_v61 = vsel %vm3224_vm6, %v3214_v52, 2102212464  ;;  %v3231_v14 = vsel %vm3223_vm4, %v3214_v52, %v3230_v49 }
 0x330   : > { %v2943_v17 = vsub.s32 0, %v7565_v35  ;;  %v2963_v40 = vsub.s32 4, %v2939_v1  ;;  %v3232_v12 = vsel %vm3222_vm5, %v3229_v36, %v3231_v14  ;;  %v3233_v25 = vsel %vm3221_vm3, %v3211_v29, %v3214_v52 }
 0x331   : > { %v3234_v41 = vsel %vm3224_vm6, %v3220_v23, 1326507024  ;;  %v7582_v48 = vmul.u32.u64.low %v7549_v30, %v3232_v12  ;;  %v7583_v18 = vmul.u32.u64.high %v7549_v30, %v3232_v12, %v7582_v48  ;;  %v7587_v45 = vadd.f32 %v4769_v24, %v2348_v47 }
 0x332   : > { %v4321_v63 = vmin.u32 %v2943_v17, %v7565_v35  ;;  %v3225_v33 = vsel %vm3221_vm3, %v3205_v37, %v3208_v51  ;;  %v3227_v46 = vsel %vm3223_vm4, %v3211_v29, %v3226_v61  ;;  %v3235_v44 = vsel %vm3223_vm4, %v3217_v13, %v3234_v41 }
 0x333   : > { %vm2879_vm10 = vcmp.lt.s32.totalorder %v7378_v27, 0  ;;  %v3236_v59 = vsel %vm3222_vm5, %v3233_v25, %v3235_v44  ;;  %v3088_v47 = vand.u32 2139095040, %v7552_v42  ;;  %vm3076_vm1 = vcmp.lt.s32.totalorder %v7546_v2, 2  ;;  %v4770_v44 = vld [vmem:[%s4850_s7 + $0x40] sm:$0xff] }
 0x334   : > { %vm7607_vm12 = vcmp.le.f32.partialorder %v2877_v5, 0.7853982  ;;  %v2945_v20 = vclz %v4321_v63  ;;  %v2964_v16 = vsel %vm2879_vm10, %v2963_v40, %v2939_v1  ;;  %v3228_v32 = vsel %vm3222_vm5, %v3225_v33, %v3227_v46 }
 0x335   : > { %v7616_v50 = vmul.u32.u64.low %v7549_v30, %v3236_v59  ;;  %v7617_v15 = vmul.u32.u64.high %v7549_v30, %v3236_v59, %v7616_v50  ;;  %v3085_v39 = vand.u32 2147483647, %v7552_v42  ;;  %vm3077_vm8 = vcmp.eq.s32.totalorder %v7546_v2, 0 }
 0x336   : > { %v4322_v26 = vadd.s32 4294967294, %v2945_v20  ;;  %v3089_v5 = vshrl.u32 %v3088_v47, 23  ;;  %v2406_v19 = vand.u32 2147483647, %v7587_v45  ;;  %vm3080_vm14 = vcmp.eq.s32.totalorder %v7546_v2, 2 }
 0x337   : > { %v7596_v56 = vpop.f32.mrb[10].mxu1  ;;  %v2933_v51 = vadd.s32 %v7514_v58, %v7521_v0  ;;  %v3247_v10 = vadd.s32 1, %v7583_v18  ;;  %v2343_v29 = vadd.f32 %v7431_v4, %v7435_v22  ;;  %v2966_v6 = vsel %vm7607_vm12, 0, %v2964_v16 }
 0x338   : > { %v7602_v7 = vpop.f32.mrb[11].mxu1  ;;  %v4713_v8 = vpop.eup %4712  ;;  %vm4323_vm2 = vcmp.lt.s32.totalorder %v4322_v26, 0  ;;  %v3244_v55 = vmul.u32 %v7549_v30, %v3228_v32  ;;  %v4328_v1 = vadd.s32 4294967169, %v3089_v5  ;;  %vm3246_vm15 = vc.u32 %v7617_v15, %v7582_v48 }
 0x339   : > { %v4715_v13 = vpop.eup %4714  ;;  %v3081_v52 = vxor.u32 2147483648, %v4713_v8  ;;  %v2948_v31 = vsel %vm4323_vm2, 0, %v4322_v26  ;;  %v3092_v58 = vand.u32 8388607, %v3085_v39  ;;  %v2422_v53 = vadd.f32 1.0, %v2406_v19 }
 0x33a   : > { %v3078_v0 = vxor.u32 2147483648, %v4715_v13  ;;  %v2949_v11 = vsub.s32 32, %v2948_v31  ;;  %v2953_v22 = vsub.s32 4294967266, %v2948_v31  ;;  %v2950_v30 = vshll.u32 %v7565_v35, %v2948_v31 }
 0x33b   : > { %v3082_v62 = vsel %vm3080_vm14, %v3081_v52, %v4715_v13  ;;  %v3248_v23 = vsel %vm3246_vm15, %v3247_v10, %v7583_v18  ;;  %v3095_v36 = vadd.s32 1, %v4328_v1  ;;  %vm3073_vm11 = vweird.f32 %v7280_v34 }
 0x33c   : > { %v3079_v49 = vsel %vm3077_vm8, %v4713_v8, %v3078_v0  ;;  %v2951_v37 = vshrl.u32 %v2933_v51, %v2949_v11  ;;  %v2954_v61 = vadd.s32 127, %v2953_v22  ;;  %v3249_v14 = vadd.s32 %v3248_v23, %v3244_v55 }
 0x33d   : > { %v3083_v17 = vsel %vm3076_vm1, %v3079_v49, %v3082_v62  ;;  %v2970_v40 = vadd.s32 3, %v2966_v6  ;;  %vm3096_vm13 = vcmp.gt.s32.totalorder %v3095_v36, 0  ;;  %v3093_v18 = vor.u32 8388608, %v3092_v58 }
 0x33e   : > { %v3084_v12 = vsel %vm3073_vm11, nan, %v3083_v17  ;;  %v2952_v25 = vor.u32 %v2951_v37, %v2950_v30  ;;  %v2955_v35 = vshll.u32 %v2954_v61, 23  ;;  %v3250_v41 = vadd.s32 536870912, %v3249_v14 }
 0x33f   : > { %4130 = vst.msk [vmem:[%s7192_s23 + $0x28] sm:$0xff] %vm255_vm0, %v3084_v12  ;;  %v3097_v24 = vsel %vm3096_vm13, %v3095_v36, 0  ;;  %v2438_v46 = vmul.f32 30.0, %v2422_v53  ;;  %v7647_v59 = vadd.f32 %v4770_v44, %v2343_v29  ;;  %v7649_v20 = vand.u32 3, %v2970_v40 }
 0x340   : > { %v2956_v63 = vor.u32 4788187, %v2955_v35  ;;  %v3251_v33 = vshrl.u32 %v3250_v41, 30  ;;  %v3099_v34 = vand.u32 31, %v3097_v24  ;;  %v2959_v2 = vcvt.s32.f32 %v2952_v25 }
 0x341   : > { %v7653_v32 = vadd.s32 %v7582_v48, %v7617_v15  ;;  %v7655_v26 = vshll.u32 %v3093_v18, 8  ;;  %v7659_v5 = vadd.f32 %v7431_v4, %v7596_v56  ;;  %v7664_v10 = vmul.f32 %v2438_v46, %v7587_v45 }
 0x342   : > { %v2957_v47 = vand.u32 2147483647, %v2956_v63  ;;  %v3252_v16 = vshll.u32 %v3251_v33, 30  ;;  %v3100_v50 = vsub.s32 32, %v3099_v34  ;;  %v2405_v29 = vand.u32 2147483647, %v7647_v59 }
 0x343   : > { %v3098_v8 = vshrl.u32 %v3097_v24, 5  ;;  %v3102_v6 = vshll.u32 %v8608_v57, %v3099_v34  ;;  %vm3191_vm9 = vcmp.lt.s32.totalorder %v7412_v43, 0  ;;  %v3105_v1 = vshll.u32 %v8603_v9, %v3099_v34 }
 0x344   : > { %v2960_v19 = vmul.f32 %v2959_v2, %v2957_v47  ;;  %v7661_v51 = vsub.s32 %v3249_v14, %v3252_v16  ;;  %v3103_v48 = vshrl.u32 %v8603_v9, %v3100_v50  ;;  %v3106_v15 = vshrl.u32 %v8604_v28, %v3100_v50 }
 0x345   : > { %v3109_v13 = vshrl.u32 %v8564_v54, %v3100_v50  ;;  %v3108_v52 = vshll.u32 %v8604_v28, %v3099_v34  ;;  %v3111_v31 = vshll.u32 %v8564_v54, %v3099_v34  ;;  %v3112_v58 = vshrl.u32 %v8581_v60, %v3100_v50 }
 0x346   : > { %v2961_v55 = vxor.u32 2147483648, %v2960_v19  ;;  %v3255_v56 = vsub.s32 0, %v7661_v51  ;;  %v3104_v45 = vor.u32 %v3103_v48, %v3102_v6  ;;  %v3107_v22 = vor.u32 %v3106_v15, %v3105_v1 }
 0x347   : > { %v3114_v53 = vshll.u32 %v8581_v60, %v3099_v34  ;;  %v3110_v30 = vor.u32 %v3109_v13, %v3108_v52  ;;  %v3113_v23 = vor.u32 %v3112_v58, %v3111_v31  ;;  %v3115_v36 = vshrl.u32 %v8573_v38, %v3100_v50 }
 0x348   : > { %v2962_v0 = vsel %vm2879_vm10, %v2961_v55, %v2960_v19  ;;  %v4333_v11 = vmin.u32 %v3255_v56, %v7661_v51  ;;  %v3275_v37 = vsub.s32 4, %v3251_v33  ;;  %v3400_v61 = vand.u32 2139095040, %v7664_v10 }
 0x349   : > { %v2965_v62 = vsel %vm7607_vm12, %v7378_v27, %v2962_v0  ;;  %vm7688_vm7 = vcmp.le.f32.partialorder %v3189_v3, 0.7853982  ;;  %v3101_v17 = vshrl.u32 %v8608_v57, %v3100_v50  ;;  %v3116_v21 = vor.u32 %v3115_v36, %v3114_v53 }
 0x34a   : > { %4716 = vcosq.f32 %v2965_v62  ;;  %v3257_v49 = vclz %v4333_v11  ;;  %vm3117_vm3 = vcmp.lt.s32.totalorder %v3098_v8, 1  ;;  %vm3119_vm6 = vcmp.lt.s32.totalorder %v3098_v8, 3 }
 0x34b   : > { %4718 = vsinq.f32 %v2965_v62  ;;  %vm3120_vm4 = vcmp.lt.s32.totalorder %v3098_v8, 4  ;;  %v3125_v12 = vsel %vm3117_vm3, %v3104_v45, %v3107_v22  ;;  %v3129_v41 = vsel %vm3117_vm3, %v3107_v22, %v3110_v30 }
 0x34c   : > { %v4334_v40 = vadd.s32 4294967294, %v3257_v49  ;;  %v3122_v25 = vsel %vm3120_vm4, %v3110_v30, 2102212464  ;;  %v3126_v35 = vsel %vm3120_vm4, %v3113_v23, 920167782  ;;  %vm3118_vm10 = vcmp.lt.s32.totalorder %v3098_v8, 2 }
 0x34d   : > { %v3130_v18 = vsel %vm3120_vm4, %v3116_v21, 1326507024  ;;  %v3127_v3 = vsel %vm3119_vm6, %v3110_v30, %v3126_v35  ;;  %v3276_v46 = vsel %vm3191_vm9, %v3275_v37, %v3251_v33  ;;  %vm2972_vm1 = vcmp.lt.s32.totalorder %v7649_v20, 2  ;;  %v4771_v30 = vld [vmem:[%s4850_s7 + $0x58] sm:$0xff] }
 0x34e   : > { %vm4335_vm5 = vcmp.lt.s32.totalorder %v4334_v40, 0  ;;  %v3131_v24 = vsel %vm3119_vm6, %v3113_v23, %v3130_v18  ;;  %v3128_v44 = vsel %vm3118_vm10, %v3125_v12, %v3127_v3  ;;  %v3121_v16 = vsel %vm3117_vm3, %v3101_v17, %v3104_v45 }
 0x34f   : > { %v3260_v63 = vsel %vm4335_vm5, 0, %v4334_v40  ;;  %v3132_v34 = vsel %vm3118_vm10, %v3129_v41, %v3131_v24  ;;  %v3123_v50 = vsel %vm3119_vm6, %v3107_v22, %v3122_v25  ;;  %vm2969_vm12 = vweird.f32 %v7378_v27 }
 0x350   : > { %v3261_v47 = vsub.s32 32, %v3260_v63  ;;  %v3265_v2 = vsub.s32 4294967266, %v3260_v63  ;;  %v7706_v19 = vmul.u32.u64.low %v7655_v26, %v3132_v34  ;;  %v7707_v6 = vmul.u32.u64.high %v7655_v26, %v3132_v34, %v7706_v19 }
 0x351   : > { %v7710_v33 = vmul.u32.u64.low %v7655_v26, %v3128_v44  ;;  %v7711_v48 = vmul.u32.u64.high %v7655_v26, %v3128_v44, %v7710_v33  ;;  %v3262_v15 = vshll.u32 %v7661_v51, %v3260_v63  ;;  %v3401_v1 = vshrl.u32 %v3400_v61, 23 }
 0x352   : > { %v3263_v55 = vshrl.u32 %v7653_v32, %v3261_v47  ;;  %v3266_v56 = vadd.s32 127, %v3265_v2  ;;  %vm2973_vm8 = vcmp.eq.s32.totalorder %v7649_v20, 0  ;;  %vm2976_vm14 = vcmp.eq.s32.totalorder %v7649_v20, 2 }
 0x353   : > { %v3124_v13 = vsel %vm3118_vm10, %v3121_v16, %v3123_v50  ;;  %v2421_v45 = vadd.f32 1.0, %v2405_v29  ;;  %v3278_v51 = vsel %vm7688_vm7, 0, %v3276_v46  ;;  %v4340_v0 = vadd.s32 4294967169, %v3401_v1 }
 0x354   : > { %v4717_v52 = vpop.eup %4716  ;;  %v3264_v31 = vor.u32 %v3263_v55, %v3262_v15  ;;  %v3267_v58 = vshll.u32 %v3266_v56, 23  ;;  %vm3142_vm2 = vc.u32 %v7707_v6, %v7710_v33  ;;  %v3143_v22 = vadd.s32 1, %v7711_v48 }
 0x355   : > { %v4719_v32 = vpop.eup %4718  ;;  %v2977_v11 = vxor.u32 2147483648, %v4717_v52  ;;  %v3397_v8 = vand.u32 2147483647, %v7664_v10  ;;  %v3140_v29 = vmul.u32 %v7655_v26, %v3124_v13  ;;  %v7730_v23 = vadd.f32 %v4771_v30, %v7659_v5 }
 0x356   : > { %v2974_v53 = vxor.u32 2147483648, %v4719_v32  ;;  %v3268_v62 = vor.u32 4788187, %v3267_v58  ;;  %v3282_v49 = vadd.s32 3, %v3278_v51  ;;  %v3144_v37 = vsel %vm3142_vm2, %v3143_v22, %v7711_v48 }
 0x357   : > { %v2978_v36 = vsel %vm2976_vm14, %v2977_v11, %v4719_v32  ;;  %v3407_v61 = vadd.s32 1, %v4340_v0  ;;  %v3271_v40 = vcvt.s32.f32 %v3264_v31  ;;  %v3145_v12 = vadd.s32 %v3144_v37, %v3140_v29 }
 0x358   : > { %v2975_v17 = vsel %vm2973_vm8, %v4717_v52, %v2974_v53  ;;  %v3269_v21 = vand.u32 2147483647, %v3268_v62  ;;  %v3404_v5 = vand.u32 8388607, %v3397_v8  ;;  %v2437_v35 = vmul.f32 30.0, %v2421_v45 }
 0x359   : > { %v2979_v26 = vsel %vm2972_vm1, %v2975_v17, %v2978_v36  ;;  %vm3408_vm15 = vcmp.gt.s32.totalorder %v3407_v61, 0  ;;  %v3146_v24 = vadd.s32 536870912, %v3145_v12  ;;  %vm3087_vm11 = vcmp.lt.s32.totalorder %v7552_v42, 0 }
 0x35a   : > { %v2980_v18 = vsel %vm2969_vm12, nan, %v2979_v26  ;;  %v3272_v3 = vmul.f32 %v3271_v40, %v3269_v21  ;;  %v3409_v63 = vsel %vm3408_vm15, %v3407_v61, 0  ;;  %v7752_v34 = vadd.f32 %v7431_v4, %v7602_v7 }
 0x35b   : > { %4129 = vst.msk [vmem:[%s7192_s23 + $0x20] sm:$0xff] %vm255_vm0, %v2980_v18  ;;  %v3411_v46 = vand.u32 31, %v3409_v63  ;;  %v3147_v20 = vshrl.u32 %v3146_v24, 30  ;;  %v7754_v47 = vand.u32 3, %v3282_v49  ;;  %v3405_v2 = vor.u32 8388608, %v3404_v5 }
 0x35c   : > { %v3273_v44 = vxor.u32 2147483648, %v3272_v3  ;;  %v2408_v27 = vand.u32 2147483647, %v7730_v23  ;;  %v7759_v48 = vshrl.u32 %v3409_v63, 5  ;;  %v7762_v15 = vmul.f32 %v2437_v35, %v7647_v59 }
 0x35d   : > { %v3412_v16 = vsub.s32 32, %v3411_v46  ;;  %v3148_v19 = vshll.u32 %v3147_v20, 30  ;;  %v3414_v7 = vshll.u32 %v8608_v57, %v3411_v46  ;;  %v3417_v13 = vshll.u32 %v8603_v9, %v3411_v46 }
 0x35e   : > { %v3274_v50 = vsel %vm3191_vm9, %v3273_v44, %v3272_v3  ;;  %v3171_v59 = vsub.s32 4, %v3147_v20  ;;  %v3420_v52 = vshll.u32 %v8604_v28, %v3411_v46  ;;  %v3423_v14 = vshll.u32 %v8564_v54, %v3411_v46 }
 0x35f   : > { %v7737_v25 = vpop.f32.mrb[12].mxu1  ;;  %v3277_v4 = vsel %vm7688_vm7, %v7412_v43, %v3274_v50  ;;  %v3415_v55 = vshrl.u32 %v8603_v9, %v3412_v16  ;;  %v3418_v56 = vshrl.u32 %v8604_v28, %v3412_v16  ;;  %v7770_v1 = vsub.s32 %v3145_v12, %v3148_v19 }
 0x360   : > { %v7743_v41 = vpop.f32.mrb[13].mxu1  ;;  %4720 = vcosq.f32 %v3277_v4  ;;  %v3421_v45 = vshrl.u32 %v8564_v54, %v3412_v16  ;;  %v3424_v0 = vshrl.u32 %v8581_v60, %v3412_v16  ;;  %v3141_v32 = vadd.s32 %v7710_v33, %v7707_v6 }
 0x361   : > { %4722 = vsinq.f32 %v3277_v4  ;;  %v3151_v31 = vsub.s32 0, %v7770_v1  ;;  %v3416_v58 = vor.u32 %v3415_v55, %v3414_v7  ;;  %v3419_v51 = vor.u32 %v3418_v56, %v3417_v13 }
 0x362   : > { %v3422_v11 = vor.u32 %v3421_v45, %v3420_v52  ;;  %v3426_v22 = vshll.u32 %v8581_v60, %v3411_v46  ;;  %v3427_v53 = vshrl.u32 %v8573_v38, %v3412_v16  ;;  %vm3288_vm13 = vcmp.eq.s32.totalorder %v7754_v47, 2 }
 0x363   : > { %vm7785_vm9 = vcmp.le.f32.partialorder %v3085_v39, 0.7853982  ;;  %v4329_v29 = vmin.u32 %v3151_v31, %v7770_v1  ;;  %v3425_v30 = vor.u32 %v3424_v0, %v3423_v14  ;;  %v3445_v36 = vshll.u32 %v3405_v2, 8 }
 0x364   : > { %v3296_v49 = vand.u32 2139095040, %v7762_v15  ;;  %vm3285_vm7 = vcmp.eq.s32.totalorder %v7754_v47, 0  ;;  %v3172_v6 = vsel %vm3087_vm11, %v3171_v59, %v3147_v20  ;;  %v3413_v33 = vshrl.u32 %v8608_v57, %v3412_v16 }
 0x365   : > { %v3428_v37 = vor.u32 %v3427_v53, %v3426_v22  ;;  %vm3429_vm3 = vcmp.lt.s32.totalorder %v7759_v48, 1  ;;  %vm3284_vm6 = vcmp.lt.s32.totalorder %v7754_v47, 2  ;;  %v3153_v39 = vclz %v4329_v29 }
 0x366   : > { %vm3431_vm4 = vcmp.lt.s32.totalorder %v7759_v48, 3  ;;  %vm3432_vm5 = vcmp.lt.s32.totalorder %v7759_v48, 4  ;;  %v3437_v61 = vsel %vm3429_vm3, %v3416_v58, %v3419_v51  ;;  %vm3281_vm10 = vweird.f32 %v7412_v43 }
 0x367   : > { %v3434_v17 = vsel %vm3432_vm5, %v3422_v11, 2102212464  ;;  %v3438_v21 = vsel %vm3432_vm5, %v3425_v30, 920167782  ;;  %v3441_v40 = vsel %vm3429_vm3, %v3419_v51, %v3422_v11  ;;  %v3442_v12 = vsel %vm3432_vm5, %v3428_v37, 1326507024 }
 0x368   : > { %v4330_v26 = vadd.s32 4294967294, %v3153_v39  ;;  %vm3430_vm1 = vcmp.lt.s32.totalorder %v7759_v48, 2  ;;  %v3439_v5 = vsel %vm3431_vm4, %v3422_v11, %v3438_v21  ;;  %v3443_v35 = vsel %vm3431_vm4, %v3425_v30, %v3442_v12 }
 0x369   : > { %v3433_v18 = vsel %vm3429_vm3, %v3413_v33, %v3416_v58  ;;  %v3440_v3 = vsel %vm3430_vm1, %v3437_v61, %v3439_v5  ;;  %v3444_v24 = vsel %vm3430_vm1, %v3441_v40, %v3443_v35  ;;  %v3297_v63 = vshrl.u32 %v3296_v49, 23  ;;  %v4772_v40 = vld [vmem:[%s4850_s7 + $0x50] sm:$0xff] }
 0x36a   : > { %v4721_v46 = vpop.eup %4720  ;;  %vm4331_vm12 = vcmp.lt.s32.totalorder %v4330_v26, 0  ;;  %v3435_v44 = vsel %vm3431_vm4, %v3419_v51, %v3434_v17  ;;  %v7811_v20 = vmul.u32.u64.low %v3445_v36, %v3444_v24  ;;  %v7812_v2 = vmul.u32.u64.high %v3445_v36, %v3444_v24, %v7811_v20 }
 0x36b   : > { %v4723_v16 = vpop.eup %4722  ;;  %v3289_v50 = vxor.u32 2147483648, %v4721_v46  ;;  %v3156_v19 = vsel %vm4331_vm12, 0, %v4330_v26  ;;  %v7814_v4 = vmul.u32.u64.low %v3445_v36, %v3440_v3  ;;  %v7815_v7 = vmul.u32.u64.high %v3445_v36, %v3440_v3, %v7814_v4 }
 0x36c   : > { %v3286_v55 = vxor.u32 2147483648, %v4723_v16  ;;  %v3157_v56 = vsub.s32 32, %v3156_v19  ;;  %v3161_v13 = vsub.s32 4294967266, %v3156_v19  ;;  %v3293_v45 = vand.u32 2147483647, %v7762_v15 }
 0x36d   : > { %v3290_v59 = vsel %vm3288_vm13, %v3289_v50, %v4723_v16  ;;  %v3174_v52 = vsel %vm7785_vm9, 0, %v3172_v6  ;;  %v3436_v14 = vsel %vm3430_vm1, %v3433_v18, %v3435_v44  ;;  %v4336_v31 = vadd.s32 4294967169, %v3297_v63 }
 0x36e   : > { %v3287_v58 = vsel %vm3285_vm7, %v4721_v46, %v3286_v55  ;;  %v3158_v51 = vshll.u32 %v7770_v1, %v3156_v19  ;;  %v3159_v0 = vshrl.u32 %v3141_v32, %v3157_v56  ;;  %v3162_v11 = vadd.s32 127, %v3161_v13 }
 0x36f   : > { %v3291_v22 = vsel %vm3284_vm6, %v3287_v58, %v3290_v59  ;;  %vm3454_vm8 = vc.u32 %v7812_v2, %v7814_v4  ;;  %v3455_v53 = vadd.s32 1, %v7815_v7  ;;  %v3303_v29 = vadd.s32 1, %v4336_v31 }
 0x370   : > { %v3292_v48 = vsel %vm3281_vm10, nan, %v3291_v22  ;;  %v3160_v30 = vor.u32 %v3159_v0, %v3158_v51  ;;  %v3163_v49 = vshll.u32 %v3162_v11, 23  ;;  %v3452_v6 = vmul.u32 %v3445_v36, %v3436_v14 }
 0x371   : > { %4132 = vst.msk [vmem:[%s7192_s23 + $0x38] sm:$0xff] %vm255_vm0, %v3292_v48  ;;  %v3178_v1 = vadd.s32 3, %v3174_v52  ;;  %v3456_v32 = vsel %vm3454_vm8, %v3455_v53, %v7815_v7  ;;  %v3300_v47 = vand.u32 8388607, %v3293_v45  ;;  %vm3304_vm14 = vcmp.gt.s32.totalorder %v3303_v29, 0 }
 0x372   : > { %v3164_v33 = vor.u32 4788187, %v3163_v49  ;;  %v3457_v37 = vadd.s32 %v3456_v32, %v3452_v6  ;;  %v3305_v39 = vsel %vm3304_vm14, %v3303_v29, 0  ;;  %v3167_v43 = vcvt.s32.f32 %v3160_v30 }
 0x373   : > { %v3307_v61 = vand.u32 31, %v3305_v39  ;;  %v7842_v12 = vadd.f32 %v4772_v40, %v7752_v34  ;;  %v7844_v36 = vand.u32 3, %v3178_v1  ;;  %v3301_v26 = vor.u32 8388608, %v3300_v47 }
 0x374   : > { %v3165_v17 = vand.u32 2147483647, %v3164_v33  ;;  %v3458_v21 = vadd.s32 536870912, %v3457_v37  ;;  %v2424_v35 = vadd.f32 1.0, %v2408_v27  ;;  %v3306_v24 = vshrl.u32 %v3305_v39, 5 }
 0x375   : > { %v3308_v5 = vsub.s32 32, %v3307_v61  ;;  %v3310_v63 = vshll.u32 %v8608_v57, %v3307_v61  ;;  %v3313_v44 = vshll.u32 %v8603_v9, %v3307_v61  ;;  %vm3399_vm2 = vcmp.lt.s32.totalorder %v7664_v10, 0 }
 0x376   : > { %v3168_v18 = vmul.f32 %v3167_v43, %v3165_v17  ;;  %v3459_v3 = vshrl.u32 %v3458_v21, 30  ;;  %v3316_v19 = vshll.u32 %v8604_v28, %v3307_v61  ;;  %v3319_v55 = vshll.u32 %v8564_v54, %v3307_v61 }
 0x377   : > { %v3311_v46 = vshrl.u32 %v8603_v9, %v3308_v5  ;;  %v3314_v20 = vshrl.u32 %v8604_v28, %v3308_v5  ;;  %v3317_v34 = vshrl.u32 %v8564_v54, %v3308_v5  ;;  %v3320_v27 = vshrl.u32 %v8581_v60, %v3308_v5 }
 0x378   : > { %v3169_v16 = vxor.u32 2147483648, %v3168_v18  ;;  %v3460_v50 = vshll.u32 %v3459_v3, 30  ;;  %v3322_v56 = vshll.u32 %v8581_v60, %v3307_v61  ;;  %v3323_v13 = vshrl.u32 %v8573_v38, %v3308_v5 }
 0x379   : > { %v3312_v7 = vor.u32 %v3311_v46, %v3310_v63  ;;  %v3315_v14 = vor.u32 %v3314_v20, %v3313_v44  ;;  %v3318_v31 = vor.u32 %v3317_v34, %v3316_v19  ;;  %v3321_v51 = vor.u32 %v3320_v27, %v3319_v55 }
 0x37a   : > { %v3170_v59 = vsel %vm3087_vm11, %v3169_v16, %v3168_v18  ;;  %v7861_v52 = vsub.s32 %v3457_v37, %v3460_v50  ;;  %v3324_v0 = vor.u32 %v3323_v13, %v3322_v56  ;;  %v2440_v11 = vmul.f32 30.0, %v2424_v35 }
 0x37b   : > { %v3173_v58 = vsel %vm7785_vm9, %v7552_v42, %v3170_v59  ;;  %vm7868_vm15 = vcmp.le.f32.partialorder %v3397_v8, 0.7853982  ;;  %v3483_v29 = vsub.s32 4, %v3459_v3  ;;  %v3309_v48 = vshrl.u32 %v8608_v57, %v3308_v5 }
 0x37c   : > { %4724 = vcosq.f32 %v3173_v58  ;;  %v3463_v53 = vsub.s32 0, %v7861_v52  ;;  %vm3325_vm11 = vcmp.lt.s32.totalorder %v3306_v24, 1  ;;  %vm3327_vm13 = vcmp.lt.s32.totalorder %v3306_v24, 3 }
 0x37d   : > { %4726 = vsinq.f32 %v3173_v58  ;;  %vm3328_vm7 = vcmp.lt.s32.totalorder %v3306_v24, 4  ;;  %v3329_v30 = vsel %vm3325_vm11, %v3309_v48, %v3312_v7  ;;  %v3333_v6 = vsel %vm3325_vm11, %v3312_v7, %v3315_v14 }
 0x37e   : > { %v4341_v62 = vmin.u32 %v3463_v53, %v7861_v52  ;;  %v3330_v49 = vsel %vm3328_vm7, %v3318_v31, 2102212464  ;;  %v3334_v8 = vsel %vm3328_vm7, %v3321_v51, 920167782  ;;  %v3337_v32 = vsel %vm3325_vm11, %v3315_v14, %v3318_v31 }
 0x37f   : > { %v3331_v1 = vsel %vm3327_vm13, %v3315_v14, %v3330_v49  ;;  %v3338_v47 = vsel %vm3328_vm7, %v3324_v0, 1326507024  ;;  %v3341_v37 = vshll.u32 %v3301_v26, 8  ;;  %v7877_v39 = vmul.f32 %v2440_v11, %v7730_v23 }
 0x380   : > { %v3465_v33 = vclz %v4341_v62  ;;  %v2407_v61 = vand.u32 2147483647, %v7842_v12  ;;  %v3484_v43 = vsel %vm3399_vm2, %v3483_v29, %v3459_v3  ;;  %vm3326_vm9 = vcmp.lt.s32.totalorder %v3306_v24, 2 }
 0x381   : > { %v3335_v21 = vsel %vm3327_vm13, %v3318_v31, %v3334_v8  ;;  %v3339_v40 = vsel %vm3327_vm13, %v3321_v51, %v3338_v47  ;;  %vm3180_vm3 = vcmp.lt.s32.totalorder %v7844_v36, 2  ;;  %v3332_v35 = vsel %vm3326_vm9, %v3329_v30, %v3331_v1 }
 0x382   : > { %v4342_v26 = vadd.s32 4294967294, %v3465_v33  ;;  %v3336_v23 = vsel %vm3326_vm9, %v3333_v6, %v3335_v21  ;;  %v3340_v18 = vsel %vm3326_vm9, %v3337_v32, %v3339_v40  ;;  %vm3181_vm6 = vcmp.eq.s32.totalorder %v7844_v36, 0  ;;  %v7924_v40 = vld [vmem:[%s8450_s4] ss:$0 sm:$0xff] }
 0x383   : > { %v7889_v63 = vmul.u32.u64.low %v3341_v37, %v3340_v18  ;;  %v7890_v46 = vmul.u32.u64.high %v3341_v37, %v3340_v18, %v7889_v63  ;;  %v7892_v44 = vmul.u32.u64.low %v3341_v37, %v3336_v23  ;;  %v7893_v20 = vmul.u32.u64.high %v3341_v37, %v3336_v23, %v7892_v44 }
 0x384   : > { %vm3184_vm4 = vcmp.eq.s32.totalorder %v7844_v36, 2  ;;  %vm4343_vm5 = vcmp.lt.s32.totalorder %v4342_v26, 0  ;;  %v3608_v3 = vand.u32 2139095040, %v7877_v39  ;;  %v3453_v24 = vadd.s32 %v7814_v4, %v7812_v2 }
 0x385   : > { %v3468_v34 = vsel %vm4343_vm5, 0, %v4342_v26  ;;  %v3486_v16 = vsel %vm7868_vm15, 0, %v3484_v43  ;;  %v2423_v50 = vadd.f32 1.0, %v2407_v61  ;;  %v3348_v55 = vmul.u32 %v3341_v37, %v3332_v35 }
 0x386   : > { %v4725_v19 = vpop.eup %4724  ;;  %v3469_v27 = vsub.s32 32, %v3468_v34  ;;  %v3473_v7 = vsub.s32 4294967266, %v3468_v34  ;;  %v3609_v56 = vshrl.u32 %v3608_v3, 23  ;;  %v3470_v14 = vshll.u32 %v7861_v52, %v3468_v34 }
 0x387   : > { %v7880_v17 = vpop.f32.mrb[14].mxu1  ;;  %v4727_v13 = vpop.eup %4726  ;;  %v3185_v59 = vxor.u32 2147483648, %v4725_v19  ;;  %vm3350_vm10 = vc.u32 %v7890_v46, %v7892_v44  ;;  %v3351_v31 = vadd.s32 1, %v7893_v20  ;;  %v3605_v53 = vand.u32 2147483647, %v7877_v39 }
 0x388   : > { %v7886_v5 = vpop.f32.mrb[15].mxu1  ;;  %v3182_v58 = vxor.u32 2147483648, %v4727_v13  ;;  %v3471_v2 = vshrl.u32 %v3453_v24, %v3469_v27  ;;  %v3474_v4 = vadd.s32 127, %v3473_v7  ;;  %v4348_v51 = vadd.s32 4294967169, %v3609_v56 }
 0x389   : > { %v3186_v0 = vsel %vm3184_vm4, %v3185_v59, %v4727_v13  ;;  %v3352_v11 = vsel %vm3350_vm10, %v3351_v31, %v7893_v20  ;;  %v2439_v29 = vmul.f32 30.0, %v2423_v50  ;;  %vm3177_vm1 = vweird.f32 %v7552_v42 }
 0x38a   : > { %v3183_v52 = vsel %vm3181_vm6, %v4725_v19, %v3182_v58  ;;  %v3472_v48 = vor.u32 %v3471_v2, %v3470_v14  ;;  %v3475_v62 = vshll.u32 %v3474_v4, 23  ;;  %v3353_v30 = vadd.s32 %v3352_v11, %v3348_v55 }
 0x38b   : > { %v3187_v49 = vsel %vm3180_vm3, %v3183_v52, %v3186_v0  ;;  %v3615_v6 = vadd.s32 1, %v4348_v51  ;;  %v3490_v32 = vadd.s32 3, %v3486_v16  ;;  %v3612_v33 = vand.u32 8388607, %v3605_v53 }
 0x38c   : > { %v3188_v1 = vsel %vm3177_vm1, nan, %v3187_v49  ;;  %v3476_v8 = vor.u32 4788187, %v3475_v62  ;;  %v3354_v47 = vadd.s32 536870912, %v3353_v30  ;;  %v7919_v37 = vmul.f32 %v2439_v29, %v7842_v12 }
 0x38d   : > { %4131 = vst.msk [vmem:[%s7192_s23 + $0x30] sm:$0xff] %vm255_vm0, %v3188_v1  ;;  %vm3616_vm12 = vcmp.gt.s32.totalorder %v3615_v6, 0  ;;  %v3479_v43 = vcvt.s32.f32 %v3472_v48  ;;  %v7928_v26 = vadd.f32 %v7924_v40, %v7737_v25  ;;  %v7930_v23 = vand.u32 3, %v3490_v32 }
 0x38e   : > { %v3477_v61 = vand.u32 2147483647, %v3476_v8  ;;  %v3355_v42 = vshrl.u32 %v3354_v47, 30  ;;  %v3617_v21 = vsel %vm3616_vm12, %v3615_v6, 0  ;;  %vm3295_vm8 = vcmp.lt.s32.totalorder %v7762_v15, 0 }
 0x38f   : > { %v3619_v36 = vand.u32 31, %v3617_v21  ;;  %v7934_v12 = vadd.s32 %v7892_v44, %v7890_v46  ;;  %v3613_v63 = vor.u32 8388608, %v3612_v33  ;;  %v3501_v3 = vand.u32 2147483647, %v7919_v37 }
 0x390   : > { %v3480_v35 = vmul.f32 %v3479_v43, %v3477_v61  ;;  %v3356_v18 = vshll.u32 %v3355_v42, 30  ;;  %v3504_v24 = vand.u32 2139095040, %v7919_v37  ;;  %v3379_v25 = vsub.s32 4, %v3355_v42 }
 0x391   : > { %v3620_v20 = vsub.s32 32, %v3619_v36  ;;  %v7940_v50 = vshrl.u32 %v3617_v21, 5  ;;  %v3622_v19 = vshll.u32 %v8608_v57, %v3619_v36  ;;  %v3625_v46 = vshll.u32 %v8603_v9, %v3619_v36 }
 0x392   : > { %v3481_v34 = vxor.u32 2147483648, %v3480_v35  ;;  %v7938_v16 = vsub.s32 %v3353_v30, %v3356_v18  ;;  %vm7950_vm14 = vcmp.le.f32.partialorder %v3293_v45, 0.7853982  ;;  %v3628_v13 = vshll.u32 %v8604_v28, %v3619_v36 }
 0x393   : > { %v3623_v27 = vshrl.u32 %v8603_v9, %v3620_v20  ;;  %v3626_v44 = vshrl.u32 %v8604_v28, %v3620_v20  ;;  %v3629_v59 = vshrl.u32 %v8564_v54, %v3620_v20  ;;  %v3631_v58 = vshll.u32 %v8564_v54, %v3619_v36 }
 0x394   : > { %v3482_v7 = vsel %vm3399_vm2, %v3481_v34, %v3480_v35  ;;  %v3359_v56 = vsub.s32 0, %v7938_v16  ;;  %v3632_v2 = vshrl.u32 %v8581_v60, %v3620_v20  ;;  %v3634_v11 = vshll.u32 %v8581_v60, %v3619_v36 }
 0x395   : > { %v3485_v14 = vsel %vm7868_vm15, %v7664_v10, %v3482_v7  ;;  %v3624_v31 = vor.u32 %v3623_v27, %v3622_v19  ;;  %v3627_v4 = vor.u32 %v3626_v44, %v3625_v46  ;;  %v3630_v51 = vor.u32 %v3629_v59, %v3628_v13 }
 0x396   : > { %4728 = vcosq.f32 %v3485_v14  ;;  %v4337_v45 = vmin.u32 %v3359_v56, %v7938_v16  ;;  %v3633_v0 = vor.u32 %v3632_v2, %v3631_v58  ;;  %v3635_v29 = vshrl.u32 %v8573_v38, %v3620_v20 }
 0x397   : > { %4730 = vsinq.f32 %v3485_v14  ;;  %v7965_v48 = vshll.u32 %v3613_v63, 8  ;;  %v3505_v22 = vshrl.u32 %v3504_v24, 23  ;;  %v7969_v62 = vand.u32 8388607, %v3501_v3 }
 0x398   : > { %v3361_v52 = vclz %v4337_v45  ;;  %v3380_v30 = vsel %vm3295_vm8, %v3379_v25, %v3355_v42  ;;  %v3621_v49 = vshrl.u32 %v8608_v57, %v3620_v20  ;;  %v3636_v6 = vor.u32 %v3635_v29, %v3634_v11 }
 0x399   : > { %vm3637_vm2 = vcmp.lt.s32.totalorder %v7940_v50, 1  ;;  %vm3639_vm15 = vcmp.lt.s32.totalorder %v7940_v50, 3  ;;  %vm3640_vm11 = vcmp.lt.s32.totalorder %v7940_v50, 4  ;;  %vm3493_vm13 = vcmp.eq.s32.totalorder %v7930_v23, 0 }
 0x39a   : > { %v4338_v1 = vadd.s32 4294967294, %v3361_v52  ;;  %v3645_v8 = vsel %vm3637_vm2, %v3624_v31, %v3627_v4  ;;  %v3642_v32 = vsel %vm3640_vm11, %v3630_v51, 2102212464  ;;  %v3646_v47 = vsel %vm3640_vm11, %v3633_v0, 920167782 }
 0x39b   : > { %v3649_v33 = vsel %vm3637_vm2, %v3627_v4, %v3630_v51  ;;  %v3650_v61 = vsel %vm3640_vm11, %v3636_v6, 1326507024  ;;  %vm3492_vm7 = vcmp.lt.s32.totalorder %v7930_v23, 2  ;;  %vm3638_vm3 = vcmp.lt.s32.totalorder %v7940_v50, 2 }
 0x39c   : > { %vm4339_vm9 = vcmp.lt.s32.totalorder %v4338_v1, 0  ;;  %v3647_v43 = vsel %vm3639_vm15, %v3630_v51, %v3646_v47  ;;  %v3651_v42 = vsel %vm3639_vm15, %v3633_v0, %v3650_v61  ;;  %vm3489_vm6 = vweird.f32 %v7664_v10 }
 0x39d   : > { %v3364_v21 = vsel %vm4339_vm9, 0, %v4338_v1  ;;  %v3382_v36 = vsel %vm7950_vm14, 0, %v3380_v30  ;;  %v3648_v35 = vsel %vm3638_vm3, %v3645_v8, %v3647_v43  ;;  %v3652_v18 = vsel %vm3638_vm3, %v3649_v33, %v3651_v42 }
 0x39e   : > { %v3365_v63 = vsub.s32 32, %v3364_v21  ;;  %v3369_v20 = vsub.s32 4294967266, %v3364_v21  ;;  %v3641_v24 = vsel %vm3637_vm2, %v3621_v49, %v3624_v31  ;;  %v3643_v34 = vsel %vm3639_vm15, %v3627_v4, %v3642_v32  ;;  %v4774_v49 = vld [vmem:[%s4850_s7 + $0x68] sm:$0xff] }
 0x39f   : > { %v8000_v25 = vmul.u32.u64.low %v7965_v48, %v3652_v18  ;;  %v8001_v19 = vmul.u32.u64.high %v7965_v48, %v3652_v18, %v8000_v25  ;;  %v8004_v27 = vmul.u32.u64.low %v7965_v48, %v3648_v35  ;;  %v8005_v46 = vmul.u32.u64.high %v7965_v48, %v3648_v35, %v8004_v27 }
 0x3a0   : > { %v4729_v44 = vpop.eup %4728  ;;  %v3366_v7 = vshll.u32 %v7938_v16, %v3364_v21  ;;  %v3367_v56 = vshrl.u32 %v7934_v12, %v3365_v63  ;;  %v3370_v13 = vadd.s32 127, %v3369_v20  ;;  %v4344_v59 = vadd.s32 4294967169, %v3505_v22 }
 0x3a1   : > { %v4731_v14 = vpop.eup %4730  ;;  %vm3496_vm4 = vcmp.eq.s32.totalorder %v7930_v23, 2  ;;  %v3497_v31 = vxor.u32 2147483648, %v4729_v44  ;;  %v3644_v58 = vsel %vm3638_vm3, %v3641_v24, %v3643_v34  ;;  %v3509_v2 = vor.u32 8388608, %v7969_v62 }
 0x3a2   : > { %v3494_v45 = vxor.u32 2147483648, %v4731_v14  ;;  %v3368_v4 = vor.u32 %v3367_v56, %v3366_v7  ;;  %v3371_v51 = vshll.u32 %v3370_v13, 23  ;;  %v3511_v0 = vadd.s32 1, %v4344_v59 }
 0x3a3   : > { %v3498_v11 = vsel %vm3496_vm4, %v3497_v31, %v4731_v14  ;;  %v3386_v16 = vadd.s32 3, %v3382_v36  ;;  %vm3662_vm5 = vc.u32 %v8001_v19, %v8004_v27  ;;  %v3663_v12 = vadd.s32 1, %v8005_v46 }
 0x3a4   : > { %v3495_v29 = vsel %vm3493_vm13, %v4729_v44, %v3494_v45  ;;  %v3372_v50 = vor.u32 4788187, %v3371_v51  ;;  %v3660_v52 = vmul.u32 %v7965_v48, %v3644_v58  ;;  %vm3512_vm10 = vcmp.gt.s32.totalorder %v3511_v0, 0 }
 0x3a5   : > { %v3499_v22 = vsel %vm3492_vm7, %v3495_v29, %v3498_v11  ;;  %v3664_v62 = vsel %vm3662_vm5, %v3663_v12, %v8005_v46  ;;  %v3513_v30 = vsel %vm3512_vm10, %v3511_v0, 0  ;;  %v8025_v6 = vadd.f32 %v4774_v49, %v7928_v26 }
 0x3a6   : > { %v3500_v1 = vsel %vm3489_vm6, nan, %v3499_v22  ;;  %v3373_v8 = vand.u32 2147483647, %v3372_v50  ;;  %v3375_v32 = vcvt.s32.f32 %v3368_v4  ;;  %v3665_v47 = vadd.s32 %v3664_v62, %v3660_v52 }
 0x3a7   : > { %4134 = vst.msk [vmem:[%s7192_s23 + $0x48] sm:$0xff] %vm255_vm0, %v3500_v1  ;;  %v3515_v48 = vand.u32 31, %v3513_v30  ;;  %v8031_v61 = vand.u32 3, %v3386_v16  ;;  %v2363_v43 = vadd.f32 %v7924_v40, %v7743_v41  ;;  %v3514_v42 = vshrl.u32 %v3513_v30, 5 }
 0x3a8   : > { %v3376_v33 = vmul.f32 %v3375_v32, %v3373_v8  ;;  %v3666_v23 = vadd.s32 536870912, %v3665_v47  ;;  %v8035_v26 = vshll.u32 %v3509_v2, 8  ;;  %v2410_v10 = vand.u32 2147483647, %v8025_v6  ;;  %v4775_v2 = vld [vmem:[%s4850_s7 + $0x60] sm:$0xff] }
 0x3a9   : > { %v3516_v21 = vsub.s32 32, %v3515_v48  ;;  %v3518_v18 = vshll.u32 %v8608_v57, %v3515_v48  ;;  %v3521_v63 = vshll.u32 %v8603_v9, %v3515_v48  ;;  %v3524_v41 = vshll.u32 %v8604_v28, %v3515_v48 }
 0x3aa   : > { %v3377_v36 = vxor.u32 2147483648, %v3376_v33  ;;  %v8038_v35 = vshrl.u32 %v3666_v23, 30  ;;  %v3527_v44 = vshll.u32 %v8564_v54, %v3515_v48  ;;  %v8057_v45 = vadd.f32 %v4775_v2, %v2363_v43 }
 0x3ab   : > { %v3519_v20 = vshrl.u32 %v8603_v9, %v3516_v21  ;;  %v3522_v24 = vshrl.u32 %v8604_v28, %v3516_v21  ;;  %v3525_v34 = vshrl.u32 %v8564_v54, %v3516_v21  ;;  %v3528_v7 = vshrl.u32 %v8581_v60, %v3516_v21 }
 0x3ac   : > { %v3378_v25 = vsel %vm3295_vm8, %v3377_v36, %v3376_v33  ;;  %v3668_v46 = vshll.u32 %v8038_v35, 30  ;;  %v3530_v4 = vshll.u32 %v8581_v60, %v3515_v48  ;;  %v3531_v51 = vshrl.u32 %v8573_v38, %v3516_v21 }
 0x3ad   : > { %v3381_v56 = vsel %vm7950_vm14, %v7762_v15, %v3378_v25  ;;  %v3520_v13 = vor.u32 %v3519_v20, %v3518_v18  ;;  %v3523_v59 = vor.u32 %v3522_v24, %v3521_v63  ;;  %v3526_v14 = vor.u32 %v3525_v34, %v3524_v41  ;;  %v4776_v25 = vld [vmem:[%s4850_s7 + $0x78] sm:$0xff] }
 0x3ae   : > { %4732 = vcosq.f32 %v3381_v56  ;;  %v8054_v31 = vsub.s32 %v3665_v47, %v3668_v46  ;;  %v3529_v58 = vor.u32 %v3528_v7, %v3527_v44  ;;  %v2426_v0 = vadd.f32 1.0, %v2410_v10 }
 0x3af   : > { %4734 = vsinq.f32 %v3381_v56  ;;  %vm3533_vm1 = vcmp.lt.s32.totalorder %v3514_v42, 1  ;;  %vm3535_vm12 = vcmp.lt.s32.totalorder %v3514_v42, 3  ;;  %vm3536_vm8 = vcmp.lt.s32.totalorder %v3514_v42, 4 }
 0x3b0   : > { %v3671_v11 = vsub.s32 0, %v8054_v31  ;;  %v3532_v55 = vor.u32 %v3531_v51, %v3530_v4  ;;  %v3538_v16 = vsel %vm3536_vm8, %v3526_v14, 2102212464  ;;  %v3541_v12 = vsel %vm3533_vm1, %v3520_v13, %v3523_v59 }
 0x3b1   : > { %v3542_v29 = vsel %vm3536_vm8, %v3529_v58, 920167782  ;;  %v3517_v52 = vshrl.u32 %v8608_v57, %v3516_v21  ;;  %vm3534_vm14 = vcmp.lt.s32.totalorder %v3514_v42, 2  ;;  %v3545_v30 = vsel %vm3533_vm1, %v3523_v59, %v3526_v14 }
 0x3b2   : > { %v4349_v50 = vmin.u32 %v3671_v11, %v8054_v31  ;;  %v3543_v22 = vsel %vm3535_vm12, %v3526_v14, %v3542_v29  ;;  %v3546_v49 = vsel %vm3536_vm8, %v3532_v55, 1326507024  ;;  %v2409_v1 = vand.u32 2147483647, %v8057_v45 }
 0x3b3   : > { %v3544_v62 = vsel %vm3534_vm14, %v3541_v12, %v3543_v22  ;;  %vm3388_vm2 = vcmp.lt.s32.totalorder %v8031_v61, 2  ;;  %vm3607_vm15 = vcmp.lt.s32.totalorder %v7877_v39, 0  ;;  %v3537_v32 = vsel %vm3533_vm1, %v3517_v52, %v3520_v13 }
 0x3b4   : > { %v3673_v8 = vclz %v4349_v50  ;;  %v3539_v47 = vsel %vm3535_vm12, %v3523_v59, %v3538_v16  ;;  %v2378_v48 = vadd.f32 %v7924_v40, %v7880_v17  ;;  %vm3385_vm11 = vweird.f32 %v7762_v15 }
 0x3b5   : > { %vm3389_vm13 = vcmp.eq.s32.totalorder %v8031_v61, 0  ;;  %v3547_v33 = vsel %vm3535_vm12, %v3529_v58, %v3546_v49  ;;  %v8079_v23 = vmul.u32.u64.low %v8035_v26, %v3544_v62  ;;  %v8080_v43 = vmul.u32.u64.high %v8035_v26, %v3544_v62, %v8079_v23 }
 0x3b6   : > { %vm3392_vm7 = vcmp.eq.s32.totalorder %v8031_v61, 2  ;;  %v4350_v21 = vadd.s32 4294967294, %v3673_v8  ;;  %v3548_v10 = vsel %vm3534_vm14, %v3545_v30, %v3547_v33  ;;  %v2442_v36 = vmul.f32 30.0, %v2426_v0 }
 0x3b7   : > { %v3540_v17 = vsel %vm3534_vm14, %v3537_v32, %v3539_v47  ;;  %v8087_v18 = vmul.u32.u64.low %v8035_v26, %v3548_v10  ;;  %v8088_v63 = vmul.u32.u64.high %v8035_v26, %v3548_v10, %v8087_v18  ;;  %v2425_v20 = vadd.f32 1.0, %v2409_v1 }
 0x3b8   : > { %v4733_v24 = vpop.eup %4732  ;;  %v3661_v41 = vadd.s32 %v8004_v27, %v8001_v19  ;;  %vm4351_vm9 = vcmp.lt.s32.totalorder %v4350_v21, 0  ;;  %v3691_v34 = vsub.s32 4, %v8038_v35  ;;  %v8094_v46 = vadd.f32 %v4776_v25, %v2378_v48 }
 0x3b9   : > { %v4735_v44 = vpop.eup %4734  ;;  %v3393_v7 = vxor.u32 2147483648, %v4733_v24  ;;  %v3676_v56 = vsel %vm4351_vm9, 0, %v4350_v21  ;;  %v3559_v42 = vadd.s32 1, %v8080_v43  ;;  %v8098_v13 = vmul.f32 %v2442_v36, %v8025_v6 }
 0x3ba   : > { %v3390_v59 = vxor.u32 2147483648, %v4735_v44  ;;  %v3677_v14 = vsub.s32 32, %v3676_v56  ;;  %v3681_v58 = vsub.s32 4294967266, %v3676_v56  ;;  %v3556_v2 = vmul.u32 %v8035_v26, %v3540_v17 }
 0x3bb   : > { %v3394_v19 = vsel %vm3392_vm7, %v3393_v7, %v4735_v44  ;;  %v3678_v27 = vshll.u32 %v8054_v31, %v3676_v56  ;;  %vm3558_vm3 = vc.u32 %v8088_v63, %v8079_v23  ;;  %v2441_v4 = vmul.f32 30.0, %v2425_v20 }
 0x3bc   : > { %v3391_v51 = vsel %vm3389_vm13, %v4733_v24, %v3390_v59  ;;  %v3679_v6 = vshrl.u32 %v3661_v41, %v3677_v14  ;;  %v3682_v0 = vadd.s32 127, %v3681_v58  ;;  %v3560_v11 = vsel %vm3558_vm3, %v3559_v42, %v8080_v43 }
 0x3bd   : > { %v3395_v26 = vsel %vm3388_vm2, %v3391_v51, %v3394_v19  ;;  %v3692_v55 = vsel %vm3607_vm15, %v3691_v34, %v8038_v35  ;;  %v3561_v16 = vadd.s32 %v3560_v11, %v3556_v2  ;;  %v3813_v31 = vand.u32 2147483647, %v8098_v13 }
 0x3be   : > { %v3396_v12 = vsel %vm3385_vm11, nan, %v3395_v26  ;;  %v3680_v29 = vor.u32 %v3679_v6, %v3678_v27  ;;  %v3683_v50 = vshll.u32 %v3682_v0, 23  ;;  %v3816_v52 = vand.u32 2139095040, %v8098_v13 }
 0x3bf   : > { %4133 = vst.msk [vmem:[%s7192_s23 + $0x40] sm:$0xff] %vm255_vm0, %v3396_v12  ;;  %v3562_v22 = vadd.s32 536870912, %v3561_v16  ;;  %v8121_v61 = vmul.f32 %v2441_v4, %v8057_v45  ;;  %vm8125_vm6 = vcmp.le.f32.partialorder %v3605_v53, 0.7853982  ;;  %v3820_v1 = vand.u32 8388607, %v3813_v31 }
 0x3c0   : > { %v3684_v62 = vor.u32 4788187, %v3683_v50  ;;  %v3817_v30 = vshrl.u32 %v3816_v52, 23  ;;  %v3694_v15 = vsel %vm8125_vm6, 0, %v3692_v55  ;;  %v2412_v8 = vand.u32 2147483647, %v8094_v46 }
 0x3c1   : > { %v3563_v49 = vshrl.u32 %v3562_v22, 30  ;;  %v3687_v45 = vcvt.s32.f32 %v3680_v29  ;;  %v3712_v48 = vand.u32 2139095040, %v8121_v61  ;;  %v3698_v43 = vadd.s32 3, %v3694_v15 }
 0x3c2   : > { %v3685_v32 = vand.u32 2147483647, %v3684_v62  ;;  %v4356_v47 = vadd.s32 4294967169, %v3817_v30  ;;  %v2428_v17 = vadd.f32 1.0, %v2412_v8  ;;  %v3821_v24 = vor.u32 8388608, %v3820_v1 }
 0x3c3   : > { %v3564_v53 = vshll.u32 %v3563_v49, 30  ;;  %v3713_v10 = vshrl.u32 %v3712_v48, 23  ;;  %v3587_v20 = vsub.s32 4, %v3563_v49  ;;  %vm3503_vm5 = vcmp.lt.s32.totalorder %v7919_v37, 0 }
 0x3c4   : > { %v3688_v33 = vmul.f32 %v3687_v45, %v3685_v32  ;;  %v3823_v21 = vadd.s32 1, %v4356_v47  ;;  %v8141_v7 = vand.u32 3, %v3698_v43  ;;  %v3557_v56 = vadd.s32 %v8079_v23, %v8088_v63 }
 0x3c5   : > { %v8135_v36 = vsub.s32 %v3561_v16, %v3564_v53  ;;  %v4352_v25 = vadd.s32 4294967169, %v3713_v10  ;;  %v3709_v58 = vand.u32 2147483647, %v8121_v61  ;;  %v8150_v2 = vmul.f32 30.0, %v2428_v17 }
 0x3c6   : > { %v3689_v18 = vxor.u32 2147483648, %v3688_v33  ;;  %vm3824_vm4 = vcmp.gt.s32.totalorder %v3823_v21, 0  ;;  %v8154_v19 = vsel %vm3503_vm5, %v3587_v20, %v3563_v49  ;;  %v8156_v4 = vshll.u32 %v3821_v24, 8 }
 0x3c7   : > { %v3567_v41 = vsub.s32 0, %v8135_v36  ;;  %v3825_v34 = vsel %vm3824_vm4, %v3823_v21, 0  ;;  %v3719_v51 = vadd.s32 1, %v4352_v25  ;;  %vm3704_vm10 = vcmp.eq.s32.totalorder %v8141_v7, 2 }
 0x3c8   : > { %v3690_v44 = vsel %vm3607_vm15, %v3689_v18, %v3688_v33  ;;  %v3827_v42 = vand.u32 31, %v3825_v34  ;;  %v3826_v63 = vshrl.u32 %v3825_v34, 5  ;;  %vm3701_vm1 = vcmp.eq.s32.totalorder %v8141_v7, 0 }
 0x3c9   : > { %v3693_v59 = vsel %vm8125_vm6, %v7877_v39, %v3690_v44  ;;  %v4345_v14 = vmin.u32 %v3567_v41, %v8135_v36  ;;  %vm3700_vm8 = vcmp.lt.s32.totalorder %v8141_v7, 2  ;;  %vm3697_vm15 = vweird.f32 %v7877_v39 }
 0x3ca   : > { %4736 = vcosq.f32 %v3693_v59  ;;  %v3828_v27 = vsub.s32 32, %v3827_v42  ;;  %v3830_v6 = vshll.u32 %v8608_v57, %v3827_v42  ;;  %v3833_v11 = vshll.u32 %v8603_v9, %v3827_v42 }
 0x3cb   : > { %4738 = vsinq.f32 %v3693_v59  ;;  %v3569_v23 = vclz %v4345_v14  ;;  %v3836_v12 = vshll.u32 %v8604_v28, %v3827_v42  ;;  %v3839_v22 = vshll.u32 %v8564_v54, %v3827_v42 }
 0x3cc   : > { %v3831_v0 = vshrl.u32 %v8603_v9, %v3828_v27  ;;  %v3834_v26 = vshrl.u32 %v8604_v28, %v3828_v27  ;;  %v3829_v16 = vshrl.u32 %v8608_v57, %v3828_v27  ;;  %v3837_v29 = vshrl.u32 %v8564_v54, %v3828_v27 }
 0x3cd   : > { %v4346_v55 = vadd.s32 4294967294, %v3569_v23  ;;  %v3840_v35 = vshrl.u32 %v8581_v60, %v3828_v27  ;;  %v3842_v30 = vshll.u32 %v8581_v60, %v3827_v42  ;;  %v3843_v15 = vshrl.u32 %v8573_v38, %v3828_v27 }
 0x3ce   : > { %v3832_v50 = vor.u32 %v3831_v0, %v3830_v6  ;;  %v3835_v52 = vor.u32 %v3834_v26, %v3833_v11  ;;  %v3838_v62 = vor.u32 %v3837_v29, %v3836_v12  ;;  %vm3845_vm14 = vcmp.lt.s32.totalorder %v3826_v63, 1 }
 0x3cf   : > { %vm4347_vm12 = vcmp.lt.s32.totalorder %v4346_v55, 0  ;;  %v3841_v1 = vor.u32 %v3840_v35, %v3839_v22  ;;  %vm3846_vm2 = vcmp.lt.s32.totalorder %v3826_v63, 2  ;;  %v3844_v45 = vor.u32 %v3843_v15, %v3842_v30 }
 0x3d0   : > { %v3572_v49 = vsel %vm4347_vm12, 0, %v4346_v55  ;;  %vm3847_vm11 = vcmp.lt.s32.totalorder %v3826_v63, 3  ;;  %vm3848_vm13 = vcmp.lt.s32.totalorder %v3826_v63, 4  ;;  %v3849_v48 = vsel %vm3845_vm14, %v3829_v16, %v3832_v50 }
 0x3d1   : > { %v3573_v8 = vsub.s32 32, %v3572_v49  ;;  %v3577_v32 = vsub.s32 4294967266, %v3572_v49  ;;  %v3574_v47 = vshll.u32 %v8135_v36, %v3572_v49  ;;  %v3853_v53 = vsel %vm3845_vm14, %v3832_v50, %v3835_v52 }
 0x3d2   : > { %v3850_v21 = vsel %vm3848_vm13, %v3838_v62, 2102212464  ;;  %v3854_v10 = vsel %vm3848_vm13, %v3841_v1, 920167782  ;;  %v3857_v24 = vsel %vm3845_vm14, %v3835_v52, %v3838_v62  ;;  %v3858_v41 = vsel %vm3848_vm13, %v3844_v45, 1326507024 }
 0x3d3   : > { %v3575_v33 = vshrl.u32 %v3557_v56, %v3573_v8  ;;  %v3578_v43 = vadd.s32 127, %v3577_v32  ;;  %v3851_v18 = vsel %vm3847_vm11, %v3835_v52, %v3850_v21  ;;  %v3855_v20 = vsel %vm3847_vm11, %v3838_v62, %v3854_v10 }
 0x3d4   : > { %v4737_v17 = vpop.eup %4736  ;;  %vm3720_vm7 = vcmp.gt.s32.totalorder %v3719_v51, 0  ;;  %v3852_v59 = vsel %vm3846_vm2, %v3849_v48, %v3851_v18  ;;  %v3856_v56 = vsel %vm3846_vm2, %v3853_v53, %v3855_v20  ;;  %v3859_v14 = vsel %vm3847_vm11, %v3841_v1, %v3858_v41 }
 0x3d5   : > { %v4739_v34 = vpop.eup %4738  ;;  %v3705_v25 = vxor.u32 2147483648, %v4737_v17  ;;  %v3576_v36 = vor.u32 %v3575_v33, %v3574_v47  ;;  %v3579_v44 = vshll.u32 %v3578_v43, 23  ;;  %v3860_v0 = vsel %vm3846_vm2, %v3857_v24, %v3859_v14 }
 0x3d6   : > { %v3702_v42 = vxor.u32 2147483648, %v4739_v34  ;;  %v8188_v26 = vmul.u32.u64.low %v8156_v4, %v3860_v0  ;;  %v8189_v55 = vmul.u32.u64.high %v8156_v4, %v3860_v0, %v8188_v26  ;;  %v3721_v16 = vsel %vm3720_vm7, %v3719_v51, 0 }
 0x3d7   : > { %v3706_v27 = vsel %vm3704_vm10, %v3705_v25, %v4739_v34  ;;  %v3580_v23 = vor.u32 4788187, %v3579_v44  ;;  %v3583_v6 = vcvt.s32.f32 %v3576_v36  ;;  %vm8202_vm9 = vcmp.le.f32.partialorder %v3501_v3, 0.7853982 }
 0x3d8   : > { %v3703_v11 = vsel %vm3701_vm1, %v4737_v17, %v3702_v42  ;;  %v8194_v50 = vmul.u32.u64.low %v8156_v4, %v3856_v56  ;;  %v8195_v52 = vmul.u32.u64.high %v8156_v4, %v3856_v56, %v8194_v50  ;;  %v3723_v35 = vand.u32 31, %v3721_v16 }
 0x3d9   : > { %v3707_v12 = vsel %vm3700_vm8, %v3703_v11, %v3706_v27  ;;  %v3581_v29 = vand.u32 2147483647, %v3580_v23  ;;  %v3590_v51 = vsel %vm8202_vm9, 0, %v8154_v19  ;;  %v3716_v62 = vand.u32 8388607, %v3709_v58 }
 0x3da   : > { %v3708_v63 = vsel %vm3697_vm15, nan, %v3707_v12  ;;  %v8215_v39 = vmul.f32 %v8150_v2, %v8094_v46  ;;  %v3868_v3 = vmul.u32 %v8156_v4, %v3852_v59  ;;  %vm3870_vm3 = vc.u32 %v8189_v55, %v8194_v50 }
 0x3db   : > { %4136 = vst.msk [vmem:[%s7192_s23 + $0x58] sm:$0xff] %vm255_vm0, %v3708_v63  ;;  %v3584_v7 = vmul.f32 %v3583_v6, %v3581_v29  ;;  %v8220_v30 = vshrl.u32 %v3721_v16, 5  ;;  %v3724_v15 = vsub.s32 32, %v3723_v35  ;;  %v3871_v1 = vadd.s32 1, %v8195_v52 }
 0x3dc   : > { %v3726_v19 = vshll.u32 %v8608_v57, %v3723_v35  ;;  %v3729_v8 = vshll.u32 %v8603_v9, %v3723_v35  ;;  %v3732_v2 = vshll.u32 %v8604_v28, %v3723_v35  ;;  %v3735_v48 = vshll.u32 %v8564_v54, %v3723_v35 }
 0x3dd   : > { %v3585_v49 = vxor.u32 2147483648, %v3584_v7  ;;  %v3727_v32 = vshrl.u32 %v8603_v9, %v3724_v15  ;;  %v3730_v46 = vshrl.u32 %v8604_v28, %v3724_v15  ;;  %v3733_v4 = vshrl.u32 %v8564_v54, %v3724_v15 }
 0x3de   : > { %v3872_v47 = vsel %vm3870_vm3, %v3871_v1, %v8195_v52  ;;  %v3736_v53 = vshrl.u32 %v8581_v60, %v3724_v15  ;;  %v2373_v20 = vadd.f32 %v7924_v40, %v7886_v5  ;;  %v3738_v41 = vshll.u32 %v8581_v60, %v3723_v35 }
 0x3df   : > { %v3586_v45 = vsel %vm3503_vm5, %v3585_v49, %v3584_v7  ;;  %v3873_v43 = vadd.s32 %v3872_v47, %v3868_v3  ;;  %v3728_v21 = vor.u32 %v3727_v32, %v3726_v19  ;;  %v3731_v10 = vor.u32 %v3730_v46, %v3729_v8 }
 0x3e0   : > { %v3589_v33 = vsel %vm8202_vm9, %v7919_v37, %v3586_v45  ;;  %v3734_v17 = vor.u32 %v3733_v4, %v3732_v2  ;;  %v3737_v18 = vor.u32 %v3736_v53, %v3735_v48  ;;  %v3739_v34 = vshrl.u32 %v8573_v38, %v3724_v15  ;;  %v4777_v2 = vld [vmem:[%s4850_s7 + $0x70] sm:$0xff] }
 0x3e1   : > { %4740 = vcosq.f32 %v3589_v33  ;;  %v3874_v24 = vadd.s32 536870912, %v3873_v43  ;;  %v3594_v25 = vadd.s32 3, %v3590_v51  ;;  %v3717_v36 = vor.u32 8388608, %v3716_v62 }
 0x3e2   : > { %4742 = vsinq.f32 %v3589_v33  ;;  %vm3741_vm6 = vcmp.lt.s32.totalorder %v8220_v30, 1  ;;  %v4024_v44 = vand.u32 2139095040, %v8215_v39  ;;  %v3740_v59 = vor.u32 %v3739_v34, %v3738_v41 }
 0x3e3   : > { %v8243_v42 = vshrl.u32 %v3874_v24, 30  ;;  %vm3744_vm4 = vcmp.lt.s32.totalorder %v8220_v30, 4  ;;  %v3749_v5 = vsel %vm3741_vm6, %v3728_v21, %v3731_v10  ;;  %v3725_v40 = vshrl.u32 %v8608_v57, %v3724_v15 }
 0x3e4   : > { %vm3742_vm5 = vcmp.lt.s32.totalorder %v8220_v30, 2  ;;  %vm3743_vm10 = vcmp.lt.s32.totalorder %v8220_v30, 3  ;;  %v3750_v56 = vsel %vm3744_vm4, %v3737_v18, 920167782  ;;  %v3746_v27 = vsel %vm3744_vm4, %v3734_v17, 2102212464 }
 0x3e5   : > { %v3876_v14 = vshll.u32 %v8243_v42, 30  ;;  %v3751_v23 = vsel %vm3743_vm10, %v3734_v17, %v3750_v56  ;;  %v3753_v6 = vsel %vm3741_vm6, %v3731_v10, %v3734_v17  ;;  %v3754_v11 = vsel %vm3744_vm4, %v3740_v59, 1326507024 }
 0x3e6   : > { %v3752_v0 = vsel %vm3742_vm5, %v3749_v5, %v3751_v23  ;;  %v3757_v26 = vshll.u32 %v3717_v36, 8  ;;  %v4025_v16 = vshrl.u32 %v4024_v44, 23  ;;  %v3595_v12 = vand.u32 3, %v3594_v25 }
 0x3e7   : > { %v8256_v29 = vsub.s32 %v3873_v43, %v3876_v14  ;;  %v3745_v52 = vsel %vm3741_vm6, %v3725_v40, %v3728_v21  ;;  %v3755_v63 = vsel %vm3743_vm10, %v3737_v18, %v3754_v11  ;;  %v3747_v22 = vsel %vm3743_vm10, %v3731_v10, %v3746_v27 }
 0x3e8   : > { %v3756_v35 = vsel %vm3742_vm5, %v3753_v6, %v3755_v63  ;;  %v8262_v7 = vmul.u32.u64.low %v3757_v26, %v3752_v0  ;;  %v8263_v51 = vmul.u32.u64.high %v3757_v26, %v3752_v0, %v8262_v7  ;;  %vm3593_vm1 = vweird.f32 %v7919_v37 }
 0x3e9   : > { %v3879_v62 = vsub.s32 0, %v8256_v29  ;;  %v8267_v3 = vmul.u32.u64.low %v3757_v26, %v3756_v35  ;;  %v8268_v15 = vmul.u32.u64.high %v3757_v26, %v3756_v35, %v8267_v3  ;;  %v4364_v1 = vadd.s32 4294967169, %v4025_v16 }
 0x3ea   : > { %v3748_v46 = vsel %vm3742_vm5, %v3745_v52, %v3747_v22  ;;  %v8275_v4 = vadd.f32 %v4777_v2, %v2373_v20  ;;  %vm3600_vm12 = vcmp.eq.s32.totalorder %v3595_v12, 2  ;;  %v3767_v47 = vadd.s32 1, %v8263_v51 }
 0x3eb   : > { %v4741_v49 = vpop.eup %4740  ;;  %v4357_v32 = vmin.u32 %v3879_v62, %v8256_v29  ;;  %v4031_v48 = vadd.s32 1, %v4364_v1  ;;  %vm3596_vm8 = vcmp.lt.s32.totalorder %v3595_v12, 2  ;;  %vm3597_vm14 = vcmp.eq.s32.totalorder %v3595_v12, 0 }
 0x3ec   : > { %v4743_v19 = vpop.eup %4742  ;;  %v3601_v8 = vxor.u32 2147483648, %v4741_v49  ;;  %v3764_v21 = vmul.u32 %v3757_v26, %v3748_v46  ;;  %vm3766_vm2 = vc.u32 %v8268_v15, %v8262_v7  ;;  %v4021_v30 = vand.u32 2147483647, %v8215_v39 }
 0x3ed   : > { %v3598_v45 = vxor.u32 2147483648, %v4743_v19  ;;  %v3881_v33 = vclz %v4357_v32  ;;  %v3768_v18 = vsel %vm3766_vm2, %v3767_v47, %v8263_v51  ;;  %vm4032_vm15 = vcmp.gt.s32.totalorder %v4031_v48, 0 }
 0x3ee   : > { %v3602_v53 = vsel %vm3600_vm12, %v3601_v8, %v4743_v19  ;;  %v3899_v24 = vsub.s32 4, %v8243_v42  ;;  %v3769_v41 = vadd.s32 %v3768_v18, %v3764_v21  ;;  %v4033_v34 = vsel %vm4032_vm15, %v4031_v48, 0 }
 0x3ef   : > { %v3599_v43 = vsel %vm3597_vm14, %v4741_v49, %v3598_v45  ;;  %v4358_v17 = vadd.s32 4294967294, %v3881_v33  ;;  %vm3815_vm11 = vcmp.lt.s32.totalorder %v8098_v13, 0  ;;  %v4035_v25 = vand.u32 31, %v4033_v34 }
 0x3f0   : > { %v3603_v10 = vsel %vm3596_vm8, %v3599_v43, %v3602_v53  ;;  %v3770_v44 = vadd.s32 536870912, %v3769_v41  ;;  %v4028_v59 = vand.u32 8388607, %v4021_v30  ;;  %v2411_v5 = vand.u32 2147483647, %v8275_v4 }
 0x3f1   : > { %v3604_v20 = vsel %vm3593_vm1, nan, %v3603_v10  ;;  %vm4359_vm13 = vcmp.lt.s32.totalorder %v4358_v17, 0  ;;  %v3869_v37 = vadd.s32 %v8194_v50, %v8189_v55  ;;  %v4036_v14 = vsub.s32 32, %v4035_v25 }
 0x3f2   : > { %4135 = vst.msk [vmem:[%s7192_s23 + $0x50] sm:$0xff] %vm255_vm0, %v3604_v20  ;;  %v3884_v36 = vsel %vm4359_vm13, 0, %v4358_v17  ;;  %vm8295_vm7 = vcmp.le.f32.partialorder %v3813_v31, 0.7853982  ;;  %v8302_v23 = vsel %vm3815_vm11, %v3899_v24, %v8243_v42  ;;  %v8304_v6 = vshrl.u32 %v3770_v44, 30 }
 0x3f3   : > { %v3885_v40 = vsub.s32 32, %v3884_v36  ;;  %v3889_v56 = vsub.s32 4294967266, %v3884_v36  ;;  %v3886_v0 = vshll.u32 %v8256_v29, %v3884_v36  ;;  %v4039_v50 = vshrl.u32 %v8603_v9, %v4036_v14 }
 0x3f4   : > { %v3772_v26 = vshll.u32 %v8304_v6, 30  ;;  %v4029_v16 = vor.u32 8388608, %v4028_v59  ;;  %v4042_v31 = vshrl.u32 %v8604_v28, %v4036_v14  ;;  %v2427_v12 = vadd.f32 1.0, %v2411_v5 }
 0x3f5   : > { %v3887_v11 = vshrl.u32 %v3869_v37, %v3885_v40  ;;  %v3890_v55 = vadd.s32 127, %v3889_v56  ;;  %v4038_v22 = vshll.u32 %v8608_v57, %v4035_v25  ;;  %v4045_v42 = vshrl.u32 %v8564_v54, %v4036_v14 }
 0x3f6   : > { %v3773_v35 = vsub.s32 %v3769_v41, %v3772_v26  ;;  %v4034_v51 = vshrl.u32 %v4033_v34, 5  ;;  %v4041_v29 = vshll.u32 %v8603_v9, %v4035_v25  ;;  %v4044_v62 = vshll.u32 %v8604_v28, %v4035_v25 }
 0x3f7   : > { %v3888_v52 = vor.u32 %v3887_v11, %v3886_v0  ;;  %v3891_v63 = vshll.u32 %v3890_v55, 23  ;;  %v4040_v49 = vor.u32 %v4039_v50, %v4038_v22  ;;  %v4047_v1 = vshll.u32 %v8564_v54, %v4035_v25 }
 0x3f8   : > { %v4048_v19 = vshrl.u32 %v8581_v60, %v4036_v14  ;;  %v3775_v8 = vsub.s32 0, %v3773_v35  ;;  %v4043_v32 = vor.u32 %v4042_v31, %v4041_v29  ;;  %v4050_v46 = vshll.u32 %v8581_v60, %v4035_v25 }
 0x3f9   : > { %v3892_v3 = vor.u32 4788187, %v3891_v63  ;;  %v4051_v2 = vshrl.u32 %v8573_v38, %v4036_v14  ;;  %v3895_v47 = vcvt.s32.f32 %v3888_v52  ;;  %v4046_v48 = vor.u32 %v4045_v42, %v4044_v62 }
 0x3fa   : > { %v4049_v53 = vor.u32 %v4048_v19, %v4047_v1  ;;  %v3902_v33 = vsel %vm8295_vm7, 0, %v8302_v23  ;;  %v4353_v43 = vmin.u32 %v3775_v8, %v3773_v35  ;;  %v4069_v10 = vshll.u32 %v4029_v16, 8 }
 0x3fb   : > { %v3893_v45 = vand.u32 2147483647, %v3892_v3  ;;  %v4052_v21 = vor.u32 %v4051_v2, %v4050_v46  ;;  %v3765_v18 = vadd.s32 %v8262_v7, %v8268_v15  ;;  %v4037_v20 = vshrl.u32 %v8608_v57, %v4036_v14 }
 0x3fc   : > { %v2443_v24 = vmul.f32 30.0, %v2427_v12  ;;  %v3777_v41 = vclz %v4353_v43  ;;  %vm4053_vm9 = vcmp.lt.s32.totalorder %v4034_v51, 1  ;;  %vm4055_vm3 = vcmp.lt.s32.totalorder %v4034_v51, 3 }
 0x3fd   : > { %v3896_v17 = vmul.f32 %v3895_v47, %v3893_v45  ;;  %vm4056_vm6 = vcmp.lt.s32.totalorder %v4034_v51, 4  ;;  %v4061_v25 = vsel %vm4053_vm9, %v4040_v49, %v4043_v32  ;;  %v4065_v44 = vsel %vm4053_vm9, %v4043_v32, %v4046_v48 }
 0x3fe   : > { %v4062_v36 = vsel %vm4056_vm6, %v4049_v53, 920167782  ;;  %v4354_v59 = vadd.s32 4294967294, %v3777_v41  ;;  %vm4054_vm4 = vcmp.lt.s32.totalorder %v4034_v51, 2  ;;  %v4066_v37 = vsel %vm4056_vm6, %v4052_v21, 1326507024 }
 0x3ff   : > { %v3897_v34 = vxor.u32 2147483648, %v3896_v17  ;;  %v4063_v5 = vsel %vm4055_vm3, %v4046_v48, %v4062_v36  ;;  %v4057_v7 = vsel %vm4053_vm9, %v4037_v20, %v4040_v49  ;;  %v4058_v15 = vsel %vm4056_vm6, %v4046_v48, 2102212464 }
 0x400   : > { %v4067_v56 = vsel %vm4055_vm3, %v4049_v53, %v4066_v37  ;;  %vm4355_vm5 = vcmp.lt.s32.totalorder %v4354_v59, 0  ;;  %v4064_v23 = vsel %vm4054_vm4, %v4061_v25, %v4063_v5  ;;  %v4059_v31 = vsel %vm4055_vm3, %v4043_v32, %v4058_v15 }
 0x401   : > { %v3898_v40 = vsel %vm3815_vm11, %v3897_v34, %v3896_v17  ;;  %v4068_v0 = vsel %vm4054_vm4, %v4065_v44, %v4067_v56  ;;  %v3780_v11 = vsel %vm4355_vm5, 0, %v4354_v59  ;;  %v8342_v27 = vmul.f32 %v2443_v24, %v8275_v4 }
 0x402   : > { %v3901_v14 = vsel %vm8295_vm7, %v8098_v13, %v3898_v40  ;;  %v8333_v55 = vmul.u32.u64.low %v4069_v10, %v4068_v0  ;;  %v8334_v50 = vmul.u32.u64.high %v4069_v10, %v4068_v0, %v8333_v55  ;;  %v3781_v26 = vsub.s32 32, %v3780_v11 }
 0x403   : > { %4744 = vcosq.f32 %v3901_v14  ;;  %v3785_v16 = vsub.s32 4294967266, %v3780_v11  ;;  %v8337_v12 = vmul.u32.u64.low %v4069_v10, %v4064_v23  ;;  %v8338_v52 = vmul.u32.u64.high %v4069_v10, %v4064_v23, %v8337_v12 }
 0x404   : > { %4746 = vsinq.f32 %v3901_v14  ;;  %v3782_v63 = vshll.u32 %v3773_v35, %v3780_v11  ;;  %v3783_v22 = vshrl.u32 %v3765_v18, %v3781_v26  ;;  %v3795_v29 = vsub.s32 4, %v8304_v6 }
 0x405   : > { %v3786_v42 = vadd.s32 127, %v3785_v16  ;;  %v3906_v62 = vadd.s32 3, %v3902_v33  ;;  %v4060_v3 = vsel %vm4054_vm4, %v4057_v7, %v4059_v31  ;;  %vm4078_vm10 = vc.u32 %v8334_v50, %v8337_v12 }
 0x406   : > { %v3784_v49 = vor.u32 %v3783_v22, %v3782_v63  ;;  %v3920_v19 = vand.u32 2139095040, %v8342_v27  ;;  %vm3711_vm1 = vcmp.lt.s32.totalorder %v8121_v61, 0  ;;  %v4079_v4 = vadd.s32 1, %v8338_v52 }
 0x407   : > { %v3787_v1 = vshll.u32 %v3786_v42, 23  ;;  %v3796_v35 = vsel %vm3711_vm1, %v3795_v29, %v8304_v6  ;;  %v4076_v32 = vmul.u32 %v4069_v10, %v4060_v3  ;;  %v3907_v51 = vand.u32 3, %v3906_v62 }
 0x408   : > { %v3921_v46 = vshrl.u32 %v3920_v19, 23  ;;  %vm8356_vm12 = vcmp.le.f32.partialorder %v3709_v58, 0.7853982  ;;  %v4080_v45 = vsel %vm4078_vm10, %v4079_v4, %v8338_v52  ;;  %v3791_v48 = vcvt.s32.f32 %v3784_v49 }
 0x409   : > { %v3788_v8 = vor.u32 4788187, %v3787_v1  ;;  %v4081_v53 = vadd.s32 %v4080_v45, %v4076_v32  ;;  %v3798_v21 = vsel %vm8356_vm12, 0, %v3796_v35  ;;  %v3917_v6 = vand.u32 2147483647, %v8342_v27 }
 0x40a   : > { %v4360_v33 = vadd.s32 4294967169, %v3921_v46  ;;  %vm3905_vm8 = vweird.f32 %v8098_v13  ;;  %vm3909_vm14 = vcmp.eq.s32.totalorder %v3907_v51, 0  ;;  %vm3912_vm2 = vcmp.eq.s32.totalorder %v3907_v51, 2 }
 0x40b   : > { %v3789_v47 = vand.u32 2147483647, %v3788_v8  ;;  %v4082_v20 = vadd.s32 536870912, %v4081_v53  ;;  %vm3908_vm11 = vcmp.lt.s32.totalorder %v3907_v51, 2  ;;  %v3802_v44 = vadd.s32 3, %v3798_v21 }
 0x40c   : > { %v3927_v58 = vadd.s32 1, %v4360_v33  ;;  %v3924_v7 = vand.u32 8388607, %v3917_v6  ;;  %vm3801_vm3 = vweird.f32 %v8121_v61 }
 0x40d   : > { %v4745_v43 = vpop.eup %4744  ;;  %v3792_v18 = vmul.f32 %v3791_v48, %v3789_v47  ;;  %v8365_v25 = vshrl.u32 %v4082_v20, 30  ;;  %v3803_v0 = vand.u32 3, %v3802_v44 }
 0x40e   : > { %v4747_v10 = vpop.eup %4746  ;;  %v3913_v17 = vxor.u32 2147483648, %v4745_v43  ;;  %vm3928_vm15 = vcmp.gt.s32.totalorder %v3927_v58, 0  ;;  %v3925_v26 = vor.u32 8388608, %v3924_v7 }
 0x40f   : > { %v3910_v24 = vxor.u32 2147483648, %v4747_v10  ;;  %v3793_v34 = vxor.u32 2147483648, %v3792_v18  ;;  %v3929_v59 = vsel %vm3928_vm15, %v3927_v58, 0  ;;  %v4084_v40 = vshll.u32 %v8365_v25, 30 }
 0x410   : > { %v3914_v41 = vsel %vm3912_vm2, %v3913_v17, %v4747_v10  ;;  %v3931_v14 = vand.u32 31, %v3929_v59  ;;  %v3930_v42 = vshrl.u32 %v3929_v59, 5  ;;  %vm3805_vm13 = vcmp.eq.s32.totalorder %v3803_v0, 0 }
 0x411   : > { %v3911_v36 = vsel %vm3909_vm14, %v4745_v43, %v3910_v24  ;;  %v3794_v37 = vsel %vm3711_vm1, %v3793_v34, %v3792_v18  ;;  %v8379_v23 = vsub.s32 %v4081_v53, %v4084_v40  ;;  %vm3804_vm7 = vcmp.lt.s32.totalorder %v3803_v0, 2 }
 0x412   : > { %v3915_v5 = vsel %vm3908_vm11, %v3911_v36, %v3914_v41  ;;  %v3797_v56 = vsel %vm8356_vm12, %v8121_v61, %v3794_v37  ;;  %v3932_v11 = vsub.s32 32, %v3931_v14  ;;  %v3934_v16 = vshll.u32 %v8608_v57, %v3931_v14 }
 0x413   : > { %v3916_v15 = vsel %vm3905_vm8, nan, %v3915_v5  ;;  %4748 = vcosq.f32 %v3797_v56  ;;  %v4087_v55 = vsub.s32 0, %v8379_v23  ;;  %v3937_v31 = vshll.u32 %v8603_v9, %v3931_v14 }
 0x414   : > { %4138 = vst.msk [vmem:[%s7192_s23 + $0x68] sm:$0xff] %vm255_vm0, %v3916_v15  ;;  %4750 = vsinq.f32 %v3797_v56  ;;  %v3935_v13 = vshrl.u32 %v8603_v9, %v3932_v11  ;;  %v3938_v52 = vshrl.u32 %v8604_v28, %v3932_v11  ;;  %v3941_v63 = vshrl.u32 %v8564_v54, %v3932_v11 }
 0x415   : > { %v4365_v22 = vmin.u32 %v4087_v55, %v8379_v23  ;;  %v3940_v29 = vshll.u32 %v8604_v28, %v3931_v14  ;;  %v3944_v62 = vshrl.u32 %v8581_v60, %v3932_v11  ;;  %v3943_v1 = vshll.u32 %v8564_v54, %v3931_v14 }
 0x416   : > { %v3936_v3 = vor.u32 %v3935_v13, %v3934_v16  ;;  %v3939_v49 = vor.u32 %v3938_v52, %v3937_v31  ;;  %vm3808_vm9 = vcmp.eq.s32.totalorder %v3803_v0, 2  ;;  %v4077_v9 = vadd.s32 %v8337_v12, %v8334_v50 }
 0x417   : > { %v4089_v19 = vclz %v4365_v22  ;;  %v3942_v4 = vor.u32 %v3941_v63, %v3940_v29  ;;  %v3945_v8 = vor.u32 %v3944_v62, %v3943_v1  ;;  %v3946_v35 = vshll.u32 %v8581_v60, %v3931_v14 }
 0x418   : > { %v3947_v28 = vshrl.u32 %v8573_v38, %v3932_v11  ;;  %v3965_v32 = vshll.u32 %v3925_v26, 8  ;;  %v3933_v51 = vshrl.u32 %v8608_v57, %v3932_v11  ;;  %vm3949_vm6 = vcmp.lt.s32.totalorder %v3930_v42, 1 }
 0x419   : > { %v4366_v46 = vadd.s32 4294967294, %v4089_v19  ;;  %vm3952_vm4 = vcmp.lt.s32.totalorder %v3930_v42, 4  ;;  %vm3951_vm5 = vcmp.lt.s32.totalorder %v3930_v42, 3  ;;  %v3957_v2 = vsel %vm3949_vm6, %v3936_v3, %v3939_v49 }
 0x41a   : > { %v3948_v54 = vor.u32 %v3947_v28, %v3946_v35  ;;  %v3958_v50 = vsel %vm3952_vm4, %v3945_v8, 920167782  ;;  %vm3950_vm1 = vcmp.lt.s32.totalorder %v3930_v42, 2  ;;  %v3954_v45 = vsel %vm3952_vm4, %v3942_v4, 2102212464 }
 0x41b   : > { %vm4367_vm10 = vcmp.lt.s32.totalorder %v4366_v46, 0  ;;  %v3959_v60 = vsel %vm3951_vm5, %v3942_v4, %v3958_v50  ;;  %v3961_v53 = vsel %vm3949_vm6, %v3939_v49, %v3942_v4  ;;  %v3953_v59 = vsel %vm3949_vm6, %v3933_v51, %v3936_v3 }
 0x41c   : > { %v4092_v48 = vsel %vm4367_vm10, 0, %v4366_v46  ;;  %v3960_v57 = vsel %vm3950_vm1, %v3957_v2, %v3959_v60  ;;  %v3962_v18 = vsel %vm3952_vm4, %v3948_v54, 1326507024  ;;  %v3955_v5 = vsel %vm3951_vm5, %v3939_v49, %v3954_v45 }
 0x41d   : > { %v4749_v12 = vpop.eup %4748  ;;  %v4093_v43 = vsub.s32 32, %v4092_v48  ;;  %v4094_v21 = vshll.u32 %v8379_v23, %v4092_v48  ;;  %v4097_v10 = vsub.s32 4294967266, %v4092_v48  ;;  %v3963_v36 = vsel %vm3951_vm5, %v3945_v8, %v3962_v18 }
 0x41e   : > { %v4751_v38 = vpop.eup %4750  ;;  %v3809_v47 = vxor.u32 2147483648, %v4749_v12  ;;  %v8406_v20 = vmul.u32.u64.low %v3965_v32, %v3960_v57  ;;  %v8407_v58 = vmul.u32.u64.high %v3965_v32, %v3960_v57, %v8406_v20  ;;  %v3964_v37 = vsel %vm3950_vm1, %v3961_v53, %v3963_v36 }
 0x41f   : > { %v3806_v33 = vxor.u32 2147483648, %v4751_v38  ;;  %v4095_v41 = vshrl.u32 %v4077_v9, %v4093_v43  ;;  %v4098_v34 = vadd.s32 127, %v4097_v10  ;;  %v3956_v0 = vsel %vm3950_vm1, %v3953_v59, %v3955_v5 }
 0x420   : > { %v3810_v17 = vsel %vm3808_vm9, %v3809_v47, %v4751_v38  ;;  %v8419_v56 = vmul.u32.u64.low %v3965_v32, %v3964_v37  ;;  %v8420_v14 = vmul.u32.u64.high %v3965_v32, %v3964_v37, %v8419_v56  ;;  %v3975_v11 = vadd.s32 1, %v8407_v58 }
 0x421   : > { %v3807_v24 = vsel %vm3805_vm13, %v4749_v12, %v3806_v33  ;;  %v4096_v7 = vor.u32 %v4095_v41, %v4094_v21  ;;  %v4099_v15 = vshll.u32 %v4098_v34, 23  ;;  %v3972_v16 = vmul.u32 %v3965_v32, %v3956_v0 }
 0x422   : > { %v3811_v44 = vsel %vm3804_vm7, %v3807_v24, %v3810_v17  ;;  %vm3974_vm12 = vc.u32 %v8420_v14, %v8406_v20  ;;  %v4107_v61 = vsub.s32 4, %v8365_v25  ;;  %vm4023_vm8 = vcmp.lt.s32.totalorder %v8215_v39, 0 }
 0x423   : > { %v3812_v40 = vsel %vm3801_vm3, nan, %v3811_v44  ;;  %v4100_v23 = vor.u32 4788187, %v4099_v15  ;;  %v4103_v26 = vcvt.s32.f32 %v4096_v7  ;;  %v3976_v31 = vsel %vm3974_vm12, %v3975_v11, %v8407_v58 }
 0x424   : > { %4137 = vst.msk [vmem:[%s7192_s23 + $0x60] sm:$0xff] %vm255_vm0, %v3812_v40  ;;  %v3977_v52 = vadd.s32 %v3976_v31, %v3972_v16  ;;  %vm4022_vm14 = vcmp.le.f32.partialorder %v4021_v30, 0.7853982  ;;  %v4108_v29 = vsel %vm4023_vm8, %v4107_v61, %v8365_v25  ;;  %vm4113_vm13 = vweird.f32 %v8215_v39 }
 0x425   : > { %v4101_v55 = vand.u32 2147483647, %v4100_v23  ;;  %v4110_v49 = vsel %vm4022_vm14, 0, %v4108_v29  ;;  %v3973_v45 = vadd.s32 %v8406_v20, %v8420_v14  ;;  %vm3919_vm9 = vcmp.lt.s32.totalorder %v8342_v27, 0 }
 0x426   : > { %v3978_v22 = vadd.s32 536870912, %v3977_v52  ;;  %v4114_v19 = vadd.s32 3, %v4110_v49  ;;  %vm3918_vm3 = vcmp.le.f32.partialorder %v3917_v6, 0.7853982  ;;  %vm4009_vm10 = vweird.f32 %v8342_v27 }
 0x427   : > { %v4104_v13 = vmul.f32 %v4103_v26, %v4101_v55 }
 0x428   : > { %v3979_v3 = vshrl.u32 %v3978_v22, 30  ;;  %v4115_v35 = vand.u32 3, %v4114_v19 }
 0x429   : > { %v4105_v63 = vxor.u32 2147483648, %v4104_v13 }
 0x42a   : > { %v3980_v1 = vshll.u32 %v3979_v3, 30  ;;  %vm4120_vm2 = vcmp.eq.s32.totalorder %v4115_v35, 2  ;;  %vm4117_vm15 = vcmp.eq.s32.totalorder %v4115_v35, 0  ;;  %vm4116_vm7 = vcmp.lt.s32.totalorder %v4115_v35, 2 }
 0x42b   : > { %v4106_v42 = vsel %vm4023_vm8, %v4105_v63, %v4104_v13  ;;  %v4003_v18 = vsub.s32 4, %v3979_v3 }
 0x42c   : > { %v4109_v62 = vsel %vm4022_vm14, %v8215_v39, %v4106_v42  ;;  %v3981_v9 = vsub.s32 %v3977_v52, %v3980_v1 }
 0x42d   : > { %4752 = vcosq.f32 %v4109_v62  ;;  %v4004_v24 = vsel %vm3919_vm9, %v4003_v18, %v3979_v3 }
 0x42e   : > { %4754 = vsinq.f32 %v4109_v62  ;;  %v3983_v4 = vsub.s32 0, %v3981_v9  ;;  %v4006_v34 = vsel %vm3918_vm3, 0, %v4004_v24 }
 0x42f   : > { %v4010_v36 = vadd.s32 3, %v4006_v34 }
 0x430   : > { %v4361_v8 = vmin.u32 %v3983_v4, %v3981_v9 }
 0x431   : > { %v4011_v44 = vand.u32 3, %v4010_v36 }
 0x432   : > { %v3985_v28 = vclz %v4361_v8 }
 0x433   : > { %vm4016_vm6 = vcmp.eq.s32.totalorder %v4011_v44, 2  ;;  %vm4013_vm4 = vcmp.eq.s32.totalorder %v4011_v44, 0  ;;  %vm4012_vm5 = vcmp.lt.s32.totalorder %v4011_v44, 2 }
 0x434   : > { %v4362_v30 = vadd.s32 4294967294, %v3985_v28 }
 0x436   : > { %vm4363_vm11 = vcmp.lt.s32.totalorder %v4362_v30, 0 }
 0x437   : > { %v4753_v32 = vpop.eup %4752  ;;  %v3988_v50 = vsel %vm4363_vm11, 0, %v4362_v30 }
 0x438   : > { %v4755_v46 = vpop.eup %4754  ;;  %v4121_v51 = vxor.u32 2147483648, %v4753_v32  ;;  %v3989_v60 = vsub.s32 32, %v3988_v50  ;;  %v3993_v38 = vsub.s32 4294967266, %v3988_v50  ;;  %v3990_v48 = vshll.u32 %v3981_v9, %v3988_v50 }
 0x439   : > { %v4118_v54 = vxor.u32 2147483648, %v4755_v46 }
 0x43a   : > { %v4122_v25 = vsel %vm4120_vm2, %v4121_v51, %v4755_v46  ;;  %v3991_v57 = vshrl.u32 %v3973_v45, %v3989_v60  ;;  %v3994_v53 = vadd.s32 127, %v3993_v38 }
 0x43b   : > { %v4119_v2 = vsel %vm4117_vm15, %v4753_v32, %v4118_v54 }
 0x43c   : > { %v4123_v12 = vsel %vm4116_vm7, %v4119_v2, %v4122_v25  ;;  %v3992_v33 = vor.u32 %v3991_v57, %v3990_v48  ;;  %v3995_v43 = vshll.u32 %v3994_v53, 23 }
 0x43d   : > { %v4124_v47 = vsel %vm4113_vm13, nan, %v4123_v12 }
 0x43e   : > { %4140 = vst.msk [vmem:[%s7192_s23 + $0x78] sm:$0xff] %vm255_vm0, %v4124_v47  ;;  %v3996_v21 = vor.u32 4788187, %v3995_v43  ;;  %v3999_v17 = vcvt.s32.f32 %v3992_v33 }
 0x440   : > { %v3997_v10 = vand.u32 2147483647, %v3996_v21 }
 0x442   : > { %v4000_v39 = vmul.f32 %v3999_v17, %v3997_v10 }
 0x444   : > { %v4001_v58 = vxor.u32 2147483648, %v4000_v39 }
 0x446   : > { %v4002_v20 = vsel %vm3919_vm9, %v4001_v58, %v4000_v39 }
 0x447   : > { %v4005_v41 = vsel %vm3918_vm3, %v8342_v27, %v4002_v20 }
 0x448   : > { %4756 = vcosq.f32 %v4005_v41 }
 0x449   : > { %4758 = vsinq.f32 %v4005_v41 }
 0x452   : > { %v4757_v59 = vpop.eup %4756 }
 0x453   : > { %v4759_v5 = vpop.eup %4758  ;;  %v4017_v37 = vxor.u32 2147483648, %v4757_v59 }
 0x454   : > { %v4014_v40 = vxor.u32 2147483648, %v4759_v5 }
 0x455   : > { %v4018_v7 = vsel %vm4016_vm6, %v4017_v37, %v4759_v5 }
 0x456   : > { %v4015_v15 = vsel %vm4013_vm4, %v4757_v59, %v4014_v40 }
 0x457   : > { %v4019_v6 = vsel %vm4012_vm5, %v4015_v15, %v4018_v7 }
 0x458   : > { %v4020_v56 = vsel %vm4009_vm10, nan, %v4019_v6 }
 0x459   : > { %4139 = vst.msk [vmem:[%s7192_s23 + $0x70] sm:$0xff] %vm255_vm0, %v4020_v56 }
 0x45a PF: > { %s15_s18 = sadd.s32 1, %s4784_s18  }
 0x45b   : > { %p12_p4 = scmp.ge.s32.totalorder %s15_s18, 4  }
 0x45d   :  { %14 = sbr.rel (!%p12_p4) target bundleno = 1 (0x1), region = 70 }

</bundles_post_ra>
